<compile_context>
chip_gen: v6e
topology: v6e:2x2x1
jax: 0.10.0
libtpu: 0.0.40
codegen_flags: <defaults>
</compile_context>

<pallas_src>
import jax
import jax.numpy as jnp
import numpy as np
from jax.experimental import pallas as pl
from jax.experimental.pallas import tpu as pltpu

VMEM = pltpu.MemorySpace.VMEM
SMEM = pltpu.MemorySpace.SMEM


# ----------------------------------------------------------------------------
# The single fused kernel
# ----------------------------------------------------------------------------
def _sapnet_kernel(data_ref, a_ref, mask_ref,
                   ew1, eb1, ew2, eb2, gw, gb, vw, vb,
                   r1, w1t, b1c, rp1, cp1,
                   r2, w2t, b2c, rp2, cp2,
                   fc1w, fc1b, rsfc, fc2w, fc2b,
                   logits_ref, div_ref, slab_ref):
    f32 = jnp.float32
    sz_c, gcn_nums, gh, _ = gw.shape
    B = mask_ref.shape[0]
    d_kv = vw.shape[2]
    kh = r1.shape[0]
    ph2 = fc1w.shape[0]

    def mm(a, b):
        return jnp.dot(a, b, preferred_element_type=f32)

    # ---- fea_embed: Linear -> Linear (no activation, matches nn.Sequential) ----
    h = mm(data_ref[...], ew1[...]) + eb1[...]
    h = mm(h, ew2[...]) + eb2[...]
    a_hat = a_ref[...]

    # ---- MultiGCNLayers: sz_c parallel stacks of dense GCN layers ----
    zs = []
    for c in range(sz_c):
        hc = h
        for l in range(gcn_nums):
            hc = jnp.maximum(mm(a_hat, mm(hc, gw[c, l])) + gb[c, l], 0.0)
        zs.append(hc)

    # ---- SimilarMeasure('mean'): mean |pairwise Pearson corr| across channels ----
    if sz_c > 1:                                   # guard sz_c==1 divide-by-zero
        cent, ssq = [], []
        for c in range(sz_c):
            zc = zs[c] - jnp.mean(zs[c])
            cent.append(zc)
            ssq.append(jnp.sum(zc * zc))
        acc = jnp.float32(0.0)
        for ci in range(sz_c):
            for cj in range(sz_c):
                if ci == cj:
                    continue
                corr = (jnp.sum(cent[ci] * cent[cj])
                        * jax.lax.rsqrt(ssq[ci] + 1e-8)
                        * jax.lax.rsqrt(ssq[cj] + 1e-8))
                acc = acc + jnp.abs(corr)
        div_ref[0, 0] = acc / float(sz_c * (sz_c - 1))
    else:
        div_ref[0, 0] = jnp.float32(0.0)

    # ---- VLRLayers: soft-assignment (VLAD-style) per-graph readout ----
    # slab layout per channel c: rows (b, kv), cols = gcn feature -> (B*d_kv, gh)
    for c in range(sz_c):
        s = mm(zs[c], vw[c]) + vb[c]
        s = s - jnp.max(s, axis=-1, keepdims=True)
        e = jnp.exp(s)
        assign = e / jnp.sum(e, axis=-1, keepdims=True)          # (N, d_kv)
        for b in range(B):
            masked = assign * mask_ref[b]                        # (N,d_kv)*(N,1)
            vlad = jax.lax.dot_general(
                masked, zs[c], (((0,), (0,)), ((), ())),
                preferred_element_type=f32)                      # (d_kv, gh)
            slab_ref[c, b * d_kv:(b + 1) * d_kv, :] = vlad

    # ---- LeNet1 head: conv5(relu)-pool2 x2, fc1(relu), fc2 ----
    # conv = sum over (channel, kernel-row) of row-shift-select @ Toeplitz-weight
    # matmuls; pooling = 0/1 row/col selection matmuls + elementwise max.
    acc = None
    for c in range(sz_c):
        sc = slab_ref[c]                                         # (B*d_kv, gh)
        for i in range(kh):
            t = mm(mm(r1[i], sc), w1t[c, i])
            acc = t if acc is None else acc + t
    y1 = jnp.maximum(acc + b1c[...], 0.0)                        # (B*OH1, OW1*OC1)

    m1 = jnp.maximum(mm(rp1[0], y1), mm(rp1[1], y1))             # pool rows
    p1 = jnp.maximum(mm(m1, cp1[0]), mm(m1, cp1[1]))             # pool cols

    acc = None
    for i in range(kh):
        t = mm(mm(r2[i], p1), w2t[i])
        acc = t if acc is None else acc + t
    y2 = jnp.maximum(acc + b2c[...], 0.0)                        # (B*OH2, OW2*OC2)

    m2 = jnp.maximum(mm(rp2[0], y2), mm(rp2[1], y2))
    p2 = jnp.maximum(mm(m2, cp2[0]), mm(m2, cp2[1]))             # (B*PH2, OC2)

    # fc1 with the NCHW flatten folded into per-row weight slices, then relu
    acc = None
    for p in range(ph2):
        t = mm(mm(rsfc[p], p2), fc1w[p])
        acc = t if acc is None else acc + t
    f1 = jnp.maximum(acc + fc1b[...], 0.0)

    logits_ref[...] = mm(f1, fc2w[...]) + fc2b[...]


# ----------------------------------------------------------------------------
# Host-side packing: stack GCN weights, build conv selection/Toeplitz matrices
# ----------------------------------------------------------------------------
_PACK_ORDER = ("ew1", "eb1", "ew2", "eb2", "gw", "gb", "vw", "vb",
               "r1", "w1t", "b1c", "rp1", "cp1",
               "r2", "w2t", "b2c", "rp2", "cp2",
               "fc1w", "fc1b", "rsfc", "fc2w", "fc2b")


def pack_params(params, *, B, sz_c, gcn_h, d_kv):
    kh = kw = 5
    H1, W1, C1 = d_kv, gcn_h, sz_c
    conv1_w = np.asarray(params["conv1_w"], np.float32)          # (OC1, C1, 5, 5)
    conv2_w = np.asarray(params["conv2_w"], np.float32)          # (OC2, C2, 5, 5)
    OC1 = conv1_w.shape[0]
    OH1, OW1 = H1 - kh + 1, W1 - kw + 1
    assert OH1 % 2 == 0 and OW1 % 2 == 0
    PH1, PW1 = OH1 // 2, OW1 // 2
    C2, H2, W2 = OC1, PH1, PW1
    OC2 = conv2_w.shape[0]
    OH2, OW2 = H2 - kh + 1, W2 - kw + 1
    assert OH2 % 2 == 0 and OW2 % 2 == 0
    PH2, PW2 = OH2 // 2, OW2 // 2

    # conv1 row-shift selectors and per-(channel, kernel-row) Toeplitz weights
    r1 = np.zeros((kh, B * OH1, B * H1), np.float32)
    for i in range(kh):
        for b in range(B):
            for oh in range(OH1):
                r1[i, b * OH1 + oh, b * H1 + oh + i] = 1.0
    w1t = np.zeros((C1, kh, W1, OW1 * OC1), np.float32)
    for c in range(C1):
        for i in range(kh):
            for ow in range(OW1):
                for j in range(kw):
                    w1t[c, i, ow + j, ow * OC1:(ow + 1) * OC1] = conv1_w[:, c, i, j]
    b1c = np.tile(np.asarray(params["conv1_b"], np.float32), OW1).reshape(1, -1)

    rp1 = np.zeros((2, B * PH1, B * OH1), np.float32)
    for dh in range(2):
        for b in range(B):
            for ph in range(PH1):
                rp1[dh, b * PH1 + ph, b * OH1 + 2 * ph + dh] = 1.0
    cp1 = np.zeros((2, OW1 * OC1, PW1 * OC1), np.float32)
    for dw in range(2):
        for pw in range(PW1):
            for oc in range(OC1):
                cp1[dw, (2 * pw + dw) * OC1 + oc, pw * OC1 + oc] = 1.0

    # conv2: input cols are (w2, c2) w-major (pool1 output layout)
    r2 = np.zeros((kh, B * OH2, B * H2), np.float32)
    for i in range(kh):
        for b in range(B):
            for oh in range(OH2):
                r2[i, b * OH2 + oh, b * H2 + oh + i] = 1.0
    w2t = np.zeros((kh, W2 * C2, OW2 * OC2), np.float32)
    for i in range(kh):
        for c in range(C2):
            for ow in range(OW2):
                for j in range(kw):
                    w2t[i, (ow + j) * C2 + c, ow * OC2:(ow + 1) * OC2] = conv2_w[:, c, i, j]
    b2c = np.tile(np.asarray(params["conv2_b"], np.float32), OW2).reshape(1, -1)

    rp2 = np.zeros((2, B * PH2, B * OH2), np.float32)
    for dh in range(2):
        for b in range(B):
            for ph in range(PH2):
                rp2[dh, b * PH2 + ph, b * OH2 + 2 * ph + dh] = 1.0
    cp2 = np.zeros((2, OW2 * OC2, PW2 * OC2), np.float32)
    for dw in range(2):
        for pw in range(PW2):
            for oc in range(OC2):
                cp2[dw, (2 * pw + dw) * OC2 + oc, pw * OC2 + oc] = 1.0

    # fc1 weight slices implementing the NCHW flatten (k = oc*PH2*PW2 + ph*PW2 + pw)
    fc1_w = np.asarray(params["fc1_w"], np.float32)
    n_hid = fc1_w.shape[1]
    fc1w = np.zeros((PH2, PW2 * OC2, n_hid), np.float32)
    for ph in range(PH2):
        for oc in range(OC2):
            for pw in range(PW2):
                fc1w[ph, pw * OC2 + oc, :] = fc1_w[oc * PH2 * PW2 + ph * PW2 + pw, :]
    rsfc = np.zeros((PH2, B, B * PH2), np.float32)
    for ph in range(PH2):
        for b in range(B):
            rsfc[ph, b, b * PH2 + ph] = 1.0

    gw = jnp.stack([jnp.stack(ws) for ws in params["gcn_w"]])
    gb = jnp.stack([jnp.stack([bb.reshape(1, -1) for bb in bs])
                    for bs in params["gcn_b"]])
    vw = jnp.stack(params["vlr_w"])
    vb = jnp.stack([bb.reshape(1, -1) for bb in params["vlr_b"]])

    return dict(
        ew1=params["emb_w1"], eb1=params["emb_b1"].reshape(1, -1),
        ew2=params["emb_w2"], eb2=params["emb_b2"].reshape(1, -1),
        gw=gw, gb=gb, vw=vw, vb=vb,
        r1=jnp.asarray(r1), w1t=jnp.asarray(w1t), b1c=jnp.asarray(b1c),
        rp1=jnp.asarray(rp1), cp1=jnp.asarray(cp1),
        r2=jnp.asarray(r2), w2t=jnp.asarray(w2t), b2c=jnp.asarray(b2c),
        rp2=jnp.asarray(rp2), cp2=jnp.asarray(cp2),
        fc1w=jnp.asarray(fc1w), fc1b=params["fc1_b"].reshape(1, -1),
        rsfc=jnp.asarray(rsfc),
        fc2w=params["fc2_w"], fc2b=params["fc2_b"].reshape(1, -1),
    )


def sapnet_forward(packed, data, a_hat, mask):
    """Single fused launch: returns (logits (B, out_dim), diversity loss scalar)."""
    N = data.shape[0]
    B = mask.shape[0]
    sz_c = packed["gw"].shape[0]
    gh = packed["gw"].shape[2]
    d_kv = packed["vw"].shape[2]
    out_dim = packed["fc2w"].shape[1]

    args = [data, a_hat, mask.reshape(B, N, 1)] + [packed[k] for k in _PACK_ORDER]
    logits, div = pl.pallas_call(
        _sapnet_kernel,
        out_shape=(jax.ShapeDtypeStruct((B, out_dim), jnp.float32),
                   jax.ShapeDtypeStruct((1, 1), jnp.float32)),
        in_specs=[pl.BlockSpec(memory_space=VMEM)] * len(args),
        out_specs=(pl.BlockSpec(memory_space=VMEM),
                   pl.BlockSpec(memory_space=SMEM)),
        scratch_shapes=[pltpu.VMEM((sz_c, B * d_kv, gh), jnp.float32)],
        compiler_params=pltpu.CompilerParams(vmem_limit_bytes=32 * 1024 * 1024),
    )(*args)
    return logits, div[0, 0]


# ----------------------------------------------------------------------------
# Graph preprocessing + deterministic parameter init (synthetic weights)
# ----------------------------------------------------------------------------
def normalized_adj(edge_index, n_nodes):
    src, dst = edge_index[0], edge_index[1]
    a = jnp.zeros((n_nodes, n_nodes), jnp.float32)
    a = a.at[src, dst].set(1.0)
    a = a.at[dst, src].set(1.0)
    a = a + jnp.eye(n_nodes, dtype=jnp.float32)
    d_inv_sqrt = 1.0 / jnp.sqrt(a.sum(axis=1))
    return a * d_inv_sqrt[:, None] * d_inv_sqrt[None, :]


def init_params(key, in_dim, gcn_h, sz_c, gcn_nums, d_kv, out_dim):
    keys = iter(jax.random.split(key, 256))

    def nrm(shape, scale=0.1):
        return scale * jax.random.normal(next(keys), shape, jnp.float32)

    p = {
        "emb_w1": nrm((in_dim, gcn_h)), "emb_b1": nrm((gcn_h,)),
        "emb_w2": nrm((gcn_h, gcn_h)), "emb_b2": nrm((gcn_h,)),
        "gcn_w": [[nrm((gcn_h, gcn_h)) for _ in range(gcn_nums)]
                  for _ in range(sz_c)],
        "gcn_b": [[nrm((gcn_h,)) for _ in range(gcn_nums)]
                  for _ in range(sz_c)],
        "vlr_w": [nrm((gcn_h, d_kv)) for _ in range(sz_c)],
        "vlr_b": [nrm((d_kv,)) for _ in range(sz_c)],
        "conv1_w": nrm((6, sz_c, 5, 5)), "conv1_b": nrm((6,)),
        "conv2_w": nrm((16, 6, 5, 5)), "conv2_b": nrm((16,)),
    }
    h1, w1 = (d_kv - 4) // 2, (gcn_h - 4) // 2
    h2, w2 = (h1 - 4) // 2, (w1 - 4) // 2
    flat = 16 * h2 * w2
    p["fc1_w"] = nrm((flat, 120)); p["fc1_b"] = nrm((120,))
    p["fc2_w"] = nrm((120, out_dim)); p["fc2_b"] = nrm((out_dim,))
    return p


# ----------------------------------------------------------------------------
if __name__ == "__main__":
    in_dim, out_dim = 8, 3
    h_dim, sz_c = 32, 2
    gcn_h = h_dim // sz_c          # 16 (g_name='GCN' -> h_dim // sz_c)
    gcn_nums = 2
    d_kv = 32
    n_graphs = 2
    nodes_per_graph = 8
    n_nodes = n_graphs * nodes_per_graph   # 16

    key = jax.random.PRNGKey(0)
    data = jax.random.normal(key, (n_nodes, in_dim), jnp.float32)

    # edge_index: a ring inside each graph (block-diagonal adjacency)
    src, dst = [], []
    for g in range(n_graphs):
        for i in range(nodes_per_graph):
            src.append(g * nodes_per_graph + i)
            dst.append(g * nodes_per_graph + (i + 1) % nodes_per_graph)
    edge_index = jnp.array([src, dst], dtype=jnp.int32)
    batch = jnp.array([g for g in range(n_graphs)
                       for _ in range(nodes_per_graph)], dtype=jnp.int32)

    a_hat = normalized_adj(edge_index, n_nodes)
    mask = (batch[None, :] == jnp.arange(n_graphs)[:, None]).astype(jnp.float32)

    params = init_params(jax.random.PRNGKey(42), in_dim, gcn_h, sz_c,
                         gcn_nums, d_kv, out_dim)
    packed = pack_params(params, B=n_graphs, sz_c=sz_c, gcn_h=gcn_h, d_kv=d_kv)

    logits, div_loss = sapnet_forward(packed, data, a_hat, mask)
    jax.block_until_ready((logits, div_loss))
    assert logits.shape == (n_graphs, out_dim)
    assert bool(jnp.isfinite(logits).all()) and bool(jnp.isfinite(div_loss))
    print("KERNEL_OK")
</pallas_src>

<mosaic_0001>
module attributes {stable_mosaic.version = 11 : i64} {
  func.func @_sapnet_kernel(%arg0: memref<16x8xf32, #tpu.memory_space<vmem>>, %arg1: memref<16x16xf32, #tpu.memory_space<vmem>>, %arg2: memref<2x16x1xf32, #tpu.memory_space<vmem>>, %arg3: memref<8x16xf32, #tpu.memory_space<vmem>>, %arg4: memref<1x16xf32, #tpu.memory_space<vmem>>, %arg5: memref<16x16xf32, #tpu.memory_space<vmem>>, %arg6: memref<1x16xf32, #tpu.memory_space<vmem>>, %arg7: memref<2x2x16x16xf32, #tpu.memory_space<vmem>>, %arg8: memref<2x2x1x16xf32, #tpu.memory_space<vmem>>, %arg9: memref<2x16x32xf32, #tpu.memory_space<vmem>>, %arg10: memref<2x1x32xf32, #tpu.memory_space<vmem>>, %arg11: memref<5x56x64xf32, #tpu.memory_space<vmem>>, %arg12: memref<2x5x16x72xf32, #tpu.memory_space<vmem>>, %arg13: memref<1x72xf32, #tpu.memory_space<vmem>>, %arg14: memref<2x28x56xf32, #tpu.memory_space<vmem>>, %arg15: memref<2x72x36xf32, #tpu.memory_space<vmem>>, %arg16: memref<5x20x28xf32, #tpu.memory_space<vmem>>, %arg17: memref<5x36x32xf32, #tpu.memory_space<vmem>>, %arg18: memref<1x32xf32, #tpu.memory_space<vmem>>, %arg19: memref<2x10x20xf32, #tpu.memory_space<vmem>>, %arg20: memref<2x32x16xf32, #tpu.memory_space<vmem>>, %arg21: memref<5x16x120xf32, #tpu.memory_space<vmem>>, %arg22: memref<1x120xf32, #tpu.memory_space<vmem>>, %arg23: memref<5x2x10xf32, #tpu.memory_space<vmem>>, %arg24: memref<120x3xf32, #tpu.memory_space<vmem>>, %arg25: memref<1x3xf32, #tpu.memory_space<vmem>>, %arg26: memref<2x3xf32, #tpu.memory_space<vmem>>, %arg27: memref<1x1xf32, #tpu.memory_space<smem>>, %arg28: memref<2x64x16xf32, #tpu.memory_space<vmem>>) attributes {dimension_semantics = [], scalar_prefetch = 0 : i64, scratch_operands = 1 : i64, tpu.core_type = #tpu.core_type<tc>} {
    %c0 = arith.constant 0 : index
    %c0_0 = arith.constant 0 : index
    %0 = vector.load %arg0[%c0, %c0_0] : memref<16x8xf32, #tpu.memory_space<vmem>>, vector<16x8xf32>
    %c0_1 = arith.constant 0 : index
    %c0_2 = arith.constant 0 : index
    %1 = vector.load %arg3[%c0_1, %c0_2] : memref<8x16xf32, #tpu.memory_space<vmem>>, vector<8x16xf32>
    %cst = arith.constant dense<0.000000e+00> : vector<16x16xf32>
    %2 = tpu.matmul %0, %1, %cst {dimension_numbers = #tpu.dot_dimension_numbers<[1], [0], [0], [1], [0, 0, 1, 1], [], []>} : vector<16x8xf32>, vector<8x16xf32>, vector<16x16xf32> -> vector<16x16xf32>
    %c0_3 = arith.constant 0 : index
    %c0_4 = arith.constant 0 : index
    %3 = vector.load %arg4[%c0_3, %c0_4] : memref<1x16xf32, #tpu.memory_space<vmem>>, vector<1x16xf32>
    %4 = vector.broadcast %3 : vector<1x16xf32> to vector<16x16xf32>
    %5 = arith.addf %2, %4 : vector<16x16xf32>
    %c0_5 = arith.constant 0 : index
    %c0_6 = arith.constant 0 : index
    %6 = vector.load %arg5[%c0_5, %c0_6] : memref<16x16xf32, #tpu.memory_space<vmem>>, vector<16x16xf32>
    %cst_7 = arith.constant dense<0.000000e+00> : vector<16x16xf32>
    %7 = tpu.matmul %5, %6, %cst_7 {dimension_numbers = #tpu.dot_dimension_numbers<[1], [0], [0], [1], [0, 0, 1, 1], [], []>} : vector<16x16xf32>, vector<16x16xf32>, vector<16x16xf32> -> vector<16x16xf32>
    %c0_8 = arith.constant 0 : index
    %c0_9 = arith.constant 0 : index
    %8 = vector.load %arg6[%c0_8, %c0_9] : memref<1x16xf32, #tpu.memory_space<vmem>>, vector<1x16xf32>
    %9 = vector.broadcast %8 : vector<1x16xf32> to vector<16x16xf32>
    %10 = arith.addf %7, %9 : vector<16x16xf32>
    %c0_10 = arith.constant 0 : index
    %c0_11 = arith.constant 0 : index
    %11 = vector.load %arg1[%c0_10, %c0_11] : memref<16x16xf32, #tpu.memory_space<vmem>>, vector<16x16xf32>
    %c0_12 = arith.constant 0 : index
    %c0_13 = arith.constant 0 : index
    %c0_14 = arith.constant 0 : index
    %c0_15 = arith.constant 0 : index
    %12 = vector.load %arg7[%c0_12, %c0_13, %c0_14, %c0_15] : memref<2x2x16x16xf32, #tpu.memory_space<vmem>>, vector<1x1x16x16xf32>
    %13 = vector.shape_cast %12 : vector<1x1x16x16xf32> to vector<16x16xf32>
    %cst_16 = arith.constant dense<0.000000e+00> : vector<16x16xf32>
    %14 = tpu.matmul %10, %13, %cst_16 {dimension_numbers = #tpu.dot_dimension_numbers<[1], [0], [0], [1], [0, 0, 1, 1], [], []>} : vector<16x16xf32>, vector<16x16xf32>, vector<16x16xf32> -> vector<16x16xf32>
    %cst_17 = arith.constant dense<0.000000e+00> : vector<16x16xf32>
    %15 = tpu.matmul %11, %14, %cst_17 {dimension_numbers = #tpu.dot_dimension_numbers<[1], [0], [0], [1], [0, 0, 1, 1], [], []>} : vector<16x16xf32>, vector<16x16xf32>, vector<16x16xf32> -> vector<16x16xf32>
    %c0_18 = arith.constant 0 : index
    %c0_19 = arith.constant 0 : index
    %c0_20 = arith.constant 0 : index
    %c0_21 = arith.constant 0 : index
    %16 = vector.load %arg8[%c0_18, %c0_19, %c0_20, %c0_21] : memref<2x2x1x16xf32, #tpu.memory_space<vmem>>, vector<1x1x1x16xf32>
    %17 = vector.shape_cast %16 : vector<1x1x1x16xf32> to vector<1x16xf32>
    %18 = vector.broadcast %17 : vector<1x16xf32> to vector<16x16xf32>
    %19 = arith.addf %15, %18 : vector<16x16xf32>
    %cst_22 = arith.constant 0.000000e+00 : f32
    %20 = vector.broadcast %cst_22 : f32 to vector<16x16xf32>
    %21 = arith.maximumf %19, %20 : vector<16x16xf32>
    %c0_23 = arith.constant 0 : index
    %c1 = arith.constant 1 : index
    %c0_24 = arith.constant 0 : index
    %c0_25 = arith.constant 0 : index
    %22 = vector.load %arg7[%c0_23, %c1, %c0_24, %c0_25] : memref<2x2x16x16xf32, #tpu.memory_space<vmem>>, vector<1x1x16x16xf32>
    %23 = vector.shape_cast %22 : vector<1x1x16x16xf32> to vector<16x16xf32>
    %cst_26 = arith.constant dense<0.000000e+00> : vector<16x16xf32>
    %24 = tpu.matmul %21, %23, %cst_26 {dimension_numbers = #tpu.dot_dimension_numbers<[1], [0], [0], [1], [0, 0, 1, 1], [], []>} : vector<16x16xf32>, vector<16x16xf32>, vector<16x16xf32> -> vector<16x16xf32>
    %cst_27 = arith.constant dense<0.000000e+00> : vector<16x16xf32>
    %25 = tpu.matmul %11, %24, %cst_27 {dimension_numbers = #tpu.dot_dimension_numbers<[1], [0], [0], [1], [0, 0, 1, 1], [], []>} : vector<16x16xf32>, vector<16x16xf32>, vector<16x16xf32> -> vector<16x16xf32>
    %c0_28 = arith.constant 0 : index
    %c1_29 = arith.constant 1 : index
    %c0_30 = arith.constant 0 : index
    %c0_31 = arith.constant 0 : index
    %26 = vector.load %arg8[%c0_28, %c1_29, %c0_30, %c0_31] : memref<2x2x1x16xf32, #tpu.memory_space<vmem>>, vector<1x1x1x16xf32>
    %27 = vector.shape_cast %26 : vector<1x1x1x16xf32> to vector<1x16xf32>
    %28 = vector.broadcast %27 : vector<1x16xf32> to vector<16x16xf32>
    %29 = arith.addf %25, %28 : vector<16x16xf32>
    %cst_32 = arith.constant 0.000000e+00 : f32
    %30 = vector.broadcast %cst_32 : f32 to vector<16x16xf32>
    %31 = arith.maximumf %29, %30 : vector<16x16xf32>
    %c1_33 = arith.constant 1 : index
    %c0_34 = arith.constant 0 : index
    %c0_35 = arith.constant 0 : index
    %c0_36 = arith.constant 0 : index
    %32 = vector.load %arg7[%c1_33, %c0_34, %c0_35, %c0_36] : memref<2x2x16x16xf32, #tpu.memory_space<vmem>>, vector<1x1x16x16xf32>
    %33 = vector.shape_cast %32 : vector<1x1x16x16xf32> to vector<16x16xf32>
    %cst_37 = arith.constant dense<0.000000e+00> : vector<16x16xf32>
    %34 = tpu.matmul %10, %33, %cst_37 {dimension_numbers = #tpu.dot_dimension_numbers<[1], [0], [0], [1], [0, 0, 1, 1], [], []>} : vector<16x16xf32>, vector<16x16xf32>, vector<16x16xf32> -> vector<16x16xf32>
    %cst_38 = arith.constant dense<0.000000e+00> : vector<16x16xf32>
    %35 = tpu.matmul %11, %34, %cst_38 {dimension_numbers = #tpu.dot_dimension_numbers<[1], [0], [0], [1], [0, 0, 1, 1], [], []>} : vector<16x16xf32>, vector<16x16xf32>, vector<16x16xf32> -> vector<16x16xf32>
    %c1_39 = arith.constant 1 : index
    %c0_40 = arith.constant 0 : index
    %c0_41 = arith.constant 0 : index
    %c0_42 = arith.constant 0 : index
    %36 = vector.load %arg8[%c1_39, %c0_40, %c0_41, %c0_42] : memref<2x2x1x16xf32, #tpu.memory_space<vmem>>, vector<1x1x1x16xf32>
    %37 = vector.shape_cast %36 : vector<1x1x1x16xf32> to vector<1x16xf32>
    %38 = vector.broadcast %37 : vector<1x16xf32> to vector<16x16xf32>
    %39 = arith.addf %35, %38 : vector<16x16xf32>
    %cst_43 = arith.constant 0.000000e+00 : f32
    %40 = vector.broadcast %cst_43 : f32 to vector<16x16xf32>
    %41 = arith.maximumf %39, %40 : vector<16x16xf32>
    %c1_44 = arith.constant 1 : index
    %c1_45 = arith.constant 1 : index
    %c0_46 = arith.constant 0 : index
    %c0_47 = arith.constant 0 : index
    %42 = vector.load %arg7[%c1_44, %c1_45, %c0_46, %c0_47] : memref<2x2x16x16xf32, #tpu.memory_space<vmem>>, vector<1x1x16x16xf32>
    %43 = vector.shape_cast %42 : vector<1x1x16x16xf32> to vector<16x16xf32>
    %cst_48 = arith.constant dense<0.000000e+00> : vector<16x16xf32>
    %44 = tpu.matmul %41, %43, %cst_48 {dimension_numbers = #tpu.dot_dimension_numbers<[1], [0], [0], [1], [0, 0, 1, 1], [], []>} : vector<16x16xf32>, vector<16x16xf32>, vector<16x16xf32> -> vector<16x16xf32>
    %cst_49 = arith.constant dense<0.000000e+00> : vector<16x16xf32>
    %45 = tpu.matmul %11, %44, %cst_49 {dimension_numbers = #tpu.dot_dimension_numbers<[1], [0], [0], [1], [0, 0, 1, 1], [], []>} : vector<16x16xf32>, vector<16x16xf32>, vector<16x16xf32> -> vector<16x16xf32>
    %c1_50 = arith.constant 1 : index
    %c1_51 = arith.constant 1 : index
    %c0_52 = arith.constant 0 : index
    %c0_53 = arith.constant 0 : index
    %46 = vector.load %arg8[%c1_50, %c1_51, %c0_52, %c0_53] : memref<2x2x1x16xf32, #tpu.memory_space<vmem>>, vector<1x1x1x16xf32>
    %47 = vector.shape_cast %46 : vector<1x1x1x16xf32> to vector<1x16xf32>
    %48 = vector.broadcast %47 : vector<1x16xf32> to vector<16x16xf32>
    %49 = arith.addf %45, %48 : vector<16x16xf32>
    %cst_54 = arith.constant 0.000000e+00 : f32
    %50 = vector.broadcast %cst_54 : f32 to vector<16x16xf32>
    %51 = arith.maximumf %49, %50 : vector<16x16xf32>
    %52 = vector.shape_cast %31 : vector<16x16xf32> to vector<1x16x16xf32>
    %cst_55 = arith.constant dense<0.000000e+00> : vector<1xf32>
    %53 = vector.multi_reduction <add>, %52, %cst_55 [1, 2] : vector<1x16x16xf32> to vector<1xf32>
    %54 = vector.shape_cast %53 : vector<1xf32> to vector<1x1x1xf32>
    %55 = vector.extract %54[0, 0, 0] : f32 from vector<1x1x1xf32>
    %cst_56 = arith.constant 2.560000e+02 : f32
    %56 = arith.divf %55, %cst_56 : f32
    %57 = vector.broadcast %56 : f32 to vector<16x16xf32>
    %58 = arith.subf %31, %57 : vector<16x16xf32>
    %59 = arith.mulf %58, %58 : vector<16x16xf32>
    %60 = vector.shape_cast %59 : vector<16x16xf32> to vector<1x16x16xf32>
    %cst_57 = arith.constant dense<0.000000e+00> : vector<1xf32>
    %61 = vector.multi_reduction <add>, %60, %cst_57 [1, 2] : vector<1x16x16xf32> to vector<1xf32>
    %62 = vector.shape_cast %61 : vector<1xf32> to vector<1x1x1xf32>
    %63 = vector.extract %62[0, 0, 0] : f32 from vector<1x1x1xf32>
    %64 = vector.shape_cast %51 : vector<16x16xf32> to vector<1x16x16xf32>
    %cst_58 = arith.constant dense<0.000000e+00> : vector<1xf32>
    %65 = vector.multi_reduction <add>, %64, %cst_58 [1, 2] : vector<1x16x16xf32> to vector<1xf32>
    %66 = vector.shape_cast %65 : vector<1xf32> to vector<1x1x1xf32>
    %67 = vector.extract %66[0, 0, 0] : f32 from vector<1x1x1xf32>
    %cst_59 = arith.constant 2.560000e+02 : f32
    %68 = arith.divf %67, %cst_59 : f32
    %69 = vector.broadcast %68 : f32 to vector<16x16xf32>
    %70 = arith.subf %51, %69 : vector<16x16xf32>
    %71 = arith.mulf %70, %70 : vector<16x16xf32>
    %72 = vector.shape_cast %71 : vector<16x16xf32> to vector<1x16x16xf32>
    %cst_60 = arith.constant dense<0.000000e+00> : vector<1xf32>
    %73 = vector.multi_reduction <add>, %72, %cst_60 [1, 2] : vector<1x16x16xf32> to vector<1xf32>
    %74 = vector.shape_cast %73 : vector<1xf32> to vector<1x1x1xf32>
    %75 = vector.extract %74[0, 0, 0] : f32 from vector<1x1x1xf32>
    %76 = arith.mulf %58, %70 : vector<16x16xf32>
    %77 = vector.shape_cast %76 : vector<16x16xf32> to vector<1x16x16xf32>
    %cst_61 = arith.constant dense<0.000000e+00> : vector<1xf32>
    %78 = vector.multi_reduction <add>, %77, %cst_61 [1, 2] : vector<1x16x16xf32> to vector<1xf32>
    %79 = vector.shape_cast %78 : vector<1xf32> to vector<1x1x1xf32>
    %80 = vector.extract %79[0, 0, 0] : f32 from vector<1x1x1xf32>
    %cst_62 = arith.constant 9.99999993E-9 : f32
    %81 = arith.addf %63, %cst_62 : f32
    %82 = math.rsqrt %81 : f32
    %83 = arith.mulf %80, %82 : f32
    %cst_63 = arith.constant 9.99999993E-9 : f32
    %84 = arith.addf %75, %cst_63 : f32
    %85 = math.rsqrt %84 : f32
    %86 = arith.mulf %83, %85 : f32
    %87 = math.absf %86 : f32
    %cst_64 = arith.constant 0.000000e+00 : f32
    %88 = arith.addf %cst_64, %87 : f32
    %89 = arith.mulf %70, %58 : vector<16x16xf32>
    %90 = vector.shape_cast %89 : vector<16x16xf32> to vector<1x16x16xf32>
    %cst_65 = arith.constant dense<0.000000e+00> : vector<1xf32>
    %91 = vector.multi_reduction <add>, %90, %cst_65 [1, 2] : vector<1x16x16xf32> to vector<1xf32>
    %92 = vector.shape_cast %91 : vector<1xf32> to vector<1x1x1xf32>
    %93 = vector.extract %92[0, 0, 0] : f32 from vector<1x1x1xf32>
    %cst_66 = arith.constant 9.99999993E-9 : f32
    %94 = arith.addf %75, %cst_66 : f32
    %95 = math.rsqrt %94 : f32
    %96 = arith.mulf %93, %95 : f32
    %cst_67 = arith.constant 9.99999993E-9 : f32
    %97 = arith.addf %63, %cst_67 : f32
    %98 = math.rsqrt %97 : f32
    %99 = arith.mulf %96, %98 : f32
    %100 = math.absf %99 : f32
    %101 = arith.addf %88, %100 : f32
    %cst_68 = arith.constant 2.000000e+00 : f32
    %102 = arith.divf %101, %cst_68 : f32
    %c0_69 = arith.constant 0 : index
    %c0_70 = arith.constant 0 : index
    %103 = memref.load %arg27[%c0_69, %c0_70] : memref<1x1xf32, #tpu.memory_space<smem>>
    memref.store %102, %arg27[%c0_69, %c0_70] : memref<1x1xf32, #tpu.memory_space<smem>>
    %c0_71 = arith.constant 0 : index
    %c0_72 = arith.constant 0 : index
    %c0_73 = arith.constant 0 : index
    %104 = vector.load %arg9[%c0_71, %c0_72, %c0_73] : memref<2x16x32xf32, #tpu.memory_space<vmem>>, vector<1x16x32xf32>
    %105 = vector.shape_cast %104 : vector<1x16x32xf32> to vector<16x32xf32>
    %cst_74 = arith.constant dense<0.000000e+00> : vector<16x32xf32>
    %106 = tpu.matmul %31, %105, %cst_74 {dimension_numbers = #tpu.dot_dimension_numbers<[1], [0], [0], [1], [0, 0, 1, 1], [], []>} : vector<16x16xf32>, vector<16x32xf32>, vector<16x32xf32> -> vector<16x32xf32>
    %c0_75 = arith.constant 0 : index
    %c0_76 = arith.constant 0 : index
    %c0_77 = arith.constant 0 : index
    %107 = vector.load %arg10[%c0_75, %c0_76, %c0_77] : memref<2x1x32xf32, #tpu.memory_space<vmem>>, vector<1x1x32xf32>
    %108 = vector.shape_cast %107 : vector<1x1x32xf32> to vector<1x32xf32>
    %109 = vector.broadcast %108 : vector<1x32xf32> to vector<16x32xf32>
    %110 = arith.addf %106, %109 : vector<16x32xf32>
    %cst_78 = arith.constant dense<0xFF800000> : vector<16xf32>
    %111 = vector.multi_reduction <maximumf>, %110, %cst_78 [1] : vector<16x32xf32> to vector<16xf32>
    %112 = vector.shape_cast %111 : vector<16xf32> to vector<16x1xf32>
    %113 = vector.broadcast %112 : vector<16x1xf32> to vector<16x32xf32>
    %114 = arith.subf %110, %113 : vector<16x32xf32>
    %115 = math.exp %114 : vector<16x32xf32>
    %cst_79 = arith.constant dense<0.000000e+00> : vector<16xf32>
    %116 = vector.multi_reduction <add>, %115, %cst_79 [1] : vector<16x32xf32> to vector<16xf32>
    %117 = vector.shape_cast %116 : vector<16xf32> to vector<16x1xf32>
    %118 = vector.broadcast %117 : vector<16x1xf32> to vector<16x32xf32>
    %119 = arith.divf %115, %118 : vector<16x32xf32>
    %c0_80 = arith.constant 0 : index
    %c0_81 = arith.constant 0 : index
    %c0_82 = arith.constant 0 : index
    %120 = vector.load %arg2[%c0_80, %c0_81, %c0_82] : memref<2x16x1xf32, #tpu.memory_space<vmem>>, vector<1x16x1xf32>
    %121 = vector.shape_cast %120 : vector<1x16x1xf32> to vector<16x1xf32>
    %122 = vector.broadcast %121 : vector<16x1xf32> to vector<16x32xf32>
    %123 = arith.mulf %119, %122 : vector<16x32xf32>
    %cst_83 = arith.constant dense<0.000000e+00> : vector<32x16xf32>
    %124 = tpu.matmul %123, %31, %cst_83 {dimension_numbers = #tpu.dot_dimension_numbers<[0], [0], [1], [1], [0, 1, 1, 1], [], []>} : vector<16x32xf32>, vector<16x16xf32>, vector<32x16xf32> -> vector<32x16xf32>
    %c0_84 = arith.constant 0 : index
    %c0_85 = arith.constant 0 : index
    %c0_86 = arith.constant 0 : index
    %125 = vector.load %arg28[%c0_84, %c0_85, %c0_86] : memref<2x64x16xf32, #tpu.memory_space<vmem>>, vector<1x32x16xf32>
    %126 = vector.shape_cast %125 : vector<1x32x16xf32> to vector<32x16xf32>
    %127 = vector.shape_cast %124 : vector<32x16xf32> to vector<1x32x16xf32>
    tpu.vector_store %arg28[%c0_84, %c0_85, %c0_86], %127 {strides = array<i32>} : memref<2x64x16xf32, #tpu.memory_space<vmem>>, vector<1x32x16xf32>,
    %c1_87 = arith.constant 1 : index
    %c0_88 = arith.constant 0 : index
    %c0_89 = arith.constant 0 : index
    %128 = vector.load %arg2[%c1_87, %c0_88, %c0_89] : memref<2x16x1xf32, #tpu.memory_space<vmem>>, vector<1x16x1xf32>
    %129 = vector.shape_cast %128 : vector<1x16x1xf32> to vector<16x1xf32>
    %130 = vector.broadcast %129 : vector<16x1xf32> to vector<16x32xf32>
    %131 = arith.mulf %119, %130 : vector<16x32xf32>
    %cst_90 = arith.constant dense<0.000000e+00> : vector<32x16xf32>
    %132 = tpu.matmul %131, %31, %cst_90 {dimension_numbers = #tpu.dot_dimension_numbers<[0], [0], [1], [1], [0, 1, 1, 1], [], []>} : vector<16x32xf32>, vector<16x16xf32>, vector<32x16xf32> -> vector<32x16xf32>
    %c0_91 = arith.constant 0 : index
    %c32 = arith.constant 32 : index
    %c0_92 = arith.constant 0 : index
    %133 = vector.load %arg28[%c0_91, %c32, %c0_92] : memref<2x64x16xf32, #tpu.memory_space<vmem>>, vector<1x32x16xf32>
    %134 = vector.shape_cast %133 : vector<1x32x16xf32> to vector<32x16xf32>
    %135 = vector.shape_cast %132 : vector<32x16xf32> to vector<1x32x16xf32>
    tpu.vector_store %arg28[%c0_91, %c32, %c0_92], %135 {strides = array<i32>} : memref<2x64x16xf32, #tpu.memory_space<vmem>>, vector<1x32x16xf32>,
    %c1_93 = arith.constant 1 : index
    %c0_94 = arith.constant 0 : index
    %c0_95 = arith.constant 0 : index
    %136 = vector.load %arg9[%c1_93, %c0_94, %c0_95] : memref<2x16x32xf32, #tpu.memory_space<vmem>>, vector<1x16x32xf32>
    %137 = vector.shape_cast %136 : vector<1x16x32xf32> to vector<16x32xf32>
    %cst_96 = arith.constant dense<0.000000e+00> : vector<16x32xf32>
    %138 = tpu.matmul %51, %137, %cst_96 {dimension_numbers = #tpu.dot_dimension_numbers<[1], [0], [0], [1], [0, 0, 1, 1], [], []>} : vector<16x16xf32>, vector<16x32xf32>, vector<16x32xf32> -> vector<16x32xf32>
    %c1_97 = arith.constant 1 : index
    %c0_98 = arith.constant 0 : index
    %c0_99 = arith.constant 0 : index
    %139 = vector.load %arg10[%c1_97, %c0_98, %c0_99] : memref<2x1x32xf32, #tpu.memory_space<vmem>>, vector<1x1x32xf32>
    %140 = vector.shape_cast %139 : vector<1x1x32xf32> to vector<1x32xf32>
    %141 = vector.broadcast %140 : vector<1x32xf32> to vector<16x32xf32>
    %142 = arith.addf %138, %141 : vector<16x32xf32>
    %cst_100 = arith.constant dense<0xFF800000> : vector<16xf32>
    %143 = vector.multi_reduction <maximumf>, %142, %cst_100 [1] : vector<16x32xf32> to vector<16xf32>
    %144 = vector.shape_cast %143 : vector<16xf32> to vector<16x1xf32>
    %145 = vector.broadcast %144 : vector<16x1xf32> to vector<16x32xf32>
    %146 = arith.subf %142, %145 : vector<16x32xf32>
    %147 = math.exp %146 : vector<16x32xf32>
    %cst_101 = arith.constant dense<0.000000e+00> : vector<16xf32>
    %148 = vector.multi_reduction <add>, %147, %cst_101 [1] : vector<16x32xf32> to vector<16xf32>
    %149 = vector.shape_cast %148 : vector<16xf32> to vector<16x1xf32>
    %150 = vector.broadcast %149 : vector<16x1xf32> to vector<16x32xf32>
    %151 = arith.divf %147, %150 : vector<16x32xf32>
    %c0_102 = arith.constant 0 : index
    %c0_103 = arith.constant 0 : index
    %c0_104 = arith.constant 0 : index
    %152 = vector.load %arg2[%c0_102, %c0_103, %c0_104] : memref<2x16x1xf32, #tpu.memory_space<vmem>>, vector<1x16x1xf32>
    %153 = vector.shape_cast %152 : vector<1x16x1xf32> to vector<16x1xf32>
    %154 = vector.broadcast %153 : vector<16x1xf32> to vector<16x32xf32>
    %155 = arith.mulf %151, %154 : vector<16x32xf32>
    %cst_105 = arith.constant dense<0.000000e+00> : vector<32x16xf32>
    %156 = tpu.matmul %155, %51, %cst_105 {dimension_numbers = #tpu.dot_dimension_numbers<[0], [0], [1], [1], [0, 1, 1, 1], [], []>} : vector<16x32xf32>, vector<16x16xf32>, vector<32x16xf32> -> vector<32x16xf32>
    %c1_106 = arith.constant 1 : index
    %c0_107 = arith.constant 0 : index
    %c0_108 = arith.constant 0 : index
    %157 = vector.load %arg28[%c1_106, %c0_107, %c0_108] : memref<2x64x16xf32, #tpu.memory_space<vmem>>, vector<1x32x16xf32>
    %158 = vector.shape_cast %157 : vector<1x32x16xf32> to vector<32x16xf32>
    %159 = vector.shape_cast %156 : vector<32x16xf32> to vector<1x32x16xf32>
    tpu.vector_store %arg28[%c1_106, %c0_107, %c0_108], %159 {strides = array<i32>} : memref<2x64x16xf32, #tpu.memory_space<vmem>>, vector<1x32x16xf32>,
    %c1_109 = arith.constant 1 : index
    %c0_110 = arith.constant 0 : index
    %c0_111 = arith.constant 0 : index
    %160 = vector.load %arg2[%c1_109, %c0_110, %c0_111] : memref<2x16x1xf32, #tpu.memory_space<vmem>>, vector<1x16x1xf32>
    %161 = vector.shape_cast %160 : vector<1x16x1xf32> to vector<16x1xf32>
    %162 = vector.broadcast %161 : vector<16x1xf32> to vector<16x32xf32>
    %163 = arith.mulf %151, %162 : vector<16x32xf32>
    %cst_112 = arith.constant dense<0.000000e+00> : vector<32x16xf32>
    %164 = tpu.matmul %163, %51, %cst_112 {dimension_numbers = #tpu.dot_dimension_numbers<[0], [0], [1], [1], [0, 1, 1, 1], [], []>} : vector<16x32xf32>, vector<16x16xf32>, vector<32x16xf32> -> vector<32x16xf32>
    %c1_113 = arith.constant 1 : index
    %c32_114 = arith.constant 32 : index
    %c0_115 = arith.constant 0 : index
    %165 = vector.load %arg28[%c1_113, %c32_114, %c0_115] : memref<2x64x16xf32, #tpu.memory_space<vmem>>, vector<1x32x16xf32>
    %166 = vector.shape_cast %165 : vector<1x32x16xf32> to vector<32x16xf32>
    %167 = vector.shape_cast %164 : vector<32x16xf32> to vector<1x32x16xf32>
    tpu.vector_store %arg28[%c1_113, %c32_114, %c0_115], %167 {strides = array<i32>} : memref<2x64x16xf32, #tpu.memory_space<vmem>>, vector<1x32x16xf32>,
    %c0_116 = arith.constant 0 : index
    %c0_117 = arith.constant 0 : index
    %c0_118 = arith.constant 0 : index
    %168 = vector.load %arg28[%c0_116, %c0_117, %c0_118] : memref<2x64x16xf32, #tpu.memory_space<vmem>>, vector<1x64x16xf32>
    %169 = vector.shape_cast %168 : vector<1x64x16xf32> to vector<64x16xf32>
    %c0_119 = arith.constant 0 : index
    %c0_120 = arith.constant 0 : index
    %c0_121 = arith.constant 0 : index
    %170 = vector.load %arg11[%c0_119, %c0_120, %c0_121] : memref<5x56x64xf32, #tpu.memory_space<vmem>>, vector<1x56x64xf32>
    %171 = vector.shape_cast %170 : vector<1x56x64xf32> to vector<56x64xf32>
    %cst_122 = arith.constant dense<0.000000e+00> : vector<56x16xf32>
    %172 = tpu.matmul %171, %169, %cst_122 {dimension_numbers = #tpu.dot_dimension_numbers<[1], [0], [0], [1], [0, 0, 1, 1], [], []>} : vector<56x64xf32>, vector<64x16xf32>, vector<56x16xf32> -> vector<56x16xf32>
    %c0_123 = arith.constant 0 : index
    %c0_124 = arith.constant 0 : index
    %c0_125 = arith.constant 0 : index
    %c0_126 = arith.constant 0 : index
    %173 = vector.load %arg12[%c0_123, %c0_124, %c0_125, %c0_126] : memref<2x5x16x72xf32, #tpu.memory_space<vmem>>, vector<1x1x16x72xf32>
    %174 = vector.shape_cast %173 : vector<1x1x16x72xf32> to vector<16x72xf32>
    %cst_127 = arith.constant dense<0.000000e+00> : vector<56x72xf32>
    %175 = tpu.matmul %172, %174, %cst_127 {dimension_numbers = #tpu.dot_dimension_numbers<[1], [0], [0], [1], [0, 0, 1, 1], [], []>} : vector<56x16xf32>, vector<16x72xf32>, vector<56x72xf32> -> vector<56x72xf32>
    %c1_128 = arith.constant 1 : index
    %c0_129 = arith.constant 0 : index
    %c0_130 = arith.constant 0 : index
    %176 = vector.load %arg11[%c1_128, %c0_129, %c0_130] : memref<5x56x64xf32, #tpu.memory_space<vmem>>, vector<1x56x64xf32>
    %177 = vector.shape_cast %176 : vector<1x56x64xf32> to vector<56x64xf32>
    %cst_131 = arith.constant dense<0.000000e+00> : vector<56x16xf32>
    %178 = tpu.matmul %177, %169, %cst_131 {dimension_numbers = #tpu.dot_dimension_numbers<[1], [0], [0], [1], [0, 0, 1, 1], [], []>} : vector<56x64xf32>, vector<64x16xf32>, vector<56x16xf32> -> vector<56x16xf32>
    %c0_132 = arith.constant 0 : index
    %c1_133 = arith.constant 1 : index
    %c0_134 = arith.constant 0 : index
    %c0_135 = arith.constant 0 : index
    %179 = vector.load %arg12[%c0_132, %c1_133, %c0_134, %c0_135] : memref<2x5x16x72xf32, #tpu.memory_space<vmem>>, vector<1x1x16x72xf32>
    %180 = vector.shape_cast %179 : vector<1x1x16x72xf32> to vector<16x72xf32>
    %cst_136 = arith.constant dense<0.000000e+00> : vector<56x72xf32>
    %181 = tpu.matmul %178, %180, %cst_136 {dimension_numbers = #tpu.dot_dimension_numbers<[1], [0], [0], [1], [0, 0, 1, 1], [], []>} : vector<56x16xf32>, vector<16x72xf32>, vector<56x72xf32> -> vector<56x72xf32>
    %182 = arith.addf %175, %181 : vector<56x72xf32>
    %c2 = arith.constant 2 : index
    %c0_137 = arith.constant 0 : index
    %c0_138 = arith.constant 0 : index
    %183 = vector.load %arg11[%c2, %c0_137, %c0_138] : memref<5x56x64xf32, #tpu.memory_space<vmem>>, vector<1x56x64xf32>
    %184 = vector.shape_cast %183 : vector<1x56x64xf32> to vector<56x64xf32>
    %cst_139 = arith.constant dense<0.000000e+00> : vector<56x16xf32>
    %185 = tpu.matmul %184, %169, %cst_139 {dimension_numbers = #tpu.dot_dimension_numbers<[1], [0], [0], [1], [0, 0, 1, 1], [], []>} : vector<56x64xf32>, vector<64x16xf32>, vector<56x16xf32> -> vector<56x16xf32>
    %c0_140 = arith.constant 0 : index
    %c2_141 = arith.constant 2 : index
    %c0_142 = arith.constant 0 : index
    %c0_143 = arith.constant 0 : index
    %186 = vector.load %arg12[%c0_140, %c2_141, %c0_142, %c0_143] : memref<2x5x16x72xf32, #tpu.memory_space<vmem>>, vector<1x1x16x72xf32>
    %187 = vector.shape_cast %186 : vector<1x1x16x72xf32> to vector<16x72xf32>
    %cst_144 = arith.constant dense<0.000000e+00> : vector<56x72xf32>
    %188 = tpu.matmul %185, %187, %cst_144 {dimension_numbers = #tpu.dot_dimension_numbers<[1], [0], [0], [1], [0, 0, 1, 1], [], []>} : vector<56x16xf32>, vector<16x72xf32>, vector<56x72xf32> -> vector<56x72xf32>
    %189 = arith.addf %182, %188 : vector<56x72xf32>
    %c3 = arith.constant 3 : index
    %c0_145 = arith.constant 0 : index
    %c0_146 = arith.constant 0 : index
    %190 = vector.load %arg11[%c3, %c0_145, %c0_146] : memref<5x56x64xf32, #tpu.memory_space<vmem>>, vector<1x56x64xf32>
    %191 = vector.shape_cast %190 : vector<1x56x64xf32> to vector<56x64xf32>
    %cst_147 = arith.constant dense<0.000000e+00> : vector<56x16xf32>
    %192 = tpu.matmul %191, %169, %cst_147 {dimension_numbers = #tpu.dot_dimension_numbers<[1], [0], [0], [1], [0, 0, 1, 1], [], []>} : vector<56x64xf32>, vector<64x16xf32>, vector<56x16xf32> -> vector<56x16xf32>
    %c0_148 = arith.constant 0 : index
    %c3_149 = arith.constant 3 : index
    %c0_150 = arith.constant 0 : index
    %c0_151 = arith.constant 0 : index
    %193 = vector.load %arg12[%c0_148, %c3_149, %c0_150, %c0_151] : memref<2x5x16x72xf32, #tpu.memory_space<vmem>>, vector<1x1x16x72xf32>
    %194 = vector.shape_cast %193 : vector<1x1x16x72xf32> to vector<16x72xf32>
    %cst_152 = arith.constant dense<0.000000e+00> : vector<56x72xf32>
    %195 = tpu.matmul %192, %194, %cst_152 {dimension_numbers = #tpu.dot_dimension_numbers<[1], [0], [0], [1], [0, 0, 1, 1], [], []>} : vector<56x16xf32>, vector<16x72xf32>, vector<56x72xf32> -> vector<56x72xf32>
    %196 = arith.addf %189, %195 : vector<56x72xf32>
    %c4 = arith.constant 4 : index
    %c0_153 = arith.constant 0 : index
    %c0_154 = arith.constant 0 : index
    %197 = vector.load %arg11[%c4, %c0_153, %c0_154] : memref<5x56x64xf32, #tpu.memory_space<vmem>>, vector<1x56x64xf32>
    %198 = vector.shape_cast %197 : vector<1x56x64xf32> to vector<56x64xf32>
    %cst_155 = arith.constant dense<0.000000e+00> : vector<56x16xf32>
    %199 = tpu.matmul %198, %169, %cst_155 {dimension_numbers = #tpu.dot_dimension_numbers<[1], [0], [0], [1], [0, 0, 1, 1], [], []>} : vector<56x64xf32>, vector<64x16xf32>, vector<56x16xf32> -> vector<56x16xf32>
    %c0_156 = arith.constant 0 : index
    %c4_157 = arith.constant 4 : index
    %c0_158 = arith.constant 0 : index
    %c0_159 = arith.constant 0 : index
    %200 = vector.load %arg12[%c0_156, %c4_157, %c0_158, %c0_159] : memref<2x5x16x72xf32, #tpu.memory_space<vmem>>, vector<1x1x16x72xf32>
    %201 = vector.shape_cast %200 : vector<1x1x16x72xf32> to vector<16x72xf32>
    %cst_160 = arith.constant dense<0.000000e+00> : vector<56x72xf32>
    %202 = tpu.matmul %199, %201, %cst_160 {dimension_numbers = #tpu.dot_dimension_numbers<[1], [0], [0], [1], [0, 0, 1, 1], [], []>} : vector<56x16xf32>, vector<16x72xf32>, vector<56x72xf32> -> vector<56x72xf32>
    %203 = arith.addf %196, %202 : vector<56x72xf32>
    %c1_161 = arith.constant 1 : index
    %c0_162 = arith.constant 0 : index
    %c0_163 = arith.constant 0 : index
    %204 = vector.load %arg28[%c1_161, %c0_162, %c0_163] : memref<2x64x16xf32, #tpu.memory_space<vmem>>, vector<1x64x16xf32>
    %205 = vector.shape_cast %204 : vector<1x64x16xf32> to vector<64x16xf32>
    %c0_164 = arith.constant 0 : index
    %c0_165 = arith.constant 0 : index
    %c0_166 = arith.constant 0 : index
    %206 = vector.load %arg11[%c0_164, %c0_165, %c0_166] : memref<5x56x64xf32, #tpu.memory_space<vmem>>, vector<1x56x64xf32>
    %207 = vector.shape_cast %206 : vector<1x56x64xf32> to vector<56x64xf32>
    %cst_167 = arith.constant dense<0.000000e+00> : vector<56x16xf32>
    %208 = tpu.matmul %207, %205, %cst_167 {dimension_numbers = #tpu.dot_dimension_numbers<[1], [0], [0], [1], [0, 0, 1, 1], [], []>} : vector<56x64xf32>, vector<64x16xf32>, vector<56x16xf32> -> vector<56x16xf32>
    %c1_168 = arith.constant 1 : index
    %c0_169 = arith.constant 0 : index
    %c0_170 = arith.constant 0 : index
    %c0_171 = arith.constant 0 : index
    %209 = vector.load %arg12[%c1_168, %c0_169, %c0_170, %c0_171] : memref<2x5x16x72xf32, #tpu.memory_space<vmem>>, vector<1x1x16x72xf32>
    %210 = vector.shape_cast %209 : vector<1x1x16x72xf32> to vector<16x72xf32>
    %cst_172 = arith.constant dense<0.000000e+00> : vector<56x72xf32>
    %211 = tpu.matmul %208, %210, %cst_172 {dimension_numbers = #tpu.dot_dimension_numbers<[1], [0], [0], [1], [0, 0, 1, 1], [], []>} : vector<56x16xf32>, vector<16x72xf32>, vector<56x72xf32> -> vector<56x72xf32>
    %212 = arith.addf %203, %211 : vector<56x72xf32>
    %c1_173 = arith.constant 1 : index
    %c0_174 = arith.constant 0 : index
    %c0_175 = arith.constant 0 : index
    %213 = vector.load %arg11[%c1_173, %c0_174, %c0_175] : memref<5x56x64xf32, #tpu.memory_space<vmem>>, vector<1x56x64xf32>
    %214 = vector.shape_cast %213 : vector<1x56x64xf32> to vector<56x64xf32>
    %cst_176 = arith.constant dense<0.000000e+00> : vector<56x16xf32>
    %215 = tpu.matmul %214, %205, %cst_176 {dimension_numbers = #tpu.dot_dimension_numbers<[1], [0], [0], [1], [0, 0, 1, 1], [], []>} : vector<56x64xf32>, vector<64x16xf32>, vector<56x16xf32> -> vector<56x16xf32>
    %c1_177 = arith.constant 1 : index
    %c1_178 = arith.constant 1 : index
    %c0_179 = arith.constant 0 : index
    %c0_180 = arith.constant 0 : index
    %216 = vector.load %arg12[%c1_177, %c1_178, %c0_179, %c0_180] : memref<2x5x16x72xf32, #tpu.memory_space<vmem>>, vector<1x1x16x72xf32>
    %217 = vector.shape_cast %216 : vector<1x1x16x72xf32> to vector<16x72xf32>
    %cst_181 = arith.constant dense<0.000000e+00> : vector<56x72xf32>
    %218 = tpu.matmul %215, %217, %cst_181 {dimension_numbers = #tpu.dot_dimension_numbers<[1], [0], [0], [1], [0, 0, 1, 1], [], []>} : vector<56x16xf32>, vector<16x72xf32>, vector<56x72xf32> -> vector<56x72xf32>
    %219 = arith.addf %212, %218 : vector<56x72xf32>
    %c2_182 = arith.constant 2 : index
    %c0_183 = arith.constant 0 : index
    %c0_184 = arith.constant 0 : index
    %220 = vector.load %arg11[%c2_182, %c0_183, %c0_184] : memref<5x56x64xf32, #tpu.memory_space<vmem>>, vector<1x56x64xf32>
    %221 = vector.shape_cast %220 : vector<1x56x64xf32> to vector<56x64xf32>
    %cst_185 = arith.constant dense<0.000000e+00> : vector<56x16xf32>
    %222 = tpu.matmul %221, %205, %cst_185 {dimension_numbers = #tpu.dot_dimension_numbers<[1], [0], [0], [1], [0, 0, 1, 1], [], []>} : vector<56x64xf32>, vector<64x16xf32>, vector<56x16xf32> -> vector<56x16xf32>
    %c1_186 = arith.constant 1 : index
    %c2_187 = arith.constant 2 : index
    %c0_188 = arith.constant 0 : index
    %c0_189 = arith.constant 0 : index
    %223 = vector.load %arg12[%c1_186, %c2_187, %c0_188, %c0_189] : memref<2x5x16x72xf32, #tpu.memory_space<vmem>>, vector<1x1x16x72xf32>
    %224 = vector.shape_cast %223 : vector<1x1x16x72xf32> to vector<16x72xf32>
    %cst_190 = arith.constant dense<0.000000e+00> : vector<56x72xf32>
    %225 = tpu.matmul %222, %224, %cst_190 {dimension_numbers = #tpu.dot_dimension_numbers<[1], [0], [0], [1], [0, 0, 1, 1], [], []>} : vector<56x16xf32>, vector<16x72xf32>, vector<56x72xf32> -> vector<56x72xf32>
    %226 = arith.addf %219, %225 : vector<56x72xf32>
    %c3_191 = arith.constant 3 : index
    %c0_192 = arith.constant 0 : index
    %c0_193 = arith.constant 0 : index
    %227 = vector.load %arg11[%c3_191, %c0_192, %c0_193] : memref<5x56x64xf32, #tpu.memory_space<vmem>>, vector<1x56x64xf32>
    %228 = vector.shape_cast %227 : vector<1x56x64xf32> to vector<56x64xf32>
    %cst_194 = arith.constant dense<0.000000e+00> : vector<56x16xf32>
    %229 = tpu.matmul %228, %205, %cst_194 {dimension_numbers = #tpu.dot_dimension_numbers<[1], [0], [0], [1], [0, 0, 1, 1], [], []>} : vector<56x64xf32>, vector<64x16xf32>, vector<56x16xf32> -> vector<56x16xf32>
    %c1_195 = arith.constant 1 : index
    %c3_196 = arith.constant 3 : index
    %c0_197 = arith.constant 0 : index
    %c0_198 = arith.constant 0 : index
    %230 = vector.load %arg12[%c1_195, %c3_196, %c0_197, %c0_198] : memref<2x5x16x72xf32, #tpu.memory_space<vmem>>, vector<1x1x16x72xf32>
    %231 = vector.shape_cast %230 : vector<1x1x16x72xf32> to vector<16x72xf32>
    %cst_199 = arith.constant dense<0.000000e+00> : vector<56x72xf32>
    %232 = tpu.matmul %229, %231, %cst_199 {dimension_numbers = #tpu.dot_dimension_numbers<[1], [0], [0], [1], [0, 0, 1, 1], [], []>} : vector<56x16xf32>, vector<16x72xf32>, vector<56x72xf32> -> vector<56x72xf32>
    %233 = arith.addf %226, %232 : vector<56x72xf32>
    %c4_200 = arith.constant 4 : index
    %c0_201 = arith.constant 0 : index
    %c0_202 = arith.constant 0 : index
    %234 = vector.load %arg11[%c4_200, %c0_201, %c0_202] : memref<5x56x64xf32, #tpu.memory_space<vmem>>, vector<1x56x64xf32>
    %235 = vector.shape_cast %234 : vector<1x56x64xf32> to vector<56x64xf32>
    %cst_203 = arith.constant dense<0.000000e+00> : vector<56x16xf32>
    %236 = tpu.matmul %235, %205, %cst_203 {dimension_numbers = #tpu.dot_dimension_numbers<[1], [0], [0], [1], [0, 0, 1, 1], [], []>} : vector<56x64xf32>, vector<64x16xf32>, vector<56x16xf32> -> vector<56x16xf32>
    %c1_204 = arith.constant 1 : index
    %c4_205 = arith.constant 4 : index
    %c0_206 = arith.constant 0 : index
    %c0_207 = arith.constant 0 : index
    %237 = vector.load %arg12[%c1_204, %c4_205, %c0_206, %c0_207] : memref<2x5x16x72xf32, #tpu.memory_space<vmem>>, vector<1x1x16x72xf32>
    %238 = vector.shape_cast %237 : vector<1x1x16x72xf32> to vector<16x72xf32>
    %cst_208 = arith.constant dense<0.000000e+00> : vector<56x72xf32>
    %239 = tpu.matmul %236, %238, %cst_208 {dimension_numbers = #tpu.dot_dimension_numbers<[1], [0], [0], [1], [0, 0, 1, 1], [], []>} : vector<56x16xf32>, vector<16x72xf32>, vector<56x72xf32> -> vector<56x72xf32>
    %240 = arith.addf %233, %239 : vector<56x72xf32>
    %c0_209 = arith.constant 0 : index
    %c0_210 = arith.constant 0 : index
    %241 = vector.load %arg13[%c0_209, %c0_210] : memref<1x72xf32, #tpu.memory_space<vmem>>, vector<1x72xf32>
    %242 = vector.broadcast %241 : vector<1x72xf32> to vector<56x72xf32>
    %243 = arith.addf %240, %242 : vector<56x72xf32>
    %cst_211 = arith.constant 0.000000e+00 : f32
    %244 = vector.broadcast %cst_211 : f32 to vector<56x72xf32>
    %245 = arith.maximumf %243, %244 : vector<56x72xf32>
    %c0_212 = arith.constant 0 : index
    %c0_213 = arith.constant 0 : index
    %c0_214 = arith.constant 0 : index
    %246 = vector.load %arg14[%c0_212, %c0_213, %c0_214] : memref<2x28x56xf32, #tpu.memory_space<vmem>>, vector<1x28x56xf32>
    %247 = vector.shape_cast %246 : vector<1x28x56xf32> to vector<28x56xf32>
    %cst_215 = arith.constant dense<0.000000e+00> : vector<28x72xf32>
    %248 = tpu.matmul %247, %245, %cst_215 {dimension_numbers = #tpu.dot_dimension_numbers<[1], [0], [0], [1], [0, 0, 1, 1], [], []>} : vector<28x56xf32>, vector<56x72xf32>, vector<28x72xf32> -> vector<28x72xf32>
    %c1_216 = arith.constant 1 : index
    %c0_217 = arith.constant 0 : index
    %c0_218 = arith.constant 0 : index
    %249 = vector.load %arg14[%c1_216, %c0_217, %c0_218] : memref<2x28x56xf32, #tpu.memory_space<vmem>>, vector<1x28x56xf32>
    %250 = vector.shape_cast %249 : vector<1x28x56xf32> to vector<28x56xf32>
    %cst_219 = arith.constant dense<0.000000e+00> : vector<28x72xf32>
    %251 = tpu.matmul %250, %245, %cst_219 {dimension_numbers = #tpu.dot_dimension_numbers<[1], [0], [0], [1], [0, 0, 1, 1], [], []>} : vector<28x56xf32>, vector<56x72xf32>, vector<28x72xf32> -> vector<28x72xf32>
    %252 = arith.maximumf %248, %251 : vector<28x72xf32>
    %c0_220 = arith.constant 0 : index
    %c0_221 = arith.constant 0 : index
    %c0_222 = arith.constant 0 : index
    %253 = vector.load %arg15[%c0_220, %c0_221, %c0_222] : memref<2x72x36xf32, #tpu.memory_space<vmem>>, vector<1x72x36xf32>
    %254 = vector.shape_cast %253 : vector<1x72x36xf32> to vector<72x36xf32>
    %cst_223 = arith.constant dense<0.000000e+00> : vector<28x36xf32>
    %255 = tpu.matmul %252, %254, %cst_223 {dimension_numbers = #tpu.dot_dimension_numbers<[1], [0], [0], [1], [0, 0, 1, 1], [], []>} : vector<28x72xf32>, vector<72x36xf32>, vector<28x36xf32> -> vector<28x36xf32>
    %c1_224 = arith.constant 1 : index
    %c0_225 = arith.constant 0 : index
    %c0_226 = arith.constant 0 : index
    %256 = vector.load %arg15[%c1_224, %c0_225, %c0_226] : memref<2x72x36xf32, #tpu.memory_space<vmem>>, vector<1x72x36xf32>
    %257 = vector.shape_cast %256 : vector<1x72x36xf32> to vector<72x36xf32>
    %cst_227 = arith.constant dense<0.000000e+00> : vector<28x36xf32>
    %258 = tpu.matmul %252, %257, %cst_227 {dimension_numbers = #tpu.dot_dimension_numbers<[1], [0], [0], [1], [0, 0, 1, 1], [], []>} : vector<28x72xf32>, vector<72x36xf32>, vector<28x36xf32> -> vector<28x36xf32>
    %259 = arith.maximumf %255, %258 : vector<28x36xf32>
    %c0_228 = arith.constant 0 : index
    %c0_229 = arith.constant 0 : index
    %c0_230 = arith.constant 0 : index
    %260 = vector.load %arg16[%c0_228, %c0_229, %c0_230] : memref<5x20x28xf32, #tpu.memory_space<vmem>>, vector<1x20x28xf32>
    %261 = vector.shape_cast %260 : vector<1x20x28xf32> to vector<20x28xf32>
    %cst_231 = arith.constant dense<0.000000e+00> : vector<20x36xf32>
    %262 = tpu.matmul %261, %259, %cst_231 {dimension_numbers = #tpu.dot_dimension_numbers<[1], [0], [0], [1], [0, 0, 1, 1], [], []>} : vector<20x28xf32>, vector<28x36xf32>, vector<20x36xf32> -> vector<20x36xf32>
    %c0_232 = arith.constant 0 : index
    %c0_233 = arith.constant 0 : index
    %c0_234 = arith.constant 0 : index
    %263 = vector.load %arg17[%c0_232, %c0_233, %c0_234] : memref<5x36x32xf32, #tpu.memory_space<vmem>>, vector<1x36x32xf32>
    %264 = vector.shape_cast %263 : vector<1x36x32xf32> to vector<36x32xf32>
    %cst_235 = arith.constant dense<0.000000e+00> : vector<20x32xf32>
    %265 = tpu.matmul %262, %264, %cst_235 {dimension_numbers = #tpu.dot_dimension_numbers<[1], [0], [0], [1], [0, 0, 1, 1], [], []>} : vector<20x36xf32>, vector<36x32xf32>, vector<20x32xf32> -> vector<20x32xf32>
    %c1_236 = arith.constant 1 : index
    %c0_237 = arith.constant 0 : index
    %c0_238 = arith.constant 0 : index
    %266 = vector.load %arg16[%c1_236, %c0_237, %c0_238] : memref<5x20x28xf32, #tpu.memory_space<vmem>>, vector<1x20x28xf32>
    %267 = vector.shape_cast %266 : vector<1x20x28xf32> to vector<20x28xf32>
    %cst_239 = arith.constant dense<0.000000e+00> : vector<20x36xf32>
    %268 = tpu.matmul %267, %259, %cst_239 {dimension_numbers = #tpu.dot_dimension_numbers<[1], [0], [0], [1], [0, 0, 1, 1], [], []>} : vector<20x28xf32>, vector<28x36xf32>, vector<20x36xf32> -> vector<20x36xf32>
    %c1_240 = arith.constant 1 : index
    %c0_241 = arith.constant 0 : index
    %c0_242 = arith.constant 0 : index
    %269 = vector.load %arg17[%c1_240, %c0_241, %c0_242] : memref<5x36x32xf32, #tpu.memory_space<vmem>>, vector<1x36x32xf32>
    %270 = vector.shape_cast %269 : vector<1x36x32xf32> to vector<36x32xf32>
    %cst_243 = arith.constant dense<0.000000e+00> : vector<20x32xf32>
    %271 = tpu.matmul %268, %270, %cst_243 {dimension_numbers = #tpu.dot_dimension_numbers<[1], [0], [0], [1], [0, 0, 1, 1], [], []>} : vector<20x36xf32>, vector<36x32xf32>, vector<20x32xf32> -> vector<20x32xf32>
    %272 = arith.addf %265, %271 : vector<20x32xf32>
    %c2_244 = arith.constant 2 : index
    %c0_245 = arith.constant 0 : index
    %c0_246 = arith.constant 0 : index
    %273 = vector.load %arg16[%c2_244, %c0_245, %c0_246] : memref<5x20x28xf32, #tpu.memory_space<vmem>>, vector<1x20x28xf32>
    %274 = vector.shape_cast %273 : vector<1x20x28xf32> to vector<20x28xf32>
    %cst_247 = arith.constant dense<0.000000e+00> : vector<20x36xf32>
    %275 = tpu.matmul %274, %259, %cst_247 {dimension_numbers = #tpu.dot_dimension_numbers<[1], [0], [0], [1], [0, 0, 1, 1], [], []>} : vector<20x28xf32>, vector<28x36xf32>, vector<20x36xf32> -> vector<20x36xf32>
    %c2_248 = arith.constant 2 : index
    %c0_249 = arith.constant 0 : index
    %c0_250 = arith.constant 0 : index
    %276 = vector.load %arg17[%c2_248, %c0_249, %c0_250] : memref<5x36x32xf32, #tpu.memory_space<vmem>>, vector<1x36x32xf32>
    %277 = vector.shape_cast %276 : vector<1x36x32xf32> to vector<36x32xf32>
    %cst_251 = arith.constant dense<0.000000e+00> : vector<20x32xf32>
    %278 = tpu.matmul %275, %277, %cst_251 {dimension_numbers = #tpu.dot_dimension_numbers<[1], [0], [0], [1], [0, 0, 1, 1], [], []>} : vector<20x36xf32>, vector<36x32xf32>, vector<20x32xf32> -> vector<20x32xf32>
    %279 = arith.addf %272, %278 : vector<20x32xf32>
    %c3_252 = arith.constant 3 : index
    %c0_253 = arith.constant 0 : index
    %c0_254 = arith.constant 0 : index
    %280 = vector.load %arg16[%c3_252, %c0_253, %c0_254] : memref<5x20x28xf32, #tpu.memory_space<vmem>>, vector<1x20x28xf32>
    %281 = vector.shape_cast %280 : vector<1x20x28xf32> to vector<20x28xf32>
    %cst_255 = arith.constant dense<0.000000e+00> : vector<20x36xf32>
    %282 = tpu.matmul %281, %259, %cst_255 {dimension_numbers = #tpu.dot_dimension_numbers<[1], [0], [0], [1], [0, 0, 1, 1], [], []>} : vector<20x28xf32>, vector<28x36xf32>, vector<20x36xf32> -> vector<20x36xf32>
    %c3_256 = arith.constant 3 : index
    %c0_257 = arith.constant 0 : index
    %c0_258 = arith.constant 0 : index
    %283 = vector.load %arg17[%c3_256, %c0_257, %c0_258] : memref<5x36x32xf32, #tpu.memory_space<vmem>>, vector<1x36x32xf32>
    %284 = vector.shape_cast %283 : vector<1x36x32xf32> to vector<36x32xf32>
    %cst_259 = arith.constant dense<0.000000e+00> : vector<20x32xf32>
    %285 = tpu.matmul %282, %284, %cst_259 {dimension_numbers = #tpu.dot_dimension_numbers<[1], [0], [0], [1], [0, 0, 1, 1], [], []>} : vector<20x36xf32>, vector<36x32xf32>, vector<20x32xf32> -> vector<20x32xf32>
    %286 = arith.addf %279, %285 : vector<20x32xf32>
    %c4_260 = arith.constant 4 : index
    %c0_261 = arith.constant 0 : index
    %c0_262 = arith.constant 0 : index
    %287 = vector.load %arg16[%c4_260, %c0_261, %c0_262] : memref<5x20x28xf32, #tpu.memory_space<vmem>>, vector<1x20x28xf32>
    %288 = vector.shape_cast %287 : vector<1x20x28xf32> to vector<20x28xf32>
    %cst_263 = arith.constant dense<0.000000e+00> : vector<20x36xf32>
    %289 = tpu.matmul %288, %259, %cst_263 {dimension_numbers = #tpu.dot_dimension_numbers<[1], [0], [0], [1], [0, 0, 1, 1], [], []>} : vector<20x28xf32>, vector<28x36xf32>, vector<20x36xf32> -> vector<20x36xf32>
    %c4_264 = arith.constant 4 : index
    %c0_265 = arith.constant 0 : index
    %c0_266 = arith.constant 0 : index
    %290 = vector.load %arg17[%c4_264, %c0_265, %c0_266] : memref<5x36x32xf32, #tpu.memory_space<vmem>>, vector<1x36x32xf32>
    %291 = vector.shape_cast %290 : vector<1x36x32xf32> to vector<36x32xf32>
    %cst_267 = arith.constant dense<0.000000e+00> : vector<20x32xf32>
    %292 = tpu.matmul %289, %291, %cst_267 {dimension_numbers = #tpu.dot_dimension_numbers<[1], [0], [0], [1], [0, 0, 1, 1], [], []>} : vector<20x36xf32>, vector<36x32xf32>, vector<20x32xf32> -> vector<20x32xf32>
    %293 = arith.addf %286, %292 : vector<20x32xf32>
    %c0_268 = arith.constant 0 : index
    %c0_269 = arith.constant 0 : index
    %294 = vector.load %arg18[%c0_268, %c0_269] : memref<1x32xf32, #tpu.memory_space<vmem>>, vector<1x32xf32>
    %295 = vector.broadcast %294 : vector<1x32xf32> to vector<20x32xf32>
    %296 = arith.addf %293, %295 : vector<20x32xf32>
    %cst_270 = arith.constant 0.000000e+00 : f32
    %297 = vector.broadcast %cst_270 : f32 to vector<20x32xf32>
    %298 = arith.maximumf %296, %297 : vector<20x32xf32>
    %c0_271 = arith.constant 0 : index
    %c0_272 = arith.constant 0 : index
    %c0_273 = arith.constant 0 : index
    %299 = vector.load %arg19[%c0_271, %c0_272, %c0_273] : memref<2x10x20xf32, #tpu.memory_space<vmem>>, vector<1x10x20xf32>
    %300 = vector.shape_cast %299 : vector<1x10x20xf32> to vector<10x20xf32>
    %cst_274 = arith.constant dense<0.000000e+00> : vector<10x32xf32>
    %301 = tpu.matmul %300, %298, %cst_274 {dimension_numbers = #tpu.dot_dimension_numbers<[1], [0], [0], [1], [0, 0, 1, 1], [], []>} : vector<10x20xf32>, vector<20x32xf32>, vector<10x32xf32> -> vector<10x32xf32>
    %c1_275 = arith.constant 1 : index
    %c0_276 = arith.constant 0 : index
    %c0_277 = arith.constant 0 : index
    %302 = vector.load %arg19[%c1_275, %c0_276, %c0_277] : memref<2x10x20xf32, #tpu.memory_space<vmem>>, vector<1x10x20xf32>
    %303 = vector.shape_cast %302 : vector<1x10x20xf32> to vector<10x20xf32>
    %cst_278 = arith.constant dense<0.000000e+00> : vector<10x32xf32>
    %304 = tpu.matmul %303, %298, %cst_278 {dimension_numbers = #tpu.dot_dimension_numbers<[1], [0], [0], [1], [0, 0, 1, 1], [], []>} : vector<10x20xf32>, vector<20x32xf32>, vector<10x32xf32> -> vector<10x32xf32>
    %305 = arith.maximumf %301, %304 : vector<10x32xf32>
    %c0_279 = arith.constant 0 : index
    %c0_280 = arith.constant 0 : index
    %c0_281 = arith.constant 0 : index
    %306 = vector.load %arg20[%c0_279, %c0_280, %c0_281] : memref<2x32x16xf32, #tpu.memory_space<vmem>>, vector<1x32x16xf32>
    %307 = vector.shape_cast %306 : vector<1x32x16xf32> to vector<32x16xf32>
    %cst_282 = arith.constant dense<0.000000e+00> : vector<10x16xf32>
    %308 = tpu.matmul %305, %307, %cst_282 {dimension_numbers = #tpu.dot_dimension_numbers<[1], [0], [0], [1], [0, 0, 1, 1], [], []>} : vector<10x32xf32>, vector<32x16xf32>, vector<10x16xf32> -> vector<10x16xf32>
    %c1_283 = arith.constant 1 : index
    %c0_284 = arith.constant 0 : index
    %c0_285 = arith.constant 0 : index
    %309 = vector.load %arg20[%c1_283, %c0_284, %c0_285] : memref<2x32x16xf32, #tpu.memory_space<vmem>>, vector<1x32x16xf32>
    %310 = vector.shape_cast %309 : vector<1x32x16xf32> to vector<32x16xf32>
    %cst_286 = arith.constant dense<0.000000e+00> : vector<10x16xf32>
    %311 = tpu.matmul %305, %310, %cst_286 {dimension_numbers = #tpu.dot_dimension_numbers<[1], [0], [0], [1], [0, 0, 1, 1], [], []>} : vector<10x32xf32>, vector<32x16xf32>, vector<10x16xf32> -> vector<10x16xf32>
    %312 = arith.maximumf %308, %311 : vector<10x16xf32>
    %c0_287 = arith.constant 0 : index
    %c0_288 = arith.constant 0 : index
    %c0_289 = arith.constant 0 : index
    %313 = vector.load %arg23[%c0_287, %c0_288, %c0_289] : memref<5x2x10xf32, #tpu.memory_space<vmem>>, vector<1x2x10xf32>
    %314 = vector.shape_cast %313 : vector<1x2x10xf32> to vector<2x10xf32>
    %cst_290 = arith.constant dense<0.000000e+00> : vector<2x16xf32>
    %315 = tpu.matmul %314, %312, %cst_290 {dimension_numbers = #tpu.dot_dimension_numbers<[1], [0], [0], [1], [0, 0, 1, 1], [], []>} : vector<2x10xf32>, vector<10x16xf32>, vector<2x16xf32> -> vector<2x16xf32>
    %c0_291 = arith.constant 0 : index
    %c0_292 = arith.constant 0 : index
    %c0_293 = arith.constant 0 : index
    %316 = vector.load %arg21[%c0_291, %c0_292, %c0_293] : memref<5x16x120xf32, #tpu.memory_space<vmem>>, vector<1x16x120xf32>
    %317 = vector.shape_cast %316 : vector<1x16x120xf32> to vector<16x120xf32>
    %cst_294 = arith.constant dense<0.000000e+00> : vector<2x120xf32>
    %318 = tpu.matmul %315, %317, %cst_294 {dimension_numbers = #tpu.dot_dimension_numbers<[1], [0], [0], [1], [0, 0, 1, 1], [], []>} : vector<2x16xf32>, vector<16x120xf32>, vector<2x120xf32> -> vector<2x120xf32>
    %c1_295 = arith.constant 1 : index
    %c0_296 = arith.constant 0 : index
    %c0_297 = arith.constant 0 : index
    %319 = vector.load %arg23[%c1_295, %c0_296, %c0_297] : memref<5x2x10xf32, #tpu.memory_space<vmem>>, vector<1x2x10xf32>
    %320 = vector.shape_cast %319 : vector<1x2x10xf32> to vector<2x10xf32>
    %cst_298 = arith.constant dense<0.000000e+00> : vector<2x16xf32>
    %321 = tpu.matmul %320, %312, %cst_298 {dimension_numbers = #tpu.dot_dimension_numbers<[1], [0], [0], [1], [0, 0, 1, 1], [], []>} : vector<2x10xf32>, vector<10x16xf32>, vector<2x16xf32> -> vector<2x16xf32>
    %c1_299 = arith.constant 1 : index
    %c0_300 = arith.constant 0 : index
    %c0_301 = arith.constant 0 : index
    %322 = vector.load %arg21[%c1_299, %c0_300, %c0_301] : memref<5x16x120xf32, #tpu.memory_space<vmem>>, vector<1x16x120xf32>
    %323 = vector.shape_cast %322 : vector<1x16x120xf32> to vector<16x120xf32>
    %cst_302 = arith.constant dense<0.000000e+00> : vector<2x120xf32>
    %324 = tpu.matmul %321, %323, %cst_302 {dimension_numbers = #tpu.dot_dimension_numbers<[1], [0], [0], [1], [0, 0, 1, 1], [], []>} : vector<2x16xf32>, vector<16x120xf32>, vector<2x120xf32> -> vector<2x120xf32>
    %325 = arith.addf %318, %324 : vector<2x120xf32>
    %c2_303 = arith.constant 2 : index
    %c0_304 = arith.constant 0 : index
    %c0_305 = arith.constant 0 : index
    %326 = vector.load %arg23[%c2_303, %c0_304, %c0_305] : memref<5x2x10xf32, #tpu.memory_space<vmem>>, vector<1x2x10xf32>
    %327 = vector.shape_cast %326 : vector<1x2x10xf32> to vector<2x10xf32>
    %cst_306 = arith.constant dense<0.000000e+00> : vector<2x16xf32>
    %328 = tpu.matmul %327, %312, %cst_306 {dimension_numbers = #tpu.dot_dimension_numbers<[1], [0], [0], [1], [0, 0, 1, 1], [], []>} : vector<2x10xf32>, vector<10x16xf32>, vector<2x16xf32> -> vector<2x16xf32>
    %c2_307 = arith.constant 2 : index
    %c0_308 = arith.constant 0 : index
    %c0_309 = arith.constant 0 : index
    %329 = vector.load %arg21[%c2_307, %c0_308, %c0_309] : memref<5x16x120xf32, #tpu.memory_space<vmem>>, vector<1x16x120xf32>
    %330 = vector.shape_cast %329 : vector<1x16x120xf32> to vector<16x120xf32>
    %cst_310 = arith.constant dense<0.000000e+00> : vector<2x120xf32>
    %331 = tpu.matmul %328, %330, %cst_310 {dimension_numbers = #tpu.dot_dimension_numbers<[1], [0], [0], [1], [0, 0, 1, 1], [], []>} : vector<2x16xf32>, vector<16x120xf32>, vector<2x120xf32> -> vector<2x120xf32>
    %332 = arith.addf %325, %331 : vector<2x120xf32>
    %c3_311 = arith.constant 3 : index
    %c0_312 = arith.constant 0 : index
    %c0_313 = arith.constant 0 : index
    %333 = vector.load %arg23[%c3_311, %c0_312, %c0_313] : memref<5x2x10xf32, #tpu.memory_space<vmem>>, vector<1x2x10xf32>
    %334 = vector.shape_cast %333 : vector<1x2x10xf32> to vector<2x10xf32>
    %cst_314 = arith.constant dense<0.000000e+00> : vector<2x16xf32>
    %335 = tpu.matmul %334, %312, %cst_314 {dimension_numbers = #tpu.dot_dimension_numbers<[1], [0], [0], [1], [0, 0, 1, 1], [], []>} : vector<2x10xf32>, vector<10x16xf32>, vector<2x16xf32> -> vector<2x16xf32>
    %c3_315 = arith.constant 3 : index
    %c0_316 = arith.constant 0 : index
    %c0_317 = arith.constant 0 : index
    %336 = vector.load %arg21[%c3_315, %c0_316, %c0_317] : memref<5x16x120xf32, #tpu.memory_space<vmem>>, vector<1x16x120xf32>
    %337 = vector.shape_cast %336 : vector<1x16x120xf32> to vector<16x120xf32>
    %cst_318 = arith.constant dense<0.000000e+00> : vector<2x120xf32>
    %338 = tpu.matmul %335, %337, %cst_318 {dimension_numbers = #tpu.dot_dimension_numbers<[1], [0], [0], [1], [0, 0, 1, 1], [], []>} : vector<2x16xf32>, vector<16x120xf32>, vector<2x120xf32> -> vector<2x120xf32>
    %339 = arith.addf %332, %338 : vector<2x120xf32>
    %c4_319 = arith.constant 4 : index
    %c0_320 = arith.constant 0 : index
    %c0_321 = arith.constant 0 : index
    %340 = vector.load %arg23[%c4_319, %c0_320, %c0_321] : memref<5x2x10xf32, #tpu.memory_space<vmem>>, vector<1x2x10xf32>
    %341 = vector.shape_cast %340 : vector<1x2x10xf32> to vector<2x10xf32>
    %cst_322 = arith.constant dense<0.000000e+00> : vector<2x16xf32>
    %342 = tpu.matmul %341, %312, %cst_322 {dimension_numbers = #tpu.dot_dimension_numbers<[1], [0], [0], [1], [0, 0, 1, 1], [], []>} : vector<2x10xf32>, vector<10x16xf32>, vector<2x16xf32> -> vector<2x16xf32>
    %c4_323 = arith.constant 4 : index
    %c0_324 = arith.constant 0 : index
    %c0_325 = arith.constant 0 : index
    %343 = vector.load %arg21[%c4_323, %c0_324, %c0_325] : memref<5x16x120xf32, #tpu.memory_space<vmem>>, vector<1x16x120xf32>
    %344 = vector.shape_cast %343 : vector<1x16x120xf32> to vector<16x120xf32>
    %cst_326 = arith.constant dense<0.000000e+00> : vector<2x120xf32>
    %345 = tpu.matmul %342, %344, %cst_326 {dimension_numbers = #tpu.dot_dimension_numbers<[1], [0], [0], [1], [0, 0, 1, 1], [], []>} : vector<2x16xf32>, vector<16x120xf32>, vector<2x120xf32> -> vector<2x120xf32>
    %346 = arith.addf %339, %345 : vector<2x120xf32>
    %c0_327 = arith.constant 0 : index
    %c0_328 = arith.constant 0 : index
    %347 = vector.load %arg22[%c0_327, %c0_328] : memref<1x120xf32, #tpu.memory_space<vmem>>, vector<1x120xf32>
    %348 = vector.broadcast %347 : vector<1x120xf32> to vector<2x120xf32>
    %349 = arith.addf %346, %348 : vector<2x120xf32>
    %cst_329 = arith.constant 0.000000e+00 : f32
    %350 = vector.broadcast %cst_329 : f32 to vector<2x120xf32>
    %351 = arith.maximumf %349, %350 : vector<2x120xf32>
    %c0_330 = arith.constant 0 : index
    %c0_331 = arith.constant 0 : index
    %352 = vector.load %arg24[%c0_330, %c0_331] : memref<120x3xf32, #tpu.memory_space<vmem>>, vector<120x3xf32>
    %cst_332 = arith.constant dense<0.000000e+00> : vector<2x3xf32>
    %353 = tpu.matmul %351, %352, %cst_332 {dimension_numbers = #tpu.dot_dimension_numbers<[1], [0], [0], [1], [0, 0, 1, 1], [], []>} : vector<2x120xf32>, vector<120x3xf32>, vector<2x3xf32> -> vector<2x3xf32>
    %c0_333 = arith.constant 0 : index
    %c0_334 = arith.constant 0 : index
    %354 = vector.load %arg25[%c0_333, %c0_334] : memref<1x3xf32, #tpu.memory_space<vmem>>, vector<1x3xf32>
    %355 = vector.broadcast %354 : vector<1x3xf32> to vector<2x3xf32>
    %356 = arith.addf %353, %355 : vector<2x3xf32>
    %c0_335 = arith.constant 0 : index
    %c0_336 = arith.constant 0 : index
    %357 = vector.load %arg26[%c0_335, %c0_336] : memref<2x3xf32, #tpu.memory_space<vmem>>, vector<2x3xf32>
    tpu.vector_store %arg26[%c0_335, %c0_336], %356 {strides = array<i32>} : memref<2x3xf32, #tpu.memory_space<vmem>>, vector<2x3xf32>,
    return
  }
}

</mosaic_0001>

<bundles_post_ra>
// kernel: tpu_custom_call.1
= control target key start
LH: loop header
LB: loop body
LE: loop exit
PB: predicated region body
PF: predicated region fallthrough
CT: control target
= control target key end

     0   :  { %s11435_s0 = inlined_call_operand.vmem [shape: f32[16,8], index: 0, kind: input, shape index: {}]   ;;  %s11436_s1 = inlined_call_operand.hbm [shape: f32[16,16], index: 1, kind: input, shape index: {}]   ;;  %s11437_s2 = inlined_call_operand.vmem [shape: f32[2,16,1], index: 2, kind: input, shape index: {}]   ;;  %s11438_s3 = inlined_call_operand.hbm [shape: f32[8,16], index: 3, kind: input, shape index: {}]   ;;  %s11439_s4 = inlined_call_operand.hbm [shape: f32[1,16], index: 4, kind: input, shape index: {}]   ;;  %s11440_s5 = inlined_call_operand.hbm [shape: f32[16,16], index: 5, kind: input, shape index: {}]   ;;  %s11441_s6 = inlined_call_operand.hbm [shape: f32[1,16], index: 6, kind: input, shape index: {}]   ;;  %s11442_s7 = inlined_call_operand.vmem [shape: f32[2,2,16,16], index: 7, kind: input, shape index: {}]   ;;  %s11443_s8 = inlined_call_operand.hbm [shape: f32[2,2,1,16], index: 8, kind: input, shape index: {}]   ;;  %s11444_s9 = inlined_call_operand.hbm [shape: f32[2,16,32], index: 9, kind: input, shape index: {}]   ;;  %s11445_s10 = inlined_call_operand.hbm [shape: f32[2,1,32], index: 10, kind: input, shape index: {}]   ;;  %s11446_s11 = inlined_call_operand.vmem [shape: f32[5,56,64], index: 11, kind: input, shape index: {}]   ;;  %s11447_s12 = inlined_call_operand.vmem [shape: f32[2,5,16,72], index: 12, kind: input, shape index: {}]   ;;  %s11448_s13 = inlined_call_operand.hbm [shape: f32[1,72], index: 13, kind: input, shape index: {}]   ;;  %s11449_s14 = inlined_call_operand.vmem [shape: f32[2,28,56], index: 14, kind: input, shape index: {}]   ;;  %s11450_s15 = inlined_call_operand.vmem [shape: f32[2,72,36], index: 15, kind: input, shape index: {}]   ;;  %s11451_s16 = inlined_call_operand.vmem [shape: f32[5,20,28], index: 16, kind: input, shape index: {}]   ;;  %s11452_s17 = inlined_call_operand.vmem [shape: f32[5,36,32], index: 17, kind: input, shape index: {}]   ;;  %s11453_s18 = inlined_call_operand.hbm [shape: f32[1,32], index: 18, kind: input, shape index: {}]   ;;  %s11454_s19 = inlined_call_operand.vmem [shape: f32[2,10,20], index: 19, kind: input, shape index: {}]   ;;  %s11455_s20 = inlined_call_operand.vmem [shape: f32[2,32,16], index: 20, kind: input, shape index: {}]   ;;  %s11456_s21 = inlined_call_operand.vmem [shape: f32[5,16,120], index: 21, kind: input, shape index: {}]   ;;  %s11457_s22 = inlined_call_operand.hbm [shape: f32[1,120], index: 22, kind: input, shape index: {}]   ;;  %s11458_s23 = inlined_call_operand.vmem [shape: f32[5,2,10], index: 23, kind: input, shape index: {}]   ;;  %s11459_s24 = inlined_call_operand.vmem [shape: f32[120,3], index: 24, kind: input, shape index: {}]   ;;  %s11460_s25 = inlined_call_operand.vmem [shape: f32[1,3], index: 25, kind: input, shape index: {}]   ;;  %s11461_s26 = inlined_call_operand.hbm [shape: f32[2,3], index: 26, kind: output, shape index: {0}]   ;;  %s11462_s27 = inlined_call_operand.hbm [shape: f32[1,1], index: 27, kind: output, shape index: {1}]  }
   0x1   :  { %11469 = sst [smem:[#allocation32_spill]] %s11435_s0 }
   0x2   :  { %11470 = sst [smem:[#allocation33_spill]] %s11436_s1 }
   0x3   :  { %11471 = sst [smem:[#allocation34_spill]] %s11437_s2 }
   0x4   :  { %11472 = sst [smem:[#allocation35_spill]] %s11438_s3 }
   0x5   :  { %11473 = sst [smem:[#allocation36_spill]] %s11439_s4 }
   0x6   :  { %11474 = sst [smem:[#allocation37_spill]] %s11440_s5 }
   0x7   :  { %11475 = sst [smem:[#allocation38_spill]] %s11441_s6 }
   0x8   :  { %11476 = sst [smem:[#allocation39_spill]] %s11442_s7 }
   0x9   :  { %11477 = sst [smem:[#allocation40_spill]] %s11443_s8 }
   0xa   :  { %11478 = sst [smem:[#allocation41_spill]] %s11444_s9 }
   0xb   :  { %11479 = sst [smem:[#allocation42_spill]] %s11445_s10 }
   0xc   :  { %11480 = sst [smem:[#allocation43_spill]] %s11446_s11 }
   0xd   :  { %11481 = sst [smem:[#allocation44_spill]] %s11461_s26 }
   0xe   :  { %33 = vsyncpa [#allocation4], 0 }
   0xf   :  { %34 = vsyncpa [#allocation8], 0 }
  0x10   :  { %35 = vsyncpa [#allocation11], 0 }
  0x11   :  { %36 = vsyncpa [#allocation14], 0 }
  0x12   :  { %37 = vsyncpa [#allocation17], 0 }
  0x13   :  { %38 = vsyncpa [#allocation20], 0 }
  0x14   :  { %39 = vsyncpa [#allocation5], 0 }
  0x15   :  { %40 = vsyncpa [#allocation6], 0  ;;  %s9480_s7 = smov [#allocation7]  }
  0x16   :  { %s63_s4 = sshll.u32 %s9480_s7, 4  ;;  %s64_s4 = int_to_ptr.vmem [resolvable:$true] %s63_s4 }
  0x17   :  { %s9224_s8 = scalar_lea.vmem %s64_s4, 128  ;;  %p9229_p1 = scmp.lt.s32.totalorder %s64_s4, %s64_s4 }
  0x18   :  { %p9225_p0 = scmp.ne.s32.totalorder %s64_s4, %s9224_s8  ;;  %p9230_p2 = scmp.lt.s32.totalorder %s9224_s8, %s9224_s8 }
  0x1a   :  { %p9231_p3 = por %p9230_p2, %p9229_p1 }
  0x1c   :  { %p9232_p4 = pnand %p9231_p3, %p9225_p0 }
  0x1e   :  { %9235 = shalt.err (!%p9232_p4)
}
  0x1f   :  { %s11482_s5 = sld [smem:[#allocation35_spill]]  ;;  %s9481_s28 = smov [#allocation10]  }
  0x20   :  { %s82_s0 = sshll.u32 %s9481_s28, 4  ;;  %s9482_s10 = smov [#allocation13]   ;;  %s83_s0 = int_to_ptr.vmem [resolvable:$true] %s82_s0 }
  0x21   :  { %s106_s29 = sshll.u32 %s9482_s10, 4  ;;  %s9244_s1 = scalar_lea.vmem %s83_s0, 256  ;;  %s107_s29 = int_to_ptr.vmem [resolvable:$true] %s106_s29 }
  0x22   :  { %p9245_p5 = scmp.ne.s32.totalorder %s83_s0, %s9244_s1  ;;  %p9249_p6 = scmp.lt.s32.totalorder %s83_s0, %s83_s0 }
  0x23   :  { %p9250_p7 = scmp.lt.s32.totalorder %s9244_s1, %s9244_s1 }
  0x25   :  { %66 = dma.hbm_to_vmem [thread:$0]  %s11482_s5, 128, %s64_s4, [#allocation8]  }
  0x26   :  { %p9251_p8 = por %p9250_p7, %p9249_p6 }
  0x28   :  { %p9252_p9 = pnand %p9251_p8, %p9245_p5 }
  0x2a   :  { %9255 = shalt.err (!%p9252_p9)
}
  0x2b   :  { %s11467_s6 = smov 128   ;;  %s9484_s11 = smov 8  }
  0x2c   :  { %s11483_s7 = sld [smem:[#allocation37_spill]]  ;;  %s9264_s4 = scalar_lea.vmem %s107_s29, 64 }
  0x2d   :  { %p9265_p10 = scmp.ne.s32.totalorder %s107_s29, %s9264_s4  ;;  %p9269_p11 = scmp.lt.s32.totalorder %s107_s29, %s107_s29 }
  0x2e   :  { %p9270_p12 = scmp.lt.s32.totalorder %s9264_s4, %s9264_s4 }
  0x30   :  { %p9271_p13 = por %p9270_p12, %p9269_p11 }
  0x32   :  { %88 = dma.hbm_to_vmem [thread:$0]  %s11483_s7, 256, %s83_s0, [#allocation11], %s11467_s6, %s11467_s6, %s9484_s11  }
  0x33   :  { %p9272_p0 = pnand %p9271_p13, %p9265_p10 }
  0x35   :  { %9275 = shalt.err (!%p9272_p0)
}
  0x36   :  { %s9485_s8 = smov 16   ;;  %s9486_s30 = smov 1  }
  0x37   :  { %s11484_s28 = sld [smem:[#allocation40_spill]]  ;;  %s9487_s10 = smov [#allocation16]  }
  0x38   :  { %s130_s1 = sshll.u32 %s9487_s10, 4  ;;  %s9488_s26 = smov [#allocation19]   ;;  %s131_s1 = int_to_ptr.vmem [resolvable:$true] %s130_s1 }
  0x39   :  { %s165_s2 = sshll.u32 %s9488_s26, 4  ;;  %s9284_s0 = scalar_lea.vmem %s131_s1, 32  ;;  %s166_s2 = int_to_ptr.vmem [resolvable:$true] %s165_s2 }
  0x3a   :  { %p9285_p1 = scmp.ne.s32.totalorder %s131_s1, %s9284_s0  ;;  %p9289_p2 = scmp.lt.s32.totalorder %s131_s1, %s131_s1 }
  0x3b   :  { %p9290_p3 = scmp.lt.s32.totalorder %s9284_s0, %s9284_s0 }
  0x3d   :  { %112 = dma.hbm_to_vmem [thread:$0]  %s11484_s28, 64, %s107_s29, [#allocation14], %s9485_s8, %s9485_s8, %s9486_s30  }
  0x3e   :  { %p9291_p4 = por %p9290_p3, %p9289_p2 }
  0x40   :  { %p9292_p5 = pnand %p9291_p4, %p9285_p1 }
  0x42   :  { %9295 = shalt.err (!%p9292_p5)
}
  0x43   :  { %s11485_s4 = sld [smem:[#allocation42_spill]]  ;;  %s9304_s6 = scalar_lea.vmem %s166_s2, 16 }
  0x44   :  { %p9305_p6 = scmp.ne.s32.totalorder %s166_s2, %s9304_s6  ;;  %s9308_s29 = scalar_lea.vmem %s166_s2, 32 }
  0x45   :  { %p9309_p7 = scmp.lt.s32.totalorder %s166_s2, %s166_s2  ;;  %p9310_p8 = scmp.lt.s32.totalorder %s9308_s29, %s9304_s6 }
  0x47   :  { %p9311_p9 = por %p9310_p8, %p9309_p7 }
  0x49   :  { %136 = dma.hbm_to_vmem [thread:$0]  %s11485_s4, 32, %s131_s1, [#allocation17], %s9485_s8, %s9485_s8, %s9486_s30  }
  0x4a   :  { %p9312_p10 = pnand %p9311_p9, %p9305_p6 }
  0x4c   :  { %9315 = shalt.err (!%p9312_p10)
}
  0x4d   :  { %168 = dma.hbm_to_vmem [thread:$0]  %s11453_s18, 16, %s166_s2, [#allocation20]  }
  0x4e   :  { %s9489_s5 = smov [#allocation3]   ;;  %s9490_s10 = smov [#allocation9]  }
  0x4f   :  { %s48_s28 = sshll.u32 %s9489_s5, 4  ;;  %s73_s0 = sshll.u32 %s9490_s10, 4  ;;  %s49_s28 = int_to_ptr.vmem [resolvable:$true] %s48_s28  ;;  %s74_s0 = int_to_ptr.vmem [resolvable:$true] %s73_s0 }
  0x50   :  { %s9324_s3 = scalar_lea.vmem %s49_s28, 256  ;;  %p9329_p12 = scmp.lt.s32.totalorder %s49_s28, %s49_s28 }
  0x51   :  { %p9325_p11 = scmp.ne.s32.totalorder %s49_s28, %s9324_s3  ;;  %p9330_p13 = scmp.lt.s32.totalorder %s9324_s3, %s9324_s3 }
  0x53   :  { %p9331_p0 = por %p9330_p13, %p9329_p12 }
  0x55   :  { %p9332_p1 = pnand %p9331_p0, %p9325_p11 }
  0x57   :  { %9335 = shalt.err (!%p9332_p1)
}
  0x58   :  { %s11486_s6 = smov 128   ;;  %s11487_s1 = sld [smem:[#allocation33_spill]] }
  0x59   :  { %s9344_s18 = scalar_lea.vmem %s74_s0, 16  ;;  %s9348_s2 = scalar_lea.vmem %s74_s0, 32 }
  0x5a   :  { %p9345_p2 = scmp.ne.s32.totalorder %s74_s0, %s9344_s18  ;;  %p9349_p3 = scmp.lt.s32.totalorder %s74_s0, %s74_s0 }
  0x5b   :  { %p9350_p4 = scmp.lt.s32.totalorder %s9348_s2, %s9344_s18 }
  0x5d   :  { %p9351_p5 = por %p9350_p4, %p9349_p3 }
  0x5e   :  { %54 = dma.hbm_to_vmem [thread:$0]  %s11487_s1, 256, %s49_s28, [#allocation4], %s11486_s6, %s11486_s6, %s9484_s11  }
  0x5f   :  { %p9352_p6 = pnand %p9351_p5, %p9345_p2 }
  0x61   :  { %9355 = shalt.err (!%p9352_p6)
}
  0x62   :  { %s11488_s29 = sld [smem:[#allocation36_spill]]  ;;  %s9491_s26 = smov [#allocation12]  }
  0x63   :  { %s95_s9 = sshll.u32 %s9491_s26, 4  ;;  %s9492_s5 = smov [#allocation15]   ;;  %s96_s9 = int_to_ptr.vmem [resolvable:$true] %s95_s9 }
  0x64   :  { %s118_s10 = sshll.u32 %s9492_s5, 4  ;;  %s9364_s3 = scalar_lea.vmem %s96_s9, 16  ;;  %s119_s10 = int_to_ptr.vmem [resolvable:$true] %s118_s10 }
  0x65   :  { %p9365_p7 = scmp.ne.s32.totalorder %s96_s9, %s9364_s3  ;;  %s9368_s28 = scalar_lea.vmem %s96_s9, 32 }
  0x66   :  { %p9369_p8 = scmp.lt.s32.totalorder %s96_s9, %s96_s9  ;;  %p9370_p9 = scmp.lt.s32.totalorder %s9368_s28, %s9364_s3 }
  0x68   :  { %76 = dma.hbm_to_vmem [thread:$0]  %s11488_s29, 16, %s74_s0, [#allocation8]  }
  0x69   :  { %p9371_p10 = por %p9370_p9, %p9369_p8 }
  0x6b   :  { %p9372_p11 = pnand %p9371_p10, %p9365_p7 }
  0x6d   :  { %9375 = shalt.err (!%p9372_p11)
}
  0x6e   :  { %s11489_s1 = sld [smem:[#allocation38_spill]]  ;;  %s9384_s18 = scalar_lea.vmem %s119_s10, 512 }
  0x6f   :  { %p9385_p12 = scmp.ne.s32.totalorder %s119_s10, %s9384_s18  ;;  %p9389_p13 = scmp.lt.s32.totalorder %s119_s10, %s119_s10 }
  0x70   :  { %p9390_p0 = scmp.lt.s32.totalorder %s9384_s18, %s9384_s18 }
  0x72   :  { %p9391_p1 = por %p9390_p0, %p9389_p13 }
  0x74   :  { %98 = dma.hbm_to_vmem [thread:$0]  %s11489_s1, 16, %s96_s9, [#allocation11]  }
  0x75   :  { %p9392_p2 = pnand %p9391_p1, %p9385_p12 }
  0x77   :  { %9395 = shalt.err (!%p9392_p2)
}
  0x78   :  { %s11490_s7 = sld [smem:[#allocation41_spill]]  ;;  %s9493_s4 = smov [#allocation18]  }
  0x79   :  { %s147_s29 = sshll.u32 %s9493_s4, 4  ;;  %s9494_s26 = smov [#allocation21]   ;;  %s148_s29 = int_to_ptr.vmem [resolvable:$true] %s147_s29 }
  0x7a   :  { %s181_s9 = sshll.u32 %s9494_s26, 4  ;;  %s9404_s5 = scalar_lea.vmem %s148_s29, 16  ;;  %s182_s9 = int_to_ptr.vmem [resolvable:$true] %s181_s9 }
  0x7b   :  { %p9405_p3 = scmp.ne.s32.totalorder %s148_s29, %s9404_s5  ;;  %s9408_s3 = scalar_lea.vmem %s148_s29, 32 }
  0x7c   :  { %p9409_p4 = scmp.lt.s32.totalorder %s148_s29, %s148_s29  ;;  %p9410_p5 = scmp.lt.s32.totalorder %s9408_s3, %s9404_s5 }
  0x7e   :  { %124 = dma.hbm_to_vmem [thread:$0]  %s11490_s7, 512, %s119_s10, [#allocation14], %s11486_s6, %s11486_s6, %s9484_s11  }
  0x7f   :  { %p9411_p6 = por %p9410_p5, %p9409_p4 }
  0x81   :  { %p9412_p7 = pnand %p9411_p6, %p9405_p3 }
  0x83   :  { %9415 = shalt.err (!%p9412_p7)
}
  0x84   :  { %150 = dma.hbm_to_vmem [thread:$0]  %s11448_s13, 16, %s148_s29, [#allocation17]  }
  0x85   :  { %s9424_s30 = scalar_lea.vmem %s182_s9, 16  ;;  %s9428_s11 = scalar_lea.vmem %s182_s9, 32 }
  0x86   :  { %p9425_p8 = scmp.ne.s32.totalorder %s182_s9, %s9424_s30  ;;  %p9429_p9 = scmp.lt.s32.totalorder %s182_s9, %s182_s9 }
  0x87   :  { %p9430_p10 = scmp.lt.s32.totalorder %s9428_s11, %s9424_s30 }
  0x89   :  { %p9431_p11 = por %p9430_p10, %p9429_p9 }
  0x8b   :  { %p9432_p12 = pnand %p9431_p11, %p9425_p8 }
  0x8d   :  { %9435 = shalt.err (!%p9432_p12)
}
  0x8e   :  { %184 = dma.hbm_to_vmem [thread:$0]  %s11457_s22, 16, %s182_s9, [#allocation20]  }
  0x8f   :  { %9464 = dma.done.wait [#allocation4], 256  }
  0x90   :  { %9465 = vsyncadd [#allocation4], 4294967040 }
  0x91   :  { %9466 = dma.done.wait [#allocation8], 144  }
  0x92   :  { %9467 = vsyncadd [#allocation8], 4294967152 }
  0x93   :  { %9468 = dma.done.wait [#allocation11], 272  }
  0x94   :  { %9469 = vsyncadd [#allocation11], 4294967024 }
  0x95   :  { %9470 = dma.done.wait [#allocation14], 576  }
  0x96   :  { %9471 = vsyncadd [#allocation14], 4294966720 }
  0x97   :  { %9472 = dma.done.wait [#allocation17], 48  }
  0x98   :  { %9473 = vsyncadd [#allocation17], 4294967248 }
  0x99   :  { %9474 = dma.done.wait [#allocation20], 32  }
  0x9a   :  { %9475 = vsyncadd [#allocation20], 4294967264  ;;  %vm234_vm0 = vcmask 64512   ;;  %v226_v0 = vld [vmem:[#allocation7] sm:$0xff]  ;;  %s11491_s18 = sld [smem:[#allocation32_spill]]  ;;  %v317_v3 = vld [vmem:[#allocation10 + $0x8] sm:$0xff] }
  0x9b   :  { %8007 = vmatprep.subr.mxu0 %v226_v0  ;;  %8012 = vmatprep.subr.mxu1 %v317_v3  ;;  %v316_v4 = vld [vmem:[#allocation10] sm:$0xff]  ;;  %v7112_v6 = vld [vmem:[#allocation9] ss:$0 sm:$0xff]  ;;  %vm325_vm1 = vcmask 130048   ;;  %s11492_s4 = sld [smem:[#allocation39_spill]]  ;;  %v9699_v20 = vld [vmem:[#allocation3 + $0x8] sm:$0xff] }
  0x9c   :  { %8008 = vmatpush3.msra.mxu0 %v226_v0  ;;  %8013 = vmatpush3.msra.mxu1 %v317_v3  ;;  %v7115_v13 = vld [vmem:[#allocation12] ss:$0 sm:$0xff]  ;;  %v407_v17 = vld [vmem:[#allocation3] sm:$0xff]  ;;  %v7120_v24 = vld [vmem:[#allocation13] ss:$0 sm:$0xff]  ;;  %vm1272_vm2 = vcmask 261120  }
  0x9d   :  { %8014 = vmatprep.subr.mxu1 %v316_v4  ;;  %v1183_v38 = vld [vmem:[#allocation15 + $0x8] sm:$0xff]  ;;  %v7134_v41 = vld [vmem:[#allocation13 + $0x2] ss:$0 sm:$0xff]  ;;  %v7127_v43 = vld [vmem:[#allocation13 + $0x1] ss:$0 sm:$0xff]  ;;  %s11493_s2 = sld [smem:[#allocation34_spill]] }
  0x9e   :  { %8015 = vmatpush3.msra.mxu1 %v316_v4  ;;  %v1182_v52 = vld [vmem:[#allocation15] sm:$0xff]  ;;  %v9495_v0 = vmov 0   ;;  %s11494_s8 = sld [smem:[#allocation43_spill]]  ;;  %vm2014_vm3 = vcmask 523264   ;;  %vm9497_vm4 = vmmov 0   ;;  %vm4480_vm5 = vcmask 457728  }
  0x9f   :  { %v7144_v57 = vld [vmem:[#allocation16] ss:$0 sm:$0xff]  ;;  %9194 = vset.pattern.permute.xlu0 %v9495_v0  ;;  %9195 = vset.pattern.permute.xlu1 %v9495_v0  ;;  %vm4693_vm6 = vcmask 588800   ;;  %vm4903_vm7 = vcmask 1043456   ;;  %vm4893_vm8 = vcmask 228352   ;;  %vm5091_vm9 = vcmask 293888  }
  0xa0   :  { %v224_v1 = vld [vmem:[%s11491_s18] sm:$0xff]  ;;  %v225_v2 = vld [vmem:[%s11491_s18 + $0x8] sm:$0xff]  ;;  %vm5873_vm10 = vcmask 162816   ;;  %vm6216_vm11 = vcmask 1041408   ;;  %vm6212_vm12 = vcmask 80896   ;;  %vm7003_vm13 = vcmask 982016  }
  0xa1   :  { %8009 = vmatprep.mubr.msk.f32.mxu0 %vm234_vm0, %v224_v1  ;;  %v410_v10 = vld [vmem:[%s11492_s4 + $0x8] sm:$0xff]  ;;  %v409_v11 = vld [vmem:[%s11492_s4] sm:$0xff]  ;;  %v7124_v21 = vld [vmem:[%s11492_s4 + $0x18] sm:$0xff]  ;;  %s9498_s30 = smov [#allocation23]   ;;  %s9499_s13 = smov [#allocation22]   ;;  %vm7077_vm14 = vcmask 17408  }
  0xa2   :  { %8010 = vmatmul.mubr.msk.f32.vlgmr.msra.gmra.mxu0 %vm234_vm0, %v225_v2  ;;  %8019 = vmatprep.subr.mxu0 %v410_v10  ;;  %v7123_v22 = vld [vmem:[%s11492_s4 + $0x10] sm:$0xff]  ;;  %v7131_v23 = vld [vmem:[%s11492_s4 + $0x28] sm:$0xff]  ;;  %v7130_v31 = vld [vmem:[%s11492_s4 + $0x20] sm:$0xff]  ;;  %s7085_s1 = sshll.u32 %s9499_s13, 4  ;;  %s7086_s1 = int_to_ptr.vmem [resolvable:$true] %s7085_s1 }
  0xa3   :  { %8020 = vmatpush3.msra.mxu0 %v410_v10  ;;  %v7138_v36 = vld [vmem:[%s11492_s4 + $0x38] sm:$0xff]  ;;  %v7137_v37 = vld [vmem:[%s11492_s4 + $0x30] sm:$0xff]  ;;  %v9757_v63 = vld [vmem:[%s11493_s2] sm:$0xff]  ;;  %p9449_p0 = scmp.lt.s32.totalorder %s7086_s1, %s7086_s1 }
  0xa4   :  { %8021 = vmatprep.subr.mxu0 %v409_v11  ;;  %v9763_v1 = vld [vmem:[%s11493_s2 + $0x10] sm:$0xff]  ;;  %v9769_v2 = vld [vmem:[%s11493_s2 + $0x18] sm:$0xff] }
  0xa5   :  { %8022 = vmatpush3.msra.mxu0 %v409_v11 }
  0xa6   :  { %8033 = vmatprep.subr.mxu0 %v7124_v21 }
 0x162   :  { %v8011_v5 = vpop.f32.mrf.mxu0 }
 0x163   :  { %v313_v9 = vadd.f32 %v8011_v5, %v7112_v6 }
 0x164   :  { %v307_v7 = vpop.f32.mrf.mxu0 }
 0x165   :  { %v308_v8 = vadd.f32 %v7112_v6, %v307_v7 }
 0x167   :  { %8016 = vmatprep.mubr.msk.f32.mxu1 %vm325_vm1, %v308_v8 }
 0x168   :  { %8017 = vmatmul.mubr.msk.f32.vlgmr.msra.gmra.mxu1 %vm325_vm1, %v313_v9 }
 0x169   :  { %8030 = vmatprep.mubr.msk.f32.mxu1 %vm325_vm1, %v407_v17 }
 0x228   :  { %v8018_v12 = vpop.f32.mrf.mxu1 }
 0x229   :  { %v404_v16 = vadd.f32 %v8018_v12, %v7115_v13 }
 0x22a   :  { %v398_v14 = vpop.f32.mrf.mxu1 }
 0x22b   :  { %v399_v15 = vadd.f32 %v7115_v13, %v398_v14  ;;  %v9777_v13 = vld [vmem:[%s11493_s2 + $0x8] sm:$0xff] }
 0x22d   :  { %8023 = vmatprep.mubr.msk.f32.mxu0 %vm325_vm1, %v399_v15 }
 0x22e   :  { %8024 = vmatmul.mubr.msk.f32.vlgmr.msra.gmra.mxu0 %vm325_vm1, %v404_v16 }
 0x22f   :  { %8034 = vmatpush3.msra.mxu0 %v7124_v21 }
 0x230   :  { %8035 = vmatprep.subr.mxu0 %v7123_v22 }
 0x231   :  { %8036 = vmatpush3.msra.mxu0 %v7123_v22 }
 0x232   :  { %8047 = vmatprep.subr.mxu0 %v7131_v23 }
 0x2ee   :  { %v8025_v18 = vpop.f32.mrf.mxu0 }
 0x2ef   :  { %8026 = vmatprep.subr.mxu1 %v8025_v18 }
 0x2f0   :  { %v483_v19 = vpop.f32.mrf.mxu0  ;;  %8027 = vmatpush3.msra.mxu1 %v8025_v18 }
 0x2f1   :  { %8028 = vmatprep.subr.mxu1 %v483_v19 }
 0x2f2   :  { %8029 = vmatpush3.msra.mxu1 %v483_v19 }
 0x2f3   :  { %8031 = vmatmul.mubr.msk.f32.vlgmr.msra.gmra.mxu1 %vm325_vm1, %v9699_v20 }
 0x2f4   :  { %8044 = vmatprep.mubr.msk.f32.mxu1 %vm325_vm1, %v407_v17 }
 0x3b3   :  { %v8032_v25 = vpop.f32.mrf.mxu1 }
 0x3b4   :  { %v577_v26 = vadd.f32 %v8032_v25, %v7120_v24 }
 0x3b5   :  { %v571_v27 = vpop.f32.mrf.mxu1 }
 0x3b6   :  { %v572_v28 = vadd.f32 %v7120_v24, %v571_v27  ;;  %v581_v30 = vmax.f32 %v577_v26, 0.0  ;;  %v7141_v27 = vld [vmem:[#allocation13 + $0x3] ss:$0 sm:$0xff] }
 0x3b8   :  { %v580_v29 = vmax.f32 %v572_v28, 0.0 }
 0x3ba   :  { %8037 = vmatprep.mubr.msk.f32.mxu0 %vm325_vm1, %v580_v29 }
 0x3bb   :  { %8038 = vmatmul.mubr.msk.f32.vlgmr.msra.gmra.mxu0 %vm325_vm1, %v581_v30 }
 0x3bc   :  { %8048 = vmatpush3.msra.mxu0 %v7131_v23  ;;  %8051 = vmatprep.mubr.msk.f32.mxu0 %vm325_vm1, %v399_v15 }
 0x3bd   :  { %8049 = vmatprep.subr.mxu0 %v7130_v31 }
 0x3be   :  { %8050 = vmatpush3.msra.mxu0 %v7130_v31 }
 0x3bf   :  { %8052 = vmatmul.mubr.msk.f32.vlgmr.msra.gmra.mxu0 %vm325_vm1, %v404_v16  ;;  %8061 = vmatprep.subr.mxu0 %v7138_v36 }
 0x3c0   :  { %8062 = vmatpush3.msra.mxu0 %v7138_v36 }
 0x3c1   :  { %8063 = vmatprep.subr.mxu0 %v7137_v37 }
 0x3c2   :  { %8064 = vmatpush3.msra.mxu0 %v7137_v37 }
 0x3c3   :  { %8075 = vmatprep.subr.mxu0 %v1183_v38 }
 0x47b   :  { %v8039_v32 = vpop.f32.mrf.mxu0 }
 0x47c   :  { %8040 = vmatprep.subr.mxu1 %v8039_v32 }
 0x47d   :  { %v657_v33 = vpop.f32.mrf.mxu0  ;;  %8041 = vmatpush3.msra.mxu1 %v8039_v32  ;;  %v1592_v32 = vld [vmem:[#allocation15 + $0x18] sm:$0xff] }
 0x47e   :  { %8042 = vmatprep.subr.mxu1 %v657_v33 }
 0x47f   :  { %8043 = vmatpush3.msra.mxu1 %v657_v33  ;;  %v8053_v34 = vpop.f32.mrf.mxu0 }
 0x480   :  { %8045 = vmatmul.mubr.msk.f32.vlgmr.msra.gmra.mxu1 %vm325_vm1, %v9699_v20  ;;  %8054 = vmatprep.subr.mxu1 %v8053_v34 }
 0x481   :  { %v820_v35 = vpop.f32.mrf.mxu0  ;;  %8055 = vmatpush3.msra.mxu1 %v8053_v34  ;;  %8058 = vmatprep.mubr.msk.f32.mxu1 %vm325_vm1, %v407_v17 }
 0x482   :  { %8056 = vmatprep.subr.mxu1 %v820_v35 }
 0x483   :  { %8057 = vmatpush3.msra.mxu1 %v820_v35 }
 0x484   :  { %8059 = vmatmul.mubr.msk.f32.vlgmr.msra.gmra.mxu1 %vm325_vm1, %v9699_v20 }
 0x485   :  { %8072 = vmatprep.mubr.msk.f32.mxu1 %vm325_vm1, %v407_v17 }
 0x540   :  { %v8046_v39 = vpop.f32.mrf.mxu1 }
 0x541   :  { %v746_v49 = vadd.f32 %v8046_v39, %v7127_v43 }
 0x542   :  { %v740_v40 = vpop.f32.mrf.mxu1 }
 0x543   :  { %v741_v46 = vadd.f32 %v7127_v43, %v740_v40  ;;  %v9738_v53 = vmax.f32 %v746_v49, 0.0  ;;  %v1591_v40 = vld [vmem:[#allocation15 + $0x10] sm:$0xff]  ;;  %v7157_v49 = vld [vmem:[#allocation16 + $0x1] ss:$0 sm:$0xff] }
 0x544   :  { %v8060_v42 = vpop.f32.mrf.mxu1 }
 0x545   :  { %v909_v44 = vadd.f32 %v8060_v42, %v7134_v41  ;;  %v9732_v51 = vmax.f32 %v741_v46, 0.0 }
 0x546   :  { %v903_v45 = vpop.f32.mrf.mxu1 }
 0x547   :  { %v904_v47 = vadd.f32 %v7134_v41, %v903_v45  ;;  %v913_v50 = vmax.f32 %v909_v44, 0.0 }
 0x549   :  { %v912_v48 = vmax.f32 %v904_v47, 0.0 }
 0x54b   :  { %8065 = vmatprep.mubr.msk.f32.mxu0 %vm325_vm1, %v912_v48 }
 0x54c   :  { %8066 = vmatmul.mubr.msk.f32.vlgmr.msra.gmra.mxu0 %vm325_vm1, %v913_v50 }
 0x54d   :  { %8076 = vmatpush3.msra.mxu0 %v1183_v38  ;;  %8079 = vmatprep.mubr.msk.f32.mxu0 %vm325_vm1, %v9732_v51 }
 0x54e   :  { %8077 = vmatprep.subr.mxu0 %v1182_v52 }
 0x54f   :  { %8078 = vmatpush3.msra.mxu0 %v1182_v52 }
 0x550   :  { %8092 = vmatprep.subr.mxu0 %v9738_v53  ;;  %8080 = vmatmul.mubr.msk.f32.vlgmr.msra.gmra.mxu0 %vm325_vm1, %v9738_v53 }
 0x551   :  { %8093 = vmatpush3.msra.mxu0 %v9738_v53 }
 0x552   :  { %8094 = vmatprep.subr.mxu0 %v9732_v51 }
 0x553   :  { %8095 = vmatpush3.msra.mxu0 %v9732_v51 }
 0x60c   :  { %v8067_v54 = vpop.f32.mrf.mxu0 }
 0x60d   :  { %8068 = vmatprep.subr.mxu1 %v8067_v54 }
 0x60e   :  { %v989_v55 = vpop.f32.mrf.mxu0  ;;  %8069 = vmatpush3.msra.mxu1 %v8067_v54 }
 0x60f   :  { %8070 = vmatprep.subr.mxu1 %v989_v55 }
 0x610   :  { %8071 = vmatpush3.msra.mxu1 %v989_v55  ;;  %v8081_v56 = vpop.f32.mrf.mxu0 }
 0x611   :  { %8082 = vmatprep.subr.mxu1 %v9738_v53  ;;  %8073 = vmatmul.mubr.msk.f32.vlgmr.msra.gmra.mxu1 %vm325_vm1, %v9699_v20  ;;  %v1269_v60 = vadd.f32 %v8081_v56, %v7144_v57 }
 0x612   :  { %v1263_v58 = vpop.f32.mrf.mxu0  ;;  %8083 = vmatpush3.msra.mxu1 %v9738_v53 }
 0x613   :  { %8084 = vmatprep.subr.mxu1 %v9732_v51  ;;  %v1264_v59 = vadd.f32 %v7144_v57, %v1263_v58  ;;  %v1276_v62 = vsel %vm1272_vm2, %v1269_v60, -inf }
 0x614   :  { %8085 = vmatpush3.msra.mxu1 %v9732_v51 }
 0x615   :  { %v1273_v61 = vsel %vm1272_vm2, %v1264_v59, -inf  ;;  %8102 = vmatprep.subr.mxu1 %v1592_v32 }
 0x616   :  { %1274 = vmax.xlane.f32.xlu0 %v1273_v61 }
 0x61a   :  { %1277 = vmax.xlane.f32.xlu0 %v1276_v62 }
 0x630   :  { %1299 = vperm.xlu0 %9194, %v9757_v63  }
 0x634   :  { %1447 = vperm.xlu0 %9194, %v9763_v1  }
 0x638   :  { %1452 = vperm.xlu0 %9194, %v9769_v2  }
 0x69f   :  { %v1275_v3 = vpop.xlane.xlu0 %1274 }
 0x6a0   :  { %v1279_v4 = vsub.f32 %v1264_v59, %v1275_v3 }
 0x6a2   :  { %v1281_v7 = vmul.f32 1.442695, %v1279_v4 }
 0x6a3   :  { %v1278_v5 = vpop.xlane.xlu0 %1277 }
 0x6a4   :  { %v1280_v6 = vsub.f32 %v1269_v60, %v1278_v5 }
 0x6a6   :  { %v1283_v8 = vmul.f32 1.442695, %v1280_v6 }
 0x6a8   :  { %9196 = vpow2.f32 %v1283_v8 }
 0x6a9   :  { %9198 = vpow2.f32 %v1281_v7 }
 0x6ab   :  { %v1300_v16 = vpop.permute.xlu0 %1299 }
 0x6af   :  { %v1448_v17 = vpop.permute.xlu0 %1447 }
 0x6b3   :  { %v1453_v25 = vpop.permute.xlu0 %1452 }
 0x6b5   :  { %v9197_v9 = vpop.eup %9196 }
 0x6b6   :  { %v1288_v10 = vsel %vm1272_vm2, %v9197_v9, 0.0  ;;  %v9199_v11 = vpop.eup %9198 }
 0x6b7   :  { %1289 = vadd.xlane.f32.xlu1 %v1288_v10  ;;  %v1285_v12 = vsel %vm1272_vm2, %v9199_v11, 0.0 }
 0x6bb   :  { %1286 = vadd.xlane.f32.xlu1 %v1285_v12 }
 0x6cc   :  { %1304 = vperm.xlu1 %9195, %v9777_v13  }
 0x6d1   :  { %v8074_v26 = vpop.f32.mrf.mxu1 }
 0x6d2   :  { %v1078_v30 = vadd.f32 %v8074_v26, %v7141_v27 }
 0x6d3   :  { %v1072_v33 = vpop.f32.mrf.mxu1 }
 0x6d4   :  { %v9780_v31 = vmax.f32 %v1078_v30, 0.0  ;;  %v1073_v34 = vadd.f32 %v7141_v27, %v1072_v33 }
 0x6d6   :  { %8109 = vmatprep.subr.mxu0 %v9780_v31  ;;  %v9785_v37 = vmax.f32 %v1073_v34, 0.0  ;;  %v1116_v27 = vsel %vm325_vm1, %v9780_v31, 0.0 }
 0x6d8   :  { %v1115_v26 = vsel %vm325_vm1, %v9785_v37, 0.0 }
 0x740   :  { %v1290_v14 = vpop.xlane.xlu1 %1289 }
 0x741   :  { %9200 = vrcp.f32 %v1290_v14 }
 0x744   :  { %v1287_v15 = vpop.xlane.xlu1 %1286 }
 0x745   :  { %9202 = vrcp.f32 %v1287_v15 }
 0x748   :  { %v1305_v24 = vpop.permute.xlu1 %1304 }
 0x74e   :  { %v9201_v18 = vpop.eup %9200 }
 0x74f   :  { %v1294_v23 = vmul.f32 %v9201_v18, %v9197_v9  ;;  %v9496_v18 = vmov 0.0  }
 0x751   :  { %v1308_v28 = vmul.f32 %v1305_v24, %v1294_v23  ;;  %v1456_v29 = vmul.f32 %v1453_v25, %v1294_v23  ;;  %v1083_v23 = vsel %vm325_vm1, %v9732_v51, 0.0  ;;  %v1084_v24 = vsel %vm325_vm1, %v9738_v53, 0.0 }
 0x752   :  { %v9203_v19 = vpop.eup %9202  ;;  %v1085_v25 = vadd.f32 %v1084_v24, %v1083_v23 }
 0x753   :  { %v1292_v20 = vmul.f32 %v9203_v19, %v9199_v11 }
 0x755   :  { %v1307_v21 = vmul.f32 %v1300_v16, %v1292_v20  ;;  %v1455_v22 = vmul.f32 %v1448_v17, %v1292_v20 }
 0x757   :  { %1309 = vxpose.xlu1.b32.start [1/2] (short) (narrow) %v1307_v21, 32  ;;  %1457 = vxpose.xlu0.b32.start [1/2] (short) (narrow) %v1455_v22, 32 }
 0x75b   :  { %1310 = vxpose.xlu1.b32.end [2/2] (short) (narrow) %v1308_v28, 32  ;;  %1458 = vxpose.xlu0.b32.end [2/2] (short) (narrow) %v1456_v29, 32  ;;  %v1117_v28 = vadd.f32 %v1116_v27, %v1115_v26 }
 0x7d3   :  { %v1325_v35 = vpop.trf.xlu1  ;;  %v1473_v36 = vpop.trf.xlu0 }
 0x7d4   :  { %8086 = vmatprep.mubr.msk.f32.mxu1 %vm325_vm1, %v1325_v35  ;;  %8096 = vmatprep.mubr.msk.f32.mxu0 %vm325_vm1, %v1473_v36 }
 0x7d7   :  { %v1326_v38 = vpop.trf.xlu1  ;;  %v1474_v39 = vpop.trf.xlu0 }
 0x7d8   :  { %8087 = vmatmul.mubr.msk.f32.vlgmr.msra.gmra.mxu1 %vm325_vm1, %v1326_v38  ;;  %8097 = vmatmul.mubr.msk.f32.vlgmr.msra.gmra.mxu0 %vm325_vm1, %v1474_v39 }
 0x7d9   :  { %8103 = vmatpush3.msra.mxu1 %v1592_v32  ;;  %8110 = vmatpush3.msra.mxu0 %v9780_v31 }
 0x7da   :  { %8104 = vmatprep.subr.mxu1 %v1591_v40  ;;  %8111 = vmatprep.subr.mxu0 %v9785_v37 }
 0x7db   :  { %v1327_v41 = vpop.trf.xlu1  ;;  %8105 = vmatpush3.msra.mxu1 %v1591_v40  ;;  %8112 = vmatpush3.msra.mxu0 %v9785_v37  ;;  %v1475_v43 = vpop.trf.xlu0 }
 0x7dc   :  { %8089 = vmatprep.mubr.msk.f32.mxu1 %vm325_vm1, %v1327_v41  ;;  %8119 = vmatprep.subr.mxu1 %v9780_v31 }
 0x7dd   :  { %8099 = vmatprep.mubr.msk.f32.mxu0 %vm325_vm1, %v1475_v43  ;;  %8129 = vmatprep.subr.mxu0 %v9496_v18 }
 0x7df   :  { %v1328_v42 = vpop.trf.xlu1  ;;  %v1476_v44 = vpop.trf.xlu0 }
 0x7e0   :  { %8090 = vmatmul.mubr.msk.f32.gmra.mxu1 %vm325_vm1, %v1328_v42  ;;  %8100 = vmatmul.mubr.msk.f32.gmra.mxu0 %vm325_vm1, %v1476_v44 }
 0x7e1   :  { %8106 = vmatprep.mubr.msk.f32.mxu1 %vm325_vm1, %v9785_v37 }
 0x7e4   :  { %8107 = vmatmul.mubr.msk.f32.vlgmr.msra.gmra.mxu1 %vm325_vm1, %v9780_v31 }
 0x7e5   :  { %8120 = vmatpush3.msra.mxu1 %v9780_v31 }
 0x7e6   :  { %8121 = vmatprep.subr.mxu1 %v9785_v37 }
 0x7e7   :  { %8122 = vmatpush3.msra.mxu1 %v9785_v37 }
 0x7e8   :  { %8166 = vmatprep.subr.mxu1 %v9496_v18 }
 0x898   :  { %v8088_v45 = vpop.f32.mrf.mxu1 }
 0x899   :  { %1439 = vst.msk [vmem:[#allocation2 + $0x8] sm:$0xff] %vm325_vm1, %v8088_v45 }
 0x89a   :  { %v1419_v46 = vpop.f32.mrf.mxu1 }
 0x89b   :  { %1438 = vst.msk [vmem:[#allocation2] sm:$0xff] %vm325_vm1, %v1419_v46 }
 0x8a0   :  { %v8091_v47 = vpop.f32.mrf.mxu1  ;;  %v9874_v45 = vld [vmem:[#allocation2 + $0x8] sm:$0xff] }
 0x8a1   :  { %1441 = vst.msk [vmem:[#allocation2 + $0x18] sm:$0xff] %vm325_vm1, %v8091_v47  ;;  %v9885_v47 = vld [vmem:[%s11494_s8] sm:$0xff] }
 0x8a2   :  { %v1429_v48 = vpop.f32.mrf.mxu1  ;;  %v9880_v46 = vld [vmem:[#allocation2] sm:$0xff] }
 0x8a3   :  { %1440 = vst.msk [vmem:[#allocation2 + $0x10] sm:$0xff] %vm325_vm1, %v1429_v48  ;;  %v9890_v48 = vld [vmem:[%s11494_s8 + $0x38] sm:$0xff] }
 0x8a4   :  { %v8108_v50 = vpop.f32.mrf.mxu1 }
 0x8a5   :  { %v1679_v52 = vadd.f32 %v8108_v50, %v7157_v49  ;;  %v9914_v50 = vld [vmem:[%s11494_s8 + $0x40] sm:$0xff] }
 0x8a6   :  { %v1673_v54 = vpop.f32.mrf.mxu1 }
 0x8a7   :  { %v1674_v55 = vadd.f32 %v7157_v49, %v1673_v54  ;;  %v1685_v56 = vsel %vm1272_vm2, %v1679_v52, -inf  ;;  %v9909_v49 = vld [vmem:[%s11494_s8 + $0x8] sm:$0xff] }
 0x8a8   :  { %1686 = vmax.xlane.f32.xlu0 %v1685_v56  ;;  %v9858_v41 = vld [vmem:[#allocation2 + $0x18] sm:$0xff]  ;;  %v9952_v56 = vld [vmem:[%s11494_s8 + $0x50] sm:$0xff] }
 0x8a9   :  { %v1682_v57 = vsel %vm1272_vm2, %v1674_v55, -inf  ;;  %v9934_v54 = vld [vmem:[%s11494_s8 + $0x48] sm:$0xff] }
 0x8aa   :  { %1683 = vmax.xlane.f32.xlu1 %v1682_v57  ;;  %v9866_v44 = vld [vmem:[#allocation2 + $0x10] sm:$0xff] }
 0x8ab   :  { %v9965_v57 = vld [vmem:[%s11494_s8 + $0x20] sm:$0xff] }
 0x8bb   :  { %1856 = vperm.xlu1 %9195, %v9763_v1  }
 0x8be   :  { %1708 = vperm.xlu0 %9194, %v9757_v63   ;;  %v8098_v63 = vpop.f32.mrf.mxu0 }
 0x8bf   :  { %1587 = vst.msk [vmem:[#allocation2 + $0x28] sm:$0xff] %vm325_vm1, %v8098_v63  ;;  %v7192_v63 = vld [vmem:[%s11447_s12 + $0x18] sm:$0xff] }
 0x8c0   :  { %v1567_v1 = vpop.f32.mrf.mxu0 }
 0x8c1   :  { %1586 = vst.msk [vmem:[#allocation2 + $0x20] sm:$0xff] %vm325_vm1, %v1567_v1 }
 0x8c2   :  { %1713 = vperm.xlu0 %9194, %v9777_v13   ;;  %v8101_v7 = vpop.f32.mrf.mxu0 }
 0x8c3   :  { %1589 = vst.msk [vmem:[#allocation2 + $0x38] sm:$0xff] %vm325_vm1, %v8101_v7 }
 0x8c4   :  { %v1577_v8 = vpop.f32.mrf.mxu0 }
 0x8c5   :  { %1588 = vst.msk [vmem:[#allocation2 + $0x30] sm:$0xff] %vm325_vm1, %v1577_v8  ;;  %v2137_v8 = vld [vmem:[%s11447_s12 + $0x8] sm:$0xff] }
 0x8c6   :  { %v9846_v38 = vld [vmem:[#allocation2 + $0x28] sm:$0xff] }
 0x8c8   :  { %v9852_v40 = vld [vmem:[#allocation2 + $0x20] sm:$0xff] }
 0x8ca   :  { %v9834_v34 = vld [vmem:[#allocation2 + $0x38] sm:$0xff] }
 0x8cc   :  { %v9840_v35 = vld [vmem:[#allocation2 + $0x30] sm:$0xff] }
 0x931   :  { %v1687_v58 = vpop.xlane.xlu0 %1686 }
 0x932   :  { %v1689_v59 = vsub.f32 %v1679_v52, %v1687_v58  ;;  %v9929_v52 = vld [vmem:[%s11494_s8 + $0x10] sm:$0xff]  ;;  %v9970_v58 = vld [vmem:[%s11494_s8 + $0x58] sm:$0xff] }
 0x933   :  { %v1684_v60 = vpop.xlane.xlu1 %1683 }
 0x934   :  { %v1692_v61 = vmul.f32 1.442695, %v1689_v59  ;;  %v1688_v62 = vsub.f32 %v1674_v55, %v1684_v60  ;;  %v9947_v55 = vld [vmem:[%s11494_s8 + $0x18] sm:$0xff]  ;;  %v9983_v59 = vld [vmem:[%s11494_s8 + $0x28] sm:$0xff]  ;;  %v9988_v60 = vld [vmem:[%s11494_s8 + $0x60] sm:$0xff] }
 0x936   :  { %9204 = vpow2.f32 %v1692_v61  ;;  %v1690_v0 = vmul.f32 1.442695, %v1688_v62  ;;  %v10001_v61 = vld [vmem:[%s11494_s8 + $0x30] sm:$0xff]  ;;  %v10006_v62 = vld [vmem:[%s11494_s8 + $0x68] sm:$0xff] }
 0x937   :  { %v1857_v9 = vpop.permute.xlu1 %1856 }
 0x938   :  { %9206 = vpow2.f32 %v1690_v0 }
 0x943   :  { %v9205_v3 = vpop.eup %9204 }
 0x944   :  { %v1697_v4 = vsel %vm1272_vm2, %v9205_v3, 0.0 }
 0x945   :  { %v9207_v5 = vpop.eup %9206  ;;  %1698 = vadd.xlane.f32.xlu1 %v1697_v4 }
 0x946   :  { %v1694_v6 = vsel %vm1272_vm2, %v9207_v5, 0.0 }
 0x949   :  { %1695 = vadd.xlane.f32.xlu1 %v1694_v6 }
 0x95a   :  { %1861 = vperm.xlu1 %9195, %v9769_v2   ;;  %v1709_v2 = vpop.permute.xlu0 %1708 }
 0x95e   :  { %v1714_v19 = vpop.permute.xlu0 %1713 }
 0x9ce   :  { %v1699_v10 = vpop.xlane.xlu1 %1698 }
 0x9cf   :  { %9208 = vrcp.f32 %v1699_v10  ;;  %v2136_v10 = vld [vmem:[%s11447_s12] sm:$0xff] }
 0x9d2   :  { %v1696_v11 = vpop.xlane.xlu1 %1695 }
 0x9d3   :  { %9210 = vrcp.f32 %v1696_v11 }
 0x9d6   :  { %v1862_v20 = vpop.permute.xlu1 %1861 }
 0x9dc   :  { %v9209_v12 = vpop.eup %9208 }
 0x9dd   :  { %v1703_v15 = vmul.f32 %v9209_v12, %v9205_v3 }
 0x9df   :  { %v1717_v21 = vmul.f32 %v1714_v19, %v1703_v15  ;;  %v1865_v22 = vmul.f32 %v1862_v20, %v1703_v15 }
 0x9e0   :  { %v9211_v13 = vpop.eup %9210 }
 0x9e1   :  { %v1701_v14 = vmul.f32 %v9211_v13, %v9207_v5 }
 0x9e3   :  { %v1864_v16 = vmul.f32 %v1857_v9, %v1701_v14  ;;  %v1716_v17 = vmul.f32 %v1709_v2, %v1701_v14  ;;  %v7191_v9 = vld [vmem:[%s11447_s12 + $0x10] sm:$0xff] }
 0x9e5   :  { %1866 = vxpose.xlu1.b32.start [1/2] (short) (narrow) %v1864_v16, 32  ;;  %1718 = vxpose.xlu0.b32.start [1/2] (short) (narrow) %v1716_v17, 32 }
 0x9e9   :  { %1867 = vxpose.xlu1.b32.end [2/2] (short) (narrow) %v1865_v22, 32  ;;  %1719 = vxpose.xlu0.b32.end [2/2] (short) (narrow) %v1717_v21, 32 }
 0xa18   :  { %1086 = vadd.xlane.f32.xlu1 %v1085_v25 }
 0xa1c   :  { %1118 = vadd.xlane.f32.xlu1 %v1117_v28 }
 0xa61   :  { %v1882_v29 = vpop.trf.xlu1  ;;  %v1734_v30 = vpop.trf.xlu0 }
 0xa62   :  { %8123 = vmatprep.mubr.msk.f32.mxu1 %vm325_vm1, %v1882_v29  ;;  %8113 = vmatprep.mubr.msk.f32.mxu0 %vm325_vm1, %v1734_v30 }
 0xa65   :  { %v1883_v32 = vpop.trf.xlu1  ;;  %v1735_v33 = vpop.trf.xlu0 }
 0xa66   :  { %8114 = vmatmul.mubr.msk.f32.vlgmr.msra.gmra.mxu0 %vm325_vm1, %v1735_v33  ;;  %8124 = vmatmul.mubr.msk.f32.vlgmr.msra.gmra.mxu1 %vm325_vm1, %v1883_v32 }
 0xa67   :  { %8130 = vmatpush3.msra.mxu0 %v9834_v34  ;;  %8167 = vmatpush3.msra.mxu1 %v9834_v34 }
 0xa68   :  { %8131 = vmatprep.subr.mxu0 %v9496_v18  ;;  %8168 = vmatprep.subr.mxu1 %v9496_v18 }
 0xa69   :  { %8132 = vmatpush3.msra.mxu0 %v9840_v35  ;;  %8169 = vmatpush3.msra.mxu1 %v9840_v35  ;;  %v1884_v36 = vpop.trf.xlu1  ;;  %v1736_v39 = vpop.trf.xlu0 }
 0xa6a   :  { %8133 = vmatprep.subr.mxu0 %v9496_v18  ;;  %8170 = vmatprep.subr.mxu1 %v9496_v18 }
 0xa6b   :  { %8171 = vmatpush3.msra.mxu1 %v9846_v38  ;;  %8134 = vmatpush3.msra.mxu0 %v9846_v38 }
 0xa6c   :  { %8135 = vmatprep.subr.mxu0 %v9496_v18  ;;  %8172 = vmatprep.subr.mxu1 %v9496_v18 }
 0xa6d   :  { %8136 = vmatpush3.msra.mxu0 %v9852_v40  ;;  %8173 = vmatpush3.msra.mxu1 %v9852_v40  ;;  %v1885_v42 = vpop.trf.xlu1  ;;  %v1737_v43 = vpop.trf.xlu0 }
 0xa6e   :  { %8126 = vmatprep.mubr.msk.f32.mxu1 %vm325_vm1, %v1884_v36  ;;  %8137 = vmatprep.subr.mxu0 %v9496_v18 }
 0xa6f   :  { %8174 = vmatprep.subr.mxu1 %v9496_v18  ;;  %8138 = vmatpush3.msra.mxu0 %v9858_v41 }
 0xa70   :  { %8175 = vmatpush3.msra.mxu1 %v9858_v41  ;;  %8139 = vmatprep.subr.mxu0 %v9496_v18 }
 0xa71   :  { %8127 = vmatmul.mubr.msk.f32.gmra.mxu1 %vm325_vm1, %v1885_v42  ;;  %8176 = vmatprep.subr.mxu1 %v9496_v18 }
 0xa72   :  { %8116 = vmatprep.mubr.msk.f32.mxu0 %vm325_vm1, %v1736_v39  ;;  %8140 = vmatpush3.msra.mxu0 %v9866_v44 }
 0xa73   :  { %8177 = vmatpush3.msra.mxu1 %v9866_v44  ;;  %8117 = vmatmul.mubr.msk.f32.gmra.mxu0 %vm325_vm1, %v1737_v43 }
 0xa74   :  { %8141 = vmatprep.subr.mxu0 %v9496_v18  ;;  %8178 = vmatprep.subr.mxu1 %v9496_v18 }
 0xa75   :  { %8142 = vmatpush3.msra.mxu0 %v9874_v45  ;;  %8179 = vmatpush3.msra.mxu1 %v9874_v45 }
 0xa76   :  { %8143 = vmatprep.subr.mxu0 %v9496_v18  ;;  %8180 = vmatprep.subr.mxu1 %v9496_v18 }
 0xa77   :  { %8144 = vmatpush3.msra.mxu0 %v9880_v46  ;;  %8145 = vmatprep.mubr.msk.f32.mxu0 %vm9497_vm4, %v9496_v18 }
 0xa78   :  { %8181 = vmatpush3.msra.mxu1 %v9880_v46  ;;  %8182 = vmatprep.mubr.msk.f32.mxu1 %vm9497_vm4, %v9496_v18 }
 0xa79   :  { %8146 = vmatmul.mubr.msk.f32.vlgmr.msra.gmra.mxu0 %vm2014_vm3, %v9885_v47  ;;  %8183 = vmatmul.mubr.msk.f32.vlgmr.msra.gmra.mxu1 %vm2014_vm3, %v9890_v48 }
 0xa7a   :  { %8148 = vmatprep.mubr.msk.f32.mxu0 %vm9497_vm4, %v9496_v18  ;;  %8185 = vmatprep.mubr.msk.f32.mxu1 %vm9497_vm4, %v9496_v18 }
 0xa7b   :  { %8203 = vmatprep.subr.mxu0 %v9496_v18  ;;  %8228 = vmatprep.subr.mxu1 %v9496_v18 }
 0xa7c   :  { %8204 = vmatpush3.msra.mxu0 %v7192_v63  ;;  %8229 = vmatpush3.msra.mxu1 %v2137_v8 }
 0xa7d   :  { %8149 = vmatmul.mubr.msk.f32.gmra.mxu0 %vm2014_vm3, %v9909_v49  ;;  %8186 = vmatmul.mubr.msk.f32.gmra.mxu1 %vm2014_vm3, %v9914_v50 }
 0xa7e   :  { %8151 = vmatprep.mubr.msk.f32.mxu0 %vm9497_vm4, %v9496_v18  ;;  %8188 = vmatprep.mubr.msk.f32.mxu1 %vm9497_vm4, %v9496_v18 }
 0xa7f   :  { %8205 = vmatprep.subr.mxu0 %v9496_v18  ;;  %8230 = vmatprep.subr.mxu1 %v9496_v18 }
 0xa80   :  { %8206 = vmatpush3.msra.mxu0 %v7191_v9  ;;  %8231 = vmatpush3.msra.mxu1 %v2136_v10 }
 0xa81   :  { %8152 = vmatmul.mubr.msk.f32.gmra.mxu0 %vm2014_vm3, %v9929_v52  ;;  %8189 = vmatmul.mubr.msk.f32.gmra.mxu1 %vm2014_vm3, %v9934_v54 }
 0xa82   :  { %8154 = vmatprep.mubr.msk.f32.mxu0 %vm9497_vm4, %v9496_v18  ;;  %8191 = vmatprep.mubr.msk.f32.mxu1 %vm9497_vm4, %v9496_v18 }
 0xa83   :  { %8253 = vmatprep.subr.mxu0 %v9496_v18  ;;  %8290 = vmatprep.subr.mxu1 %v9496_v18 }
 0xa85   :  { %8155 = vmatmul.mubr.msk.f32.gmra.mxu0 %vm2014_vm3, %v9947_v55  ;;  %8192 = vmatmul.mubr.msk.f32.gmra.mxu1 %vm2014_vm3, %v9952_v56 }
 0xa86   :  { %8157 = vmatprep.mubr.msk.f32.mxu0 %vm9497_vm4, %v9496_v18  ;;  %8194 = vmatprep.mubr.msk.f32.mxu1 %vm9497_vm4, %v9496_v18 }
 0xa89   :  { %8158 = vmatmul.mubr.msk.f32.gmra.mxu0 %vm2014_vm3, %v9965_v57  ;;  %8195 = vmatmul.mubr.msk.f32.gmra.mxu1 %vm2014_vm3, %v9970_v58 }
 0xa8a   :  { %8160 = vmatprep.mubr.msk.f32.mxu0 %vm9497_vm4, %v9496_v18  ;;  %8197 = vmatprep.mubr.msk.f32.mxu1 %vm9497_vm4, %v9496_v18 }
 0xa8d   :  { %8161 = vmatmul.mubr.msk.f32.gmra.mxu0 %vm2014_vm3, %v9983_v59  ;;  %8198 = vmatmul.mubr.msk.f32.gmra.mxu1 %vm2014_vm3, %v9988_v60 }
 0xa8e   :  { %8163 = vmatprep.mubr.msk.f32.mxu0 %vm9497_vm4, %v9496_v18  ;;  %8200 = vmatprep.mubr.msk.f32.mxu1 %vm9497_vm4, %v9496_v18 }
 0xa91   :  { %8164 = vmatmul.mubr.msk.f32.gmra.mxu0 %vm2014_vm3, %v10001_v61  ;;  %8201 = vmatmul.mubr.msk.f32.gmra.mxu1 %vm2014_vm3, %v10006_v62 }
 0xa92   :  { %8207 = vmatprep.mubr.msk.f32.mxu0 %vm9497_vm4, %v9496_v18  ;;  %8232 = vmatprep.mubr.msk.f32.mxu1 %vm9497_vm4, %v9496_v18 }
 0xaa1   :  { %v1087_v0 = vpop.xlane.xlu1 %1086 }
 0xaa2   :  { %v1088_v3 = vrot.slane %v1087_v0, 4 }
 0xaa4   :  { %v1089_v4 = vadd.f32 %v1088_v3, %v1087_v0 }
 0xaa6   :  { %v1090_v5 = vrot.slane %v1089_v4, 2 }
 0xaa8   :  { %v1091_v6 = vadd.f32 %v1090_v5, %v1089_v4 }
 0xaaa   :  { %v1092_v1 = vrot.slane %v1091_v6, 1 }
 0xaac   :  { %v1093_v7 = vadd.f32 %v1092_v1, %v1091_v6 }
 0xaae   :  { %9160 = vpush %v1093_v7 }
 0xadf   :  { %s9161_s3 = spop %9160 }
 0xae0   :  { %s1097_s28 = smul.f32 0.00390625, %s9161_s3 }
 0xae2   :  { %v1098_v11 = vstv %s1097_s28 }
 0xae3   :  { %v10033_v12 = vsub.f32 %v9732_v51, %v1098_v11  ;;  %v10036_v13 = vsub.f32 %v9738_v53, %v1098_v11 }
 0xae5   :  { %v1101_v2 = vmul.f32 %v10033_v12, %v10033_v12  ;;  %v1102_v14 = vmul.f32 %v10036_v13, %v10036_v13 }
 0xae7   :  { %v1103_v15 = vsel %vm325_vm1, %v1101_v2, 0.0  ;;  %v1104_v16 = vsel %vm325_vm1, %v1102_v14, 0.0 }
 0xae8   :  { %v1105_v17 = vadd.f32 %v1104_v16, %v1103_v15  ;;  %v10111_v16 = vld [vmem:[%s11494_s8 + $0x70] sm:$0xff] }
 0xaea   :  { %1106 = vadd.xlane.f32.xlu0 %v1105_v17 }
 0xb26   :  { %v8125_v19 = vpop.f32.mrf.mxu1  ;;  %v8115_v20 = vpop.f32.mrf.mxu0 }
 0xb27   :  { %1996 = vst.msk [vmem:[#allocation2 + $0x68] sm:$0xff] %vm325_vm1, %v8125_v19  ;;  %1849 = vst.msk [vmem:[#allocation2 + $0x48] sm:$0xff] %vm325_vm1, %v8115_v20  ;;  %v10123_v19 = vld [vmem:[%s11494_s8 + $0x78] sm:$0xff]  ;;  %v10136_v20 = vld [vmem:[%s11494_s8 + $0x80] sm:$0xff] }
 0xb28   :  { %v1976_v51 = vpop.f32.mrf.mxu1  ;;  %v1828_v53 = vpop.f32.mrf.mxu0 }
 0xb29   :  { %1995 = vst.msk [vmem:[#allocation2 + $0x60] sm:$0xff] %vm325_vm1, %v1976_v51  ;;  %1848 = vst.msk [vmem:[#allocation2 + $0x40] sm:$0xff] %vm325_vm1, %v1828_v53  ;;  %v10149_v51 = vld [vmem:[%s11494_s8 + $0x88] sm:$0xff]  ;;  %v10162_v53 = vld [vmem:[%s11494_s8 + $0x90] sm:$0xff] }
 0xb31   :  { %v8128_v21 = vpop.f32.mrf.mxu1 }
 0xb32   :  { %1998 = vst.msk [vmem:[#allocation2 + $0x78] sm:$0xff] %vm325_vm1, %v8128_v21  ;;  %v10174_v21 = vld [vmem:[%s11494_s8 + $0x98] sm:$0xff] }
 0xb33   :  { %v8118_v22 = vpop.f32.mrf.mxu0  ;;  %v1986_v23 = vpop.f32.mrf.mxu1 }
 0xb34   :  { %1851 = vst.msk [vmem:[#allocation2 + $0x58] sm:$0xff] %vm325_vm1, %v8118_v22  ;;  %1997 = vst.msk [vmem:[#allocation2 + $0x70] sm:$0xff] %vm325_vm1, %v1986_v23  ;;  %v1119_v22 = vpop.xlane.xlu1 %1118 }
 0xb35   :  { %v1838_v24 = vpop.f32.mrf.mxu0  ;;  %v1120_v23 = vrot.slane %v1119_v22, 4 }
 0xb36   :  { %1850 = vst.msk [vmem:[#allocation2 + $0x50] sm:$0xff] %vm325_vm1, %v1838_v24  ;;  %v10183_v24 = vld [vmem:[%s11494_s8 + $0xa0] sm:$0xff] }
 0xb39   :  { %v2102_v25 = vpop.f32.mrf.mxu0  ;;  %v2233_v26 = vpop.f32.mrf.mxu1 }
 0xb3a   :  { %8208 = vmatmul.mubr.msk.f32.vlgmr.msra.gmra.mxu0 %vm325_vm1, %v2233_v26  ;;  %8233 = vmatmul.mubr.msk.f32.vlgmr.msra.gmra.mxu1 %vm325_vm1, %v2102_v25  ;;  %v1121_v25 = vadd.f32 %v1120_v23, %v1119_v22  ;;  %v10192_v26 = vld [vmem:[%s11494_s8 + $0xa8] sm:$0xff] }
 0xb3b   :  { %8254 = vmatpush3.msra.mxu0 %v9834_v34  ;;  %v8147_v27 = vpop.f32.mrf.mxu0  ;;  %v8184_v28 = vpop.f32.mrf.mxu1  ;;  %8210 = vmatprep.mubr.msk.f32.mxu0 %vm9497_vm4, %v9496_v18 }
 0xb3c   :  { %8255 = vmatprep.subr.mxu0 %v9496_v18  ;;  %8235 = vmatprep.mubr.msk.f32.mxu1 %vm9497_vm4, %v9496_v18  ;;  %v1122_v27 = vrot.slane %v1121_v25, 2  ;;  %v10202_v28 = vld [vmem:[%s11494_s8 + $0xb0] sm:$0xff] }
 0xb3d   :  { %8256 = vmatpush3.msra.mxu0 %v9840_v35  ;;  %v2107_v29 = vpop.f32.mrf.mxu0  ;;  %v2238_v30 = vpop.f32.mrf.mxu1 }
 0xb3e   :  { %8257 = vmatprep.subr.mxu0 %v9496_v18  ;;  %8211 = vmatmul.mubr.msk.f32.gmra.mxu0 %vm325_vm1, %v2238_v30 }
 0xb3f   :  { %8236 = vmatmul.mubr.msk.f32.gmra.mxu1 %vm325_vm1, %v2107_v29  ;;  %8258 = vmatpush3.msra.mxu0 %v9846_v38  ;;  %v8150_v32 = vpop.f32.mrf.mxu0  ;;  %v8187_v33 = vpop.f32.mrf.mxu1 }
 0xb40   :  { %8259 = vmatprep.subr.mxu0 %v9496_v18  ;;  %8213 = vmatprep.mubr.msk.f32.mxu0 %vm9497_vm4, %v9496_v18  ;;  %v10215_v32 = vld [vmem:[%s11494_s8 + $0xb8] sm:$0xff]  ;;  %v1123_v33 = vadd.f32 %v1122_v27, %v1121_v25 }
 0xb41   :  { %8260 = vmatpush3.msra.mxu0 %v9852_v40  ;;  %v2112_v36 = vpop.f32.mrf.mxu0  ;;  %v2243_v39 = vpop.f32.mrf.mxu1  ;;  %8238 = vmatprep.mubr.msk.f32.mxu1 %vm9497_vm4, %v9496_v18 }
 0xb42   :  { %8261 = vmatprep.subr.mxu0 %v9496_v18  ;;  %8214 = vmatmul.mubr.msk.f32.gmra.mxu0 %vm325_vm1, %v2243_v39  ;;  %v1124_v39 = vrot.slane %v1123_v33, 1 }
 0xb43   :  { %8239 = vmatmul.mubr.msk.f32.gmra.mxu1 %vm325_vm1, %v2112_v36  ;;  %8262 = vmatpush3.msra.mxu0 %v9858_v41  ;;  %v8153_v42 = vpop.f32.mrf.mxu0  ;;  %v8190_v43 = vpop.f32.mrf.mxu1 }
 0xb44   :  { %8263 = vmatprep.subr.mxu0 %v9496_v18  ;;  %8216 = vmatprep.mubr.msk.f32.mxu0 %vm9497_vm4, %v9496_v18  ;;  %v10241_v42 = vld [vmem:[%s11494_s8 + $0xc8] sm:$0xff]  ;;  %v1125_v43 = vadd.f32 %v1124_v39, %v1123_v33 }
 0xb45   :  { %8264 = vmatpush3.msra.mxu0 %v9866_v44  ;;  %v2117_v0 = vpop.f32.mrf.mxu0  ;;  %v2248_v3 = vpop.f32.mrf.mxu1  ;;  %8241 = vmatprep.mubr.msk.f32.mxu1 %vm9497_vm4, %v9496_v18 }
 0xb46   :  { %8265 = vmatprep.subr.mxu0 %v9496_v18  ;;  %8217 = vmatmul.mubr.msk.f32.gmra.mxu0 %vm325_vm1, %v2248_v3  ;;  %v10279_v3 = vld [vmem:[#allocation2 + $0x78] sm:$0xff] }
 0xb47   :  { %8242 = vmatmul.mubr.msk.f32.gmra.mxu1 %vm325_vm1, %v2117_v0  ;;  %8266 = vmatpush3.msra.mxu0 %v9874_v45  ;;  %v8156_v4 = vpop.f32.mrf.mxu0  ;;  %v8193_v5 = vpop.f32.mrf.mxu1  ;;  %v10274_v0 = vld [vmem:[%s11494_s8 + $0xe0] sm:$0xff] }
 0xb48   :  { %8267 = vmatprep.subr.mxu0 %v9496_v18  ;;  %8219 = vmatprep.mubr.msk.f32.mxu0 %vm9497_vm4, %v9496_v18  ;;  %v10287_v4 = vld [vmem:[%s11494_s8 + $0xe8] sm:$0xff]  ;;  %v10290_v5 = vld [vmem:[#allocation2 + $0x70] sm:$0xff] }
 0xb49   :  { %8268 = vmatpush3.msra.mxu0 %v9880_v46  ;;  %v2122_v6 = vpop.f32.mrf.mxu0  ;;  %v2253_v63 = vpop.f32.mrf.mxu1  ;;  %8244 = vmatprep.mubr.msk.f32.mxu1 %vm9497_vm4, %v9496_v18 }
 0xb4a   :  { %8220 = vmatmul.mubr.msk.f32.gmra.mxu0 %vm325_vm1, %v2253_v63  ;;  %8315 = vmatprep.subr.mxu0 %v9496_v18  ;;  %v10304_v63 = vld [vmem:[%s11494_s8 + $0xf0] sm:$0xff] }
 0xb4b   :  { %8245 = vmatmul.mubr.msk.f32.gmra.mxu1 %vm325_vm1, %v2122_v6  ;;  %v8159_v1 = vpop.f32.mrf.mxu0  ;;  %v8196_v7 = vpop.f32.mrf.mxu1  ;;  %8222 = vmatprep.mubr.msk.f32.mxu0 %vm9497_vm4, %v9496_v18  ;;  %v10296_v6 = vld [vmem:[#allocation2 + $0x68] sm:$0xff] }
 0xb4c   :  { %8247 = vmatprep.mubr.msk.f32.mxu1 %vm9497_vm4, %v9496_v18  ;;  %v10307_v1 = vld [vmem:[#allocation2 + $0x60] sm:$0xff]  ;;  %v10309_v7 = vld [vmem:[#allocation2 + $0x58] sm:$0xff] }
 0xb4d   :  { %v2127_v8 = vpop.f32.mrf.mxu0  ;;  %v2258_v9 = vpop.f32.mrf.mxu1 }
 0xb4e   :  { %8223 = vmatmul.mubr.msk.f32.gmra.mxu0 %vm325_vm1, %v2258_v9  ;;  %v7221_v9 = vld [vmem:[%s11447_s12 + $0x20] sm:$0xff] }
 0xb4f   :  { %8248 = vmatmul.mubr.msk.f32.gmra.mxu1 %vm325_vm1, %v2127_v8  ;;  %v8162_v10 = vpop.f32.mrf.mxu0  ;;  %v8199_v11 = vpop.f32.mrf.mxu1  ;;  %8225 = vmatprep.mubr.msk.f32.mxu0 %vm9497_vm4, %v9496_v18  ;;  %v10315_v8 = vld [vmem:[#allocation2 + $0x50] sm:$0xff] }
 0xb50   :  { %8250 = vmatprep.mubr.msk.f32.mxu1 %vm9497_vm4, %v9496_v18  ;;  %v10326_v10 = vld [vmem:[%s11494_s8 + $0xf8] sm:$0xff] }
 0xb51   :  { %v2132_v2 = vpop.f32.mrf.mxu0  ;;  %v2263_v14 = vpop.f32.mrf.mxu1  ;;  %v10329_v11 = vld [vmem:[#allocation2 + $0x48] sm:$0xff] }
 0xb52   :  { %8226 = vmatmul.mubr.msk.f32.gmra.mxu0 %vm325_vm1, %v2263_v14  ;;  %v10344_v14 = vld [vmem:[%s11494_s8 + $0x100] sm:$0xff] }
 0xb53   :  { %8251 = vmatmul.mubr.msk.f32.gmra.mxu1 %vm325_vm1, %v2132_v2  ;;  %v8202_v15 = vpop.f32.mrf.mxu1  ;;  %8269 = vmatprep.mubr.msk.f32.mxu0 %vm9497_vm4, %v9496_v18  ;;  %v8165_v17 = vpop.f32.mrf.mxu0  ;;  %v10336_v2 = vld [vmem:[#allocation2 + $0x40] sm:$0xff] }
 0xb54   :  { %8294 = vmatprep.mubr.msk.f32.mxu1 %vm9497_vm4, %v9496_v18  ;;  %v10356_v15 = vld [vmem:[%s11494_s8 + $0x108] sm:$0xff]  ;;  %v10365_v17 = vld [vmem:[%s11494_s8 + $0x110] sm:$0xff] }
 0xb56   :  { %8270 = vmatmul.mubr.msk.f32.vlgmr.msra.gmra.mxu0 %vm2014_vm3, %v10111_v16 }
 0xb57   :  { %8316 = vmatpush3.msra.mxu0 %v9834_v34  ;;  %8272 = vmatprep.mubr.msk.f32.mxu0 %vm9497_vm4, %v9496_v18 }
 0xb58   :  { %8317 = vmatprep.subr.mxu0 %v9496_v18 }
 0xb59   :  { %8318 = vmatpush3.msra.mxu0 %v9840_v35 }
 0xb5a   :  { %8319 = vmatprep.subr.mxu0 %v9496_v18  ;;  %8273 = vmatmul.mubr.msk.f32.gmra.mxu0 %vm2014_vm3, %v10123_v19 }
 0xb5b   :  { %8320 = vmatpush3.msra.mxu0 %v9846_v38  ;;  %8275 = vmatprep.mubr.msk.f32.mxu0 %vm9497_vm4, %v9496_v18 }
 0xb5c   :  { %8321 = vmatprep.subr.mxu0 %v9496_v18 }
 0xb5d   :  { %8322 = vmatpush3.msra.mxu0 %v9852_v40 }
 0xb5e   :  { %8323 = vmatprep.subr.mxu0 %v9496_v18  ;;  %8276 = vmatmul.mubr.msk.f32.gmra.mxu0 %vm2014_vm3, %v10136_v20 }
 0xb5f   :  { %8324 = vmatpush3.msra.mxu0 %v9858_v41  ;;  %8278 = vmatprep.mubr.msk.f32.mxu0 %vm9497_vm4, %v9496_v18 }
 0xb60   :  { %8325 = vmatprep.subr.mxu0 %v9496_v18 }
 0xb61   :  { %8326 = vmatpush3.msra.mxu0 %v9866_v44 }
 0xb62   :  { %8327 = vmatprep.subr.mxu0 %v9496_v18  ;;  %8279 = vmatmul.mubr.msk.f32.gmra.mxu0 %vm2014_vm3, %v10149_v51 }
 0xb63   :  { %8328 = vmatpush3.msra.mxu0 %v9874_v45  ;;  %8281 = vmatprep.mubr.msk.f32.mxu0 %vm9497_vm4, %v9496_v18 }
 0xb64   :  { %8329 = vmatprep.subr.mxu0 %v9496_v18 }
 0xb65   :  { %8330 = vmatpush3.msra.mxu0 %v9880_v46 }
 0xb66   :  { %8282 = vmatmul.mubr.msk.f32.gmra.mxu0 %vm2014_vm3, %v10162_v53  ;;  %8377 = vmatprep.subr.mxu0 %v9496_v18 }
 0xb67   :  { %8284 = vmatprep.mubr.msk.f32.mxu0 %vm9497_vm4, %v9496_v18 }
 0xb6a   :  { %8285 = vmatmul.mubr.msk.f32.gmra.mxu0 %vm2014_vm3, %v10174_v21 }
 0xb6b   :  { %8287 = vmatprep.mubr.msk.f32.mxu0 %vm9497_vm4, %v9496_v18 }
 0xb6e   :  { %8288 = vmatmul.mubr.msk.f32.gmra.mxu0 %vm2014_vm3, %v10183_v24 }
 0xb6f   :  { %8331 = vmatprep.mubr.msk.f32.mxu0 %vm9497_vm4, %v9496_v18 }
 0xb72   :  { %8332 = vmatmul.mubr.msk.f32.vlgmr.msra.gmra.mxu0 %vm2014_vm3, %v10192_v26 }
 0xb73   :  { %8378 = vmatpush3.msra.mxu0 %v9834_v34  ;;  %8334 = vmatprep.mubr.msk.f32.mxu0 %vm9497_vm4, %v9496_v18  ;;  %v1107_v29 = vpop.xlane.xlu0 %1106 }
 0xb74   :  { %8379 = vmatprep.subr.mxu0 %v9496_v18  ;;  %v1108_v30 = vrot.slane %v1107_v29, 4 }
 0xb75   :  { %8380 = vmatpush3.msra.mxu0 %v9840_v35 }
 0xb76   :  { %8381 = vmatprep.subr.mxu0 %v9496_v18  ;;  %8335 = vmatmul.mubr.msk.f32.gmra.mxu0 %vm2014_vm3, %v10202_v28  ;;  %v1109_v34 = vadd.f32 %v1108_v30, %v1107_v29 }
 0xb77   :  { %8382 = vmatpush3.msra.mxu0 %v9846_v38  ;;  %8337 = vmatprep.mubr.msk.f32.mxu0 %vm9497_vm4, %v9496_v18  ;;  %v10228_v38 = vld [vmem:[%s11494_s8 + $0xc0] sm:$0xff] }
 0xb78   :  { %8383 = vmatprep.subr.mxu0 %v9496_v18  ;;  %v1110_v35 = vrot.slane %v1109_v34, 2 }
 0xb79   :  { %8384 = vmatpush3.msra.mxu0 %v9852_v40 }
 0xb7a   :  { %v1111_v36 = vadd.f32 %v1110_v35, %v1109_v34  ;;  %8385 = vmatprep.subr.mxu0 %v9496_v18  ;;  %8338 = vmatmul.mubr.msk.f32.gmra.mxu0 %vm2014_vm3, %v10215_v32 }
 0xb7b   :  { %8386 = vmatpush3.msra.mxu0 %v9858_v41  ;;  %8340 = vmatprep.mubr.msk.f32.mxu0 %vm9497_vm4, %v9496_v18 }
 0xb7c   :  { %8387 = vmatprep.subr.mxu0 %v9496_v18  ;;  %v1112_v40 = vrot.slane %v1111_v36, 1 }
 0xb7d   :  { %8388 = vmatpush3.msra.mxu0 %v9866_v44  ;;  %v10253_v44 = vld [vmem:[%s11494_s8 + $0xd0] sm:$0xff] }
 0xb7e   :  { %8389 = vmatprep.subr.mxu0 %v9496_v18  ;;  %8341 = vmatmul.mubr.msk.f32.gmra.mxu0 %vm2014_vm3, %v10228_v38  ;;  %v1113_v41 = vadd.f32 %v1112_v40, %v1111_v36 }
 0xb7f   :  { %8390 = vmatpush3.msra.mxu0 %v9874_v45  ;;  %8343 = vmatprep.mubr.msk.f32.mxu0 %vm9497_vm4, %v9496_v18  ;;  %v10262_v45 = vld [vmem:[%s11494_s8 + $0xd8] sm:$0xff] }
 0xb80   :  { %8391 = vmatprep.subr.mxu0 %v9496_v18  ;;  %9162 = vpush %v1113_v41 }
 0xb81   :  { %8392 = vmatpush3.msra.mxu0 %v9880_v46  ;;  %9164 = vpush %v1125_v43  ;;  %v7222_v46 = vld [vmem:[%s11447_s12 + $0x28] sm:$0xff] }
 0xb82   :  { %8344 = vmatmul.mubr.msk.f32.gmra.mxu0 %vm2014_vm3, %v10241_v42  ;;  %8439 = vmatprep.subr.mxu0 %v9496_v18 }
 0xb83   :  { %8346 = vmatprep.mubr.msk.f32.mxu0 %vm9497_vm4, %v9496_v18  ;;  %8291 = vmatpush3.msra.mxu1 %v7222_v46 }
 0xb84   :  { %8292 = vmatprep.subr.mxu1 %v9496_v18 }
 0xb85   :  { %8293 = vmatpush3.msra.mxu1 %v7221_v9 }
 0xb86   :  { %8347 = vmatmul.mubr.msk.f32.gmra.mxu0 %vm2014_vm3, %v10253_v44  ;;  %8352 = vmatprep.subr.mxu1 %v9496_v18 }
 0xb87   :  { %8349 = vmatprep.mubr.msk.f32.mxu0 %vm9497_vm4, %v9496_v18 }
 0xb8a   :  { %8350 = vmatmul.mubr.msk.f32.gmra.mxu0 %vm2014_vm3, %v10262_v45 }
 0xb8b   :  { %8393 = vmatprep.mubr.msk.f32.mxu0 %vm9497_vm4, %v9496_v18 }
 0xb8e   :  { %8394 = vmatmul.mubr.msk.f32.vlgmr.msra.gmra.mxu0 %vm2014_vm3, %v10274_v0 }
 0xb8f   :  { %8440 = vmatpush3.msra.mxu0 %v10279_v3  ;;  %8396 = vmatprep.mubr.msk.f32.mxu0 %vm9497_vm4, %v9496_v18 }
 0xb90   :  { %8441 = vmatprep.subr.mxu0 %v9496_v18 }
 0xb91   :  { %8442 = vmatpush3.msra.mxu0 %v10290_v5 }
 0xb92   :  { %8443 = vmatprep.subr.mxu0 %v9496_v18  ;;  %8397 = vmatmul.mubr.msk.f32.gmra.mxu0 %vm2014_vm3, %v10287_v4 }
 0xb93   :  { %8444 = vmatpush3.msra.mxu0 %v10296_v6  ;;  %8399 = vmatprep.mubr.msk.f32.mxu0 %vm9497_vm4, %v9496_v18 }
 0xb94   :  { %8445 = vmatprep.subr.mxu0 %v9496_v18 }
 0xb95   :  { %8446 = vmatpush3.msra.mxu0 %v10307_v1 }
 0xb96   :  { %8447 = vmatprep.subr.mxu0 %v9496_v18  ;;  %8400 = vmatmul.mubr.msk.f32.gmra.mxu0 %vm2014_vm3, %v10304_v63 }
 0xb97   :  { %8448 = vmatpush3.msra.mxu0 %v10309_v7  ;;  %8402 = vmatprep.mubr.msk.f32.mxu0 %vm9497_vm4, %v9496_v18 }
 0xb98   :  { %8449 = vmatprep.subr.mxu0 %v9496_v18 }
 0xb99   :  { %8450 = vmatpush3.msra.mxu0 %v10315_v8 }
 0xb9a   :  { %8451 = vmatprep.subr.mxu0 %v9496_v18  ;;  %8403 = vmatmul.mubr.msk.f32.gmra.mxu0 %vm2014_vm3, %v10326_v10 }
 0xb9b   :  { %8452 = vmatpush3.msra.mxu0 %v10329_v11  ;;  %8405 = vmatprep.mubr.msk.f32.mxu0 %vm9497_vm4, %v9496_v18 }
 0xb9c   :  { %8453 = vmatprep.subr.mxu0 %v9496_v18 }
 0xb9d   :  { %8454 = vmatpush3.msra.mxu0 %v10336_v2 }
 0xb9e   :  { %8406 = vmatmul.mubr.msk.f32.gmra.mxu0 %vm2014_vm3, %v10344_v14  ;;  %8501 = vmatprep.subr.mxu0 %v9496_v18 }
 0xb9f   :  { %8408 = vmatprep.mubr.msk.f32.mxu0 %vm9497_vm4, %v9496_v18 }
 0xba2   :  { %8409 = vmatmul.mubr.msk.f32.gmra.mxu0 %vm2014_vm3, %v10356_v15 }
 0xba3   :  { %8411 = vmatprep.mubr.msk.f32.mxu0 %vm9497_vm4, %v9496_v18 }
 0xba6   :  { %8412 = vmatmul.mubr.msk.f32.gmra.mxu0 %vm2014_vm3, %v10365_v17 }
 0xba7   :  { %8455 = vmatprep.mubr.msk.f32.mxu0 %vm9497_vm4, %v9496_v18 }
 0xbaa   :  { %8456 = vmatmul.mubr.msk.f32.vlgmr.msra.gmra.mxu0 %vm2014_vm3, %v9885_v47 }
 0xbab   :  { %8502 = vmatpush3.msra.mxu0 %v10279_v3  ;;  %8458 = vmatprep.mubr.msk.f32.mxu0 %vm9497_vm4, %v9496_v18 }
 0xbac   :  { %8503 = vmatprep.subr.mxu0 %v9496_v18 }
 0xbad   :  { %8504 = vmatpush3.msra.mxu0 %v10290_v5 }
 0xbae   :  { %8505 = vmatprep.subr.mxu0 %v9496_v18  ;;  %8459 = vmatmul.mubr.msk.f32.gmra.mxu0 %vm2014_vm3, %v9909_v49 }
 0xbaf   :  { %8506 = vmatpush3.msra.mxu0 %v10296_v6  ;;  %8461 = vmatprep.mubr.msk.f32.mxu0 %vm9497_vm4, %v9496_v18 }
 0xbb0   :  { %8507 = vmatprep.subr.mxu0 %v9496_v18 }
 0xbb1   :  { %8508 = vmatpush3.msra.mxu0 %v10307_v1  ;;  %s10386_s8 = spop %9162 }
 0xbb2   :  { %8509 = vmatprep.subr.mxu0 %v9496_v18  ;;  %8462 = vmatmul.mubr.msk.f32.gmra.mxu0 %vm2014_vm3, %v9929_v52  ;;  %s9165_s7 = spop %9164  ;;  %s1161_s6 = sadd.f32 1e-08, %s10386_s8 }
 0xbb3   :  { %8510 = vmatpush3.msra.mxu0 %v10309_v7  ;;  %s1129_s4 = smul.f32 0.00390625, %s9165_s7  ;;  %8464 = vmatprep.mubr.msk.f32.mxu0 %vm9497_vm4, %v9496_v18 }
 0xbb4   :  { %8511 = vmatprep.subr.mxu0 %v9496_v18 }
 0xbb5   :  { %8512 = vmatpush3.msra.mxu0 %v10315_v8  ;;  %v1130_v47 = vstv %s1129_s4 }
 0xbb6   :  { %v1131_v49 = vsub.f32 %v9785_v37, %v1130_v47  ;;  %v1132_v22 = vsub.f32 %v9780_v31, %v1130_v47  ;;  %8513 = vmatprep.subr.mxu0 %v9496_v18  ;;  %8465 = vmatmul.mubr.msk.f32.gmra.mxu0 %vm2014_vm3, %v9947_v55 }
 0xbb7   :  { %8514 = vmatpush3.msra.mxu0 %v10329_v11  ;;  %8467 = vmatprep.mubr.msk.f32.mxu0 %vm9497_vm4, %v9496_v18 }
 0xbb8   :  { %v1133_v52 = vmul.f32 %v1131_v49, %v1131_v49  ;;  %v1134_v23 = vmul.f32 %v1132_v22, %v1132_v22  ;;  %v1147_v25 = vmul.f32 %v1131_v49, %v10033_v12  ;;  %v1148_v27 = vmul.f32 %v1132_v22, %v10036_v13  ;;  %8515 = vmatprep.subr.mxu0 %v9496_v18 }
 0xbb9   :  { %8516 = vmatpush3.msra.mxu0 %v10336_v2 }
 0xbba   :  { %8468 = vmatmul.mubr.msk.f32.gmra.mxu0 %vm2014_vm3, %v9965_v57  ;;  %v1135_v31 = vsel %vm325_vm1, %v1133_v52, 0.0  ;;  %v1136_v37 = vsel %vm325_vm1, %v1134_v23, 0.0  ;;  %8563 = vmatprep.subr.mxu0 %v9496_v18  ;;  %v1149_v12 = vsel %vm325_vm1, %v1147_v25, 0.0  ;;  %v1150_v13 = vsel %vm325_vm1, %v1148_v27, 0.0 }
 0xbbb   :  { %8470 = vmatprep.mubr.msk.f32.mxu0 %vm9497_vm4, %v9496_v18  ;;  %v1137_v55 = vadd.f32 %v1136_v37, %v1135_v31  ;;  %v1151_v57 = vadd.f32 %v1150_v13, %v1149_v12 }
 0xbbd   :  { %1138 = vadd.xlane.f32.xlu1 %v1137_v55 }
 0xbbe   :  { %8471 = vmatmul.mubr.msk.f32.gmra.mxu0 %vm2014_vm3, %v9983_v59 }
 0xbbf   :  { %8473 = vmatprep.mubr.msk.f32.mxu0 %vm9497_vm4, %v9496_v18 }
 0xbc1   :  { %1152 = vadd.xlane.f32.xlu1 %v1151_v57 }
 0xbc2   :  { %8474 = vmatmul.mubr.msk.f32.gmra.mxu0 %vm2014_vm3, %v10001_v61 }
 0xbc3   :  { %8517 = vmatprep.mubr.msk.f32.mxu0 %vm9497_vm4, %v9496_v18 }
 0xbc6   :  { %8518 = vmatmul.mubr.msk.f32.vlgmr.msra.gmra.mxu0 %vm2014_vm3, %v9890_v48 }
 0xbc7   :  { %8564 = vmatpush3.msra.mxu0 %v10279_v3  ;;  %8520 = vmatprep.mubr.msk.f32.mxu0 %vm9497_vm4, %v9496_v18 }
 0xbc8   :  { %8565 = vmatprep.subr.mxu0 %v9496_v18 }
 0xbc9   :  { %8566 = vmatpush3.msra.mxu0 %v10290_v5 }
 0xbca   :  { %8567 = vmatprep.subr.mxu0 %v9496_v18  ;;  %8521 = vmatmul.mubr.msk.f32.gmra.mxu0 %vm2014_vm3, %v9914_v50 }
 0xbcb   :  { %8568 = vmatpush3.msra.mxu0 %v10296_v6  ;;  %8523 = vmatprep.mubr.msk.f32.mxu0 %vm9497_vm4, %v9496_v18 }
 0xbcc   :  { %8569 = vmatprep.subr.mxu0 %v9496_v18 }
 0xbcd   :  { %8570 = vmatpush3.msra.mxu0 %v10307_v1 }
 0xbce   :  { %8571 = vmatprep.subr.mxu0 %v9496_v18  ;;  %8524 = vmatmul.mubr.msk.f32.gmra.mxu0 %vm2014_vm3, %v9934_v54 }
 0xbcf   :  { %8572 = vmatpush3.msra.mxu0 %v10309_v7  ;;  %8526 = vmatprep.mubr.msk.f32.mxu0 %vm9497_vm4, %v9496_v18 }
 0xbd0   :  { %8573 = vmatprep.subr.mxu0 %v9496_v18 }
 0xbd1   :  { %8574 = vmatpush3.msra.mxu0 %v10315_v8 }
 0xbd2   :  { %8575 = vmatprep.subr.mxu0 %v9496_v18  ;;  %8527 = vmatmul.mubr.msk.f32.gmra.mxu0 %vm2014_vm3, %v9952_v56 }
 0xbd3   :  { %8576 = vmatpush3.msra.mxu0 %v10329_v11  ;;  %8529 = vmatprep.mubr.msk.f32.mxu0 %vm9497_vm4, %v9496_v18 }
 0xbd4   :  { %8577 = vmatprep.subr.mxu0 %v9496_v18 }
 0xbd5   :  { %8578 = vmatpush3.msra.mxu0 %v10336_v2 }
 0xbd6   :  { %8530 = vmatmul.mubr.msk.f32.gmra.mxu0 %vm2014_vm3, %v9970_v58  ;;  %8625 = vmatprep.subr.mxu0 %v9496_v18 }
 0xbd7   :  { %8532 = vmatprep.mubr.msk.f32.mxu0 %vm9497_vm4, %v9496_v18 }
 0xbda   :  { %8533 = vmatmul.mubr.msk.f32.gmra.mxu0 %vm2014_vm3, %v9988_v60 }
 0xbdb   :  { %8535 = vmatprep.mubr.msk.f32.mxu0 %vm9497_vm4, %v9496_v18 }
 0xbde   :  { %8536 = vmatmul.mubr.msk.f32.gmra.mxu0 %vm2014_vm3, %v10006_v62 }
 0xbdf   :  { %8579 = vmatprep.mubr.msk.f32.mxu0 %vm9497_vm4, %v9496_v18 }
 0xbe2   :  { %8580 = vmatmul.mubr.msk.f32.vlgmr.msra.gmra.mxu0 %vm2014_vm3, %v10111_v16 }
 0xbe3   :  { %8626 = vmatpush3.msra.mxu0 %v10279_v3  ;;  %8582 = vmatprep.mubr.msk.f32.mxu0 %vm9497_vm4, %v9496_v18 }
 0xbe4   :  { %8627 = vmatprep.subr.mxu0 %v9496_v18 }
 0xbe5   :  { %8628 = vmatpush3.msra.mxu0 %v10290_v5 }
 0xbe6   :  { %8629 = vmatprep.subr.mxu0 %v9496_v18  ;;  %8583 = vmatmul.mubr.msk.f32.gmra.mxu0 %vm2014_vm3, %v10123_v19 }
 0xbe7   :  { %8630 = vmatpush3.msra.mxu0 %v10296_v6  ;;  %8585 = vmatprep.mubr.msk.f32.mxu0 %vm9497_vm4, %v9496_v18 }
 0xbe8   :  { %8631 = vmatprep.subr.mxu0 %v9496_v18 }
 0xbe9   :  { %8632 = vmatpush3.msra.mxu0 %v10307_v1 }
 0xbea   :  { %8633 = vmatprep.subr.mxu0 %v9496_v18  ;;  %8586 = vmatmul.mubr.msk.f32.gmra.mxu0 %vm2014_vm3, %v10136_v20 }
 0xbeb   :  { %8634 = vmatpush3.msra.mxu0 %v10309_v7  ;;  %8588 = vmatprep.mubr.msk.f32.mxu0 %vm9497_vm4, %v9496_v18 }
 0xbec   :  { %8635 = vmatprep.subr.mxu0 %v9496_v18 }
 0xbed   :  { %8636 = vmatpush3.msra.mxu0 %v10315_v8 }
 0xbee   :  { %8637 = vmatprep.subr.mxu0 %v9496_v18  ;;  %8589 = vmatmul.mubr.msk.f32.gmra.mxu0 %vm2014_vm3, %v10149_v51 }
 0xbef   :  { %8638 = vmatpush3.msra.mxu0 %v10329_v11  ;;  %8591 = vmatprep.mubr.msk.f32.mxu0 %vm9497_vm4, %v9496_v18 }
 0xbf0   :  { %8639 = vmatprep.subr.mxu0 %v9496_v18 }
 0xbf1   :  { %8640 = vmatpush3.msra.mxu0 %v10336_v2 }
 0xbf2   :  { %8592 = vmatmul.mubr.msk.f32.gmra.mxu0 %vm2014_vm3, %v10162_v53  ;;  %8687 = vmatprep.subr.mxu0 %v9496_v18 }
 0xbf3   :  { %8594 = vmatprep.mubr.msk.f32.mxu0 %vm9497_vm4, %v9496_v18 }
 0xbf6   :  { %8595 = vmatmul.mubr.msk.f32.gmra.mxu0 %vm2014_vm3, %v10174_v21 }
 0xbf7   :  { %8597 = vmatprep.mubr.msk.f32.mxu0 %vm9497_vm4, %v9496_v18 }
 0xbfa   :  { %v2357_v48 = vpop.f32.mrf.mxu0  ;;  %v2478_v50 = vpop.f32.mrf.mxu1  ;;  %8598 = vmatmul.mubr.msk.f32.gmra.mxu0 %vm2014_vm3, %v10183_v24 }
 0xbfb   :  { %v10511_v54 = vadd.f32 %v2478_v50, %v2357_v48  ;;  %8641 = vmatprep.mubr.msk.f32.mxu0 %vm9497_vm4, %v9496_v18 }
 0xbfc   :  { %v8209_v56 = vpop.f32.mrf.mxu0  ;;  %v8234_v58 = vpop.f32.mrf.mxu1 }
 0xbfd   :  { %v1162_v56 = vstv %s1161_s6 }
 0xbfe   :  { %v2362_v59 = vpop.f32.mrf.mxu0  ;;  %8642 = vmatmul.mubr.msk.f32.vlgmr.msra.gmra.mxu0 %vm2014_vm3, %v10192_v26  ;;  %9212 = vrsqrt.f32 %v1162_v56 }
 0xbff   :  { %v2483_v60 = vpop.f32.mrf.mxu1  ;;  %8688 = vmatpush3.msra.mxu0 %v10279_v3  ;;  %8644 = vmatprep.mubr.msk.f32.mxu0 %vm9497_vm4, %v9496_v18 }
 0xc00   :  { %v10520_v61 = vadd.f32 %v2483_v60, %v2362_v59  ;;  %8689 = vmatprep.subr.mxu0 %v9496_v18  ;;  %v8212_v62 = vpop.f32.mrf.mxu0 }
 0xc01   :  { %v8237_v16 = vpop.f32.mrf.mxu1  ;;  %8690 = vmatpush3.msra.mxu0 %v10290_v5 }
 0xc02   :  { %8691 = vmatprep.subr.mxu0 %v9496_v18  ;;  %v2367_v19 = vpop.f32.mrf.mxu0  ;;  %8645 = vmatmul.mubr.msk.f32.gmra.mxu0 %vm2014_vm3, %v10202_v28 }
 0xc03   :  { %v2488_v20 = vpop.f32.mrf.mxu1  ;;  %8692 = vmatpush3.msra.mxu0 %v10296_v6  ;;  %8647 = vmatprep.mubr.msk.f32.mxu0 %vm9497_vm4, %v9496_v18 }
 0xc04   :  { %v10530_v51 = vadd.f32 %v2488_v20, %v2367_v19  ;;  %8693 = vmatprep.subr.mxu0 %v9496_v18  ;;  %v8215_v53 = vpop.f32.mrf.mxu0 }
 0xc05   :  { %v8240_v21 = vpop.f32.mrf.mxu1  ;;  %8694 = vmatpush3.msra.mxu0 %v10307_v1 }
 0xc06   :  { %8695 = vmatprep.subr.mxu0 %v9496_v18  ;;  %v2372_v24 = vpop.f32.mrf.mxu0  ;;  %8648 = vmatmul.mubr.msk.f32.gmra.mxu0 %vm2014_vm3, %v10215_v32 }
 0xc07   :  { %v2493_v26 = vpop.f32.mrf.mxu1  ;;  %8696 = vmatpush3.msra.mxu0 %v10309_v7  ;;  %8650 = vmatprep.mubr.msk.f32.mxu0 %vm9497_vm4, %v9496_v18 }
 0xc08   :  { %v10540_v28 = vadd.f32 %v2493_v26, %v2372_v24  ;;  %8697 = vmatprep.subr.mxu0 %v9496_v18  ;;  %v8218_v29 = vpop.f32.mrf.mxu0  ;;  %v7284_v26 = vld [vmem:[%s11447_s12 + $0x58] sm:$0xff] }
 0xc09   :  { %v8243_v30 = vpop.f32.mrf.mxu1  ;;  %8698 = vmatpush3.msra.mxu0 %v10315_v8 }
 0xc0a   :  { %8699 = vmatprep.subr.mxu0 %v9496_v18  ;;  %v2377_v34 = vpop.f32.mrf.mxu0  ;;  %8651 = vmatmul.mubr.msk.f32.gmra.mxu0 %vm2014_vm3, %v10228_v38 }
 0xc0b   :  { %v2498_v32 = vpop.f32.mrf.mxu1  ;;  %8700 = vmatpush3.msra.mxu0 %v10329_v11  ;;  %8653 = vmatprep.mubr.msk.f32.mxu0 %vm9497_vm4, %v9496_v18 }
 0xc0c   :  { %v10550_v33 = vadd.f32 %v2498_v32, %v2377_v34  ;;  %8701 = vmatprep.subr.mxu0 %v9496_v18  ;;  %v8221_v35 = vpop.f32.mrf.mxu0  ;;  %v7283_v32 = vld [vmem:[%s11447_s12 + $0x50] sm:$0xff] }
 0xc0d   :  { %v8246_v36 = vpop.f32.mrf.mxu1  ;;  %8702 = vmatpush3.msra.mxu0 %v10336_v2 }
 0xc0e   :  { %v2382_v39 = vpop.f32.mrf.mxu0  ;;  %8654 = vmatmul.mubr.msk.f32.gmra.mxu0 %vm2014_vm3, %v10241_v42  ;;  %v7245_v42 = vld [vmem:[%s11447_s12 + $0x38] sm:$0xff] }
 0xc0f   :  { %v2503_v40 = vpop.f32.mrf.mxu1  ;;  %8656 = vmatprep.mubr.msk.f32.mxu0 %vm9497_vm4, %v9496_v18 }
 0xc10   :  { %v10558_v38 = vadd.f32 %v2503_v40, %v2382_v39  ;;  %v8224_v41 = vpop.f32.mrf.mxu0 }
 0xc11   :  { %v8249_v43 = vpop.f32.mrf.mxu1 }
 0xc12   :  { %v2387_v46 = vpop.f32.mrf.mxu0  ;;  %8657 = vmatmul.mubr.msk.f32.gmra.mxu0 %vm2014_vm3, %v10253_v44  ;;  %v7244_v44 = vld [vmem:[%s11447_s12 + $0x30] sm:$0xff] }
 0xc13   :  { %v2508_v3 = vpop.f32.mrf.mxu1  ;;  %8659 = vmatprep.mubr.msk.f32.mxu0 %vm9497_vm4, %v9496_v18 }
 0xc14   :  { %v10564_v5 = vadd.f32 %v2508_v3, %v2387_v46  ;;  %v8227_v6 = vpop.f32.mrf.mxu0 }
 0xc15   :  { %v8252_v1 = vpop.f32.mrf.mxu1  ;;  %v9213_v6 = vpop.eup %9212 }
 0xc16   :  { %v2607_v7 = vpop.f32.mrf.mxu0  ;;  %8660 = vmatmul.mubr.msk.f32.gmra.mxu0 %vm2014_vm3, %v10262_v45 }
 0xc17   :  { %8295 = vmatmul.mubr.msk.f32.vlgmr.msra.gmra.mxu1 %vm325_vm1, %v2607_v7  ;;  %8703 = vmatprep.mubr.msk.f32.mxu0 %vm9497_vm4, %v9496_v18 }
 0xc18   :  { %v8271_v8 = vpop.f32.mrf.mxu0  ;;  %8297 = vmatprep.mubr.msk.f32.mxu1 %vm9497_vm4, %v9496_v18  ;;  %8353 = vmatpush3.msra.mxu1 %v7245_v42 }
 0xc19   :  { %8354 = vmatprep.subr.mxu1 %v9496_v18 }
 0xc1a   :  { %v2612_v9 = vpop.f32.mrf.mxu0  ;;  %8704 = vmatmul.mubr.msk.f32.vlgmr.msra.gmra.mxu0 %vm2014_vm3, %v10274_v0  ;;  %8355 = vmatpush3.msra.mxu1 %v7244_v44 }
 0xc1b   :  { %8298 = vmatmul.mubr.msk.f32.gmra.mxu1 %vm325_vm1, %v2612_v9  ;;  %8706 = vmatprep.mubr.msk.f32.mxu0 %vm9497_vm4, %v9496_v18 }
 0xc1c   :  { %v8274_v45 = vpop.f32.mrf.mxu0  ;;  %8300 = vmatprep.mubr.msk.f32.mxu1 %vm9497_vm4, %v9496_v18  ;;  %8414 = vmatprep.subr.mxu1 %v9496_v18 }
 0xc1e   :  { %v2617_v11 = vpop.f32.mrf.mxu0  ;;  %8707 = vmatmul.mubr.msk.f32.gmra.mxu0 %vm2014_vm3, %v10287_v4 }
 0xc1f   :  { %8301 = vmatmul.mubr.msk.f32.gmra.mxu1 %vm325_vm1, %v2617_v11  ;;  %8709 = vmatprep.mubr.msk.f32.mxu0 %vm9497_vm4, %v9496_v18 }
 0xc20   :  { %v8277_v0 = vpop.f32.mrf.mxu0  ;;  %8303 = vmatprep.mubr.msk.f32.mxu1 %vm9497_vm4, %v9496_v18 }
 0xc22   :  { %v2622_v2 = vpop.f32.mrf.mxu0  ;;  %8710 = vmatmul.mubr.msk.f32.gmra.mxu0 %vm2014_vm3, %v10304_v63 }
 0xc23   :  { %8304 = vmatmul.mubr.msk.f32.gmra.mxu1 %vm325_vm1, %v2622_v2  ;;  %8712 = vmatprep.mubr.msk.f32.mxu0 %vm9497_vm4, %v9496_v18  ;;  %v7300_v2 = vld [vmem:[%s11447_s12 + $0x68] sm:$0xff] }
 0xc24   :  { %v8280_v47 = vpop.f32.mrf.mxu0  ;;  %8306 = vmatprep.mubr.msk.f32.mxu1 %vm9497_vm4, %v9496_v18 }
 0xc26   :  { %v2627_v4 = vpop.f32.mrf.mxu0  ;;  %8713 = vmatmul.mubr.msk.f32.gmra.mxu0 %vm2014_vm3, %v10326_v10 }
 0xc27   :  { %8307 = vmatmul.mubr.msk.f32.gmra.mxu1 %vm325_vm1, %v2627_v4  ;;  %8715 = vmatprep.mubr.msk.f32.mxu0 %vm9497_vm4, %v9496_v18  ;;  %v7299_v4 = vld [vmem:[%s11447_s12 + $0x60] sm:$0xff] }
 0xc28   :  { %v8283_v49 = vpop.f32.mrf.mxu0  ;;  %8309 = vmatprep.mubr.msk.f32.mxu1 %vm9497_vm4, %v9496_v18 }
 0xc2a   :  { %v2632_v63 = vpop.f32.mrf.mxu0  ;;  %8716 = vmatmul.mubr.msk.f32.gmra.mxu0 %vm2014_vm3, %v10344_v14  ;;  %v7268_v14 = vld [vmem:[%s11447_s12 + $0x48] sm:$0xff] }
 0xc2b   :  { %8310 = vmatmul.mubr.msk.f32.gmra.mxu1 %vm325_vm1, %v2632_v63  ;;  %8718 = vmatprep.mubr.msk.f32.mxu0 %vm9497_vm4, %v9496_v18 }
 0xc2c   :  { %v8286_v22 = vpop.f32.mrf.mxu0  ;;  %8312 = vmatprep.mubr.msk.f32.mxu1 %vm9497_vm4, %v9496_v18 }
 0xc2e   :  { %v2637_v10 = vpop.f32.mrf.mxu0  ;;  %8719 = vmatmul.mubr.msk.f32.gmra.mxu0 %vm2014_vm3, %v10356_v15  ;;  %v7267_v15 = vld [vmem:[%s11447_s12 + $0x40] sm:$0xff] }
 0xc2f   :  { %8313 = vmatmul.mubr.msk.f32.gmra.mxu1 %vm325_vm1, %v2637_v10  ;;  %8721 = vmatprep.mubr.msk.f32.mxu0 %vm9497_vm4, %v9496_v18 }
 0xc30   :  { %v8289_v52 = vpop.f32.mrf.mxu0  ;;  %8356 = vmatprep.mubr.msk.f32.mxu1 %vm9497_vm4, %v9496_v18 }
 0xc32   :  { %v2867_v23 = vpop.f32.mrf.mxu0  ;;  %8722 = vmatmul.mubr.msk.f32.gmra.mxu0 %vm2014_vm3, %v10365_v17 }
 0xc33   :  { %8357 = vmatmul.mubr.msk.f32.vlgmr.msra.gmra.mxu1 %vm325_vm1, %v2867_v23 }
 0xc34   :  { %v8333_v25 = vpop.f32.mrf.mxu0  ;;  %8359 = vmatprep.mubr.msk.f32.mxu1 %vm9497_vm4, %v9496_v18  ;;  %8415 = vmatpush3.msra.mxu1 %v7268_v14 }
 0xc35   :  { %8416 = vmatprep.subr.mxu1 %v9496_v18 }
 0xc36   :  { %v2872_v27 = vpop.f32.mrf.mxu0  ;;  %8417 = vmatpush3.msra.mxu1 %v7267_v15 }
 0xc37   :  { %8360 = vmatmul.mubr.msk.f32.gmra.mxu1 %vm325_vm1, %v2872_v27  ;;  %8476 = vmatprep.subr.mxu1 %v9496_v18 }
 0xc38   :  { %v8336_v17 = vpop.f32.mrf.mxu0  ;;  %8362 = vmatprep.mubr.msk.f32.mxu1 %vm9497_vm4, %v9496_v18 }
 0xc3a   :  { %v2877_v31 = vpop.f32.mrf.mxu0 }
 0xc3b   :  { %8363 = vmatmul.mubr.msk.f32.gmra.mxu1 %vm325_vm1, %v2877_v31 }
 0xc3c   :  { %v8339_v37 = vpop.f32.mrf.mxu0  ;;  %8365 = vmatprep.mubr.msk.f32.mxu1 %vm9497_vm4, %v9496_v18 }
 0xc3e   :  { %v2882_v55 = vpop.f32.mrf.mxu0 }
 0xc3f   :  { %8366 = vmatmul.mubr.msk.f32.gmra.mxu1 %vm325_vm1, %v2882_v55  ;;  %v7316_v55 = vld [vmem:[%s11447_s12 + $0x78] sm:$0xff] }
 0xc40   :  { %v8342_v12 = vpop.f32.mrf.mxu0  ;;  %8368 = vmatprep.mubr.msk.f32.mxu1 %vm9497_vm4, %v9496_v18 }
 0xc42   :  { %v2887_v13 = vpop.f32.mrf.mxu0 }
 0xc43   :  { %8369 = vmatmul.mubr.msk.f32.gmra.mxu1 %vm325_vm1, %v2887_v13 }
 0xc44   :  { %v8345_v57 = vpop.f32.mrf.mxu0  ;;  %8371 = vmatprep.mubr.msk.f32.mxu1 %vm9497_vm4, %v9496_v18 }
 0xc45   :  { %v7315_v57 = vld [vmem:[%s11447_s12 + $0x70] sm:$0xff] }
 0xc46   :  { %v2892_v48 = vpop.f32.mrf.mxu0  ;;  %v1139_v50 = vpop.xlane.xlu1 %1138 }
 0xc47   :  { %8372 = vmatmul.mubr.msk.f32.gmra.mxu1 %vm325_vm1, %v2892_v48  ;;  %v1140_v58 = vrot.slane %v1139_v50, 4 }
 0xc48   :  { %v8348_v59 = vpop.f32.mrf.mxu0  ;;  %8374 = vmatprep.mubr.msk.f32.mxu1 %vm9497_vm4, %v9496_v18 }
 0xc49   :  { %v1141_v60 = vadd.f32 %v1140_v58, %v1139_v50 }
 0xc4a   :  { %v2897_v62 = vpop.f32.mrf.mxu0  ;;  %v1153_v16 = vpop.xlane.xlu1 %1152 }
 0xc4b   :  { %v1142_v19 = vrot.slane %v1141_v60, 2  ;;  %8375 = vmatmul.mubr.msk.f32.gmra.mxu1 %vm325_vm1, %v2897_v62  ;;  %v1154_v20 = vrot.slane %v1153_v16, 4 }
 0xc4c   :  { %v8351_v53 = vpop.f32.mrf.mxu0  ;;  %8418 = vmatprep.mubr.msk.f32.mxu1 %vm9497_vm4, %v9496_v18 }
 0xc4d   :  { %v1155_v21 = vadd.f32 %v1154_v20, %v1153_v16  ;;  %v1143_v24 = vadd.f32 %v1142_v19, %v1141_v60 }
 0xc4e   :  { %v3127_v29 = vpop.f32.mrf.mxu0 }
 0xc4f   :  { %v1156_v30 = vrot.slane %v1155_v21, 2  ;;  %8419 = vmatmul.mubr.msk.f32.vlgmr.msra.gmra.mxu1 %vm325_vm1, %v3127_v29  ;;  %v1144_v34 = vrot.slane %v1143_v24, 1  ;;  %v7332_v29 = vld [vmem:[%s11447_s12 + $0x88] sm:$0xff] }
 0xc50   :  { %v8395_v35 = vpop.f32.mrf.mxu0  ;;  %8421 = vmatprep.mubr.msk.f32.mxu1 %vm9497_vm4, %v9496_v18  ;;  %8477 = vmatpush3.msra.mxu1 %v7284_v26 }
 0xc51   :  { %v1157_v36 = vadd.f32 %v1156_v30, %v1155_v21  ;;  %v1145_v39 = vadd.f32 %v1144_v34, %v1143_v24  ;;  %8478 = vmatprep.subr.mxu1 %v9496_v18  ;;  %v7331_v34 = vld [vmem:[%s11447_s12 + $0x80] sm:$0xff] }
 0xc52   :  { %v3132_v40 = vpop.f32.mrf.mxu0  ;;  %8479 = vmatpush3.msra.mxu1 %v7283_v32 }
 0xc53   :  { %8422 = vmatmul.mubr.msk.f32.gmra.mxu1 %vm325_vm1, %v3132_v40  ;;  %9166 = vpush %v1145_v39  ;;  %v1158_v41 = vrot.slane %v1157_v36, 1  ;;  %8538 = vmatprep.subr.mxu1 %v9496_v18 }
 0xc54   :  { %v8398_v43 = vpop.f32.mrf.mxu0  ;;  %8424 = vmatprep.mubr.msk.f32.mxu1 %vm9497_vm4, %v9496_v18 }
 0xc55   :  { %v1159_v46 = vadd.f32 %v1158_v41, %v1157_v36 }
 0xc56   :  { %v3137_v3 = vpop.f32.mrf.mxu0 }
 0xc57   :  { %8425 = vmatmul.mubr.msk.f32.gmra.mxu1 %vm325_vm1, %v3137_v3  ;;  %9168 = vpush %v1159_v46 }
 0xc58   :  { %v8401_v42 = vpop.f32.mrf.mxu0  ;;  %9170 = vpush %v9213_v6  ;;  %8427 = vmatprep.mubr.msk.f32.mxu1 %vm9497_vm4, %v9496_v18 }
 0xc5a   :  { %v3142_v1 = vpop.f32.mrf.mxu0 }
 0xc5b   :  { %8428 = vmatmul.mubr.msk.f32.gmra.mxu1 %vm325_vm1, %v3142_v1 }
 0xc5c   :  { %v8404_v7 = vpop.f32.mrf.mxu0  ;;  %8430 = vmatprep.mubr.msk.f32.mxu1 %vm9497_vm4, %v9496_v18 }
 0xc5e   :  { %v3147_v44 = vpop.f32.mrf.mxu0 }
 0xc5f   :  { %8431 = vmatmul.mubr.msk.f32.gmra.mxu1 %vm325_vm1, %v3147_v44  ;;  %v7348_v44 = vld [vmem:[%s11447_s12 + $0x98] sm:$0xff] }
 0xc60   :  { %v8407_v8 = vpop.f32.mrf.mxu0  ;;  %8433 = vmatprep.mubr.msk.f32.mxu1 %vm9497_vm4, %v9496_v18 }
 0xc62   :  { %v3152_v9 = vpop.f32.mrf.mxu0 }
 0xc63   :  { %8434 = vmatmul.mubr.msk.f32.gmra.mxu1 %vm325_vm1, %v3152_v9  ;;  %v7347_v9 = vld [vmem:[%s11447_s12 + $0x90] sm:$0xff] }
 0xc64   :  { %v8410_v45 = vpop.f32.mrf.mxu0  ;;  %8436 = vmatprep.mubr.msk.f32.mxu1 %vm9497_vm4, %v9496_v18 }
 0xc66   :  { %v3157_v11 = vpop.f32.mrf.mxu0 }
 0xc67   :  { %8437 = vmatmul.mubr.msk.f32.gmra.mxu1 %vm325_vm1, %v3157_v11 }
 0xc68   :  { %v8413_v0 = vpop.f32.mrf.mxu0  ;;  %8480 = vmatprep.mubr.msk.f32.mxu1 %vm9497_vm4, %v9496_v18 }
 0xc6a   :  { %v3366_v47 = vpop.f32.mrf.mxu0 }
 0xc6b   :  { %8481 = vmatmul.mubr.msk.f32.vlgmr.msra.gmra.mxu1 %vm325_vm1, %v3366_v47 }
 0xc6c   :  { %v8457_v49 = vpop.f32.mrf.mxu0  ;;  %8483 = vmatprep.mubr.msk.f32.mxu1 %vm9497_vm4, %v9496_v18  ;;  %8539 = vmatpush3.msra.mxu1 %v7300_v2 }
 0xc6d   :  { %8540 = vmatprep.subr.mxu1 %v9496_v18 }
 0xc6e   :  { %v3371_v63 = vpop.f32.mrf.mxu0  ;;  %8541 = vmatpush3.msra.mxu1 %v7299_v4 }
 0xc6f   :  { %8484 = vmatmul.mubr.msk.f32.gmra.mxu1 %vm325_vm1, %v3371_v63  ;;  %8600 = vmatprep.subr.mxu1 %v9496_v18 }
 0xc70   :  { %v8460_v22 = vpop.f32.mrf.mxu0  ;;  %8486 = vmatprep.mubr.msk.f32.mxu1 %vm9497_vm4, %v9496_v18 }
 0xc72   :  { %v3376_v10 = vpop.f32.mrf.mxu0 }
 0xc73   :  { %8487 = vmatmul.mubr.msk.f32.gmra.mxu1 %vm325_vm1, %v3376_v10 }
 0xc74   :  { %v8463_v52 = vpop.f32.mrf.mxu0  ;;  %8489 = vmatprep.mubr.msk.f32.mxu1 %vm9497_vm4, %v9496_v18 }
 0xc76   :  { %v3381_v14 = vpop.f32.mrf.mxu0 }
 0xc77   :  { %8490 = vmatmul.mubr.msk.f32.gmra.mxu1 %vm325_vm1, %v3381_v14 }
 0xc78   :  { %v8466_v23 = vpop.f32.mrf.mxu0  ;;  %8492 = vmatprep.mubr.msk.f32.mxu1 %vm9497_vm4, %v9496_v18 }
 0xc7a   :  { %v3386_v15 = vpop.f32.mrf.mxu0 }
 0xc7b   :  { %8493 = vmatmul.mubr.msk.f32.gmra.mxu1 %vm325_vm1, %v3386_v15 }
 0xc7c   :  { %v8469_v25 = vpop.f32.mrf.mxu0  ;;  %8495 = vmatprep.mubr.msk.f32.mxu1 %vm9497_vm4, %v9496_v18 }
 0xc7e   :  { %v3391_v27 = vpop.f32.mrf.mxu0 }
 0xc7f   :  { %8496 = vmatmul.mubr.msk.f32.gmra.mxu1 %vm325_vm1, %v3391_v27 }
 0xc80   :  { %v8472_v17 = vpop.f32.mrf.mxu0  ;;  %8498 = vmatprep.mubr.msk.f32.mxu1 %vm9497_vm4, %v9496_v18 }
 0xc82   :  { %v3396_v31 = vpop.f32.mrf.mxu0 }
 0xc83   :  { %8499 = vmatmul.mubr.msk.f32.gmra.mxu1 %vm325_vm1, %v3396_v31 }
 0xc84   :  { %v8475_v37 = vpop.f32.mrf.mxu0  ;;  %8542 = vmatprep.mubr.msk.f32.mxu1 %vm9497_vm4, %v9496_v18  ;;  %s9167_s7 = spop %9166 }
 0xc85   :  { %s1166_s4 = sadd.f32 1e-08, %s9167_s7 }
 0xc86   :  { %v3597_v12 = vpop.f32.mrf.mxu0 }
 0xc87   :  { %v1167_v13 = vstv %s1166_s4  ;;  %8543 = vmatmul.mubr.msk.f32.vlgmr.msra.gmra.mxu1 %vm325_vm1, %v3597_v12 }
 0xc88   :  { %9214 = vrsqrt.f32 %v1167_v13  ;;  %v8519_v48 = vpop.f32.mrf.mxu0  ;;  %8545 = vmatprep.mubr.msk.f32.mxu1 %vm9497_vm4, %v9496_v18  ;;  %8601 = vmatpush3.msra.mxu1 %v7316_v55  ;;  %s9169_s18 = spop %9168 }
 0xc89   :  { %8602 = vmatprep.subr.mxu1 %v9496_v18  ;;  %s9171_s0 = spop %9170 }
 0xc8a   :  { %v3602_v50 = vpop.f32.mrf.mxu0  ;;  %8603 = vmatpush3.msra.mxu1 %v7315_v57  ;;  %s1165_s22 = smul.f32 %s9171_s0, %s9169_s18 }
 0xc8b   :  { %8546 = vmatmul.mubr.msk.f32.gmra.mxu1 %vm325_vm1, %v3602_v50  ;;  %8662 = vmatprep.subr.mxu1 %v9496_v18 }
 0xc8c   :  { %v8522_v56 = vpop.f32.mrf.mxu0  ;;  %8548 = vmatprep.mubr.msk.f32.mxu1 %vm9497_vm4, %v9496_v18 }
 0xc8e   :  { %v3607_v58 = vpop.f32.mrf.mxu0 }
 0xc8f   :  { %8549 = vmatmul.mubr.msk.f32.gmra.mxu1 %vm325_vm1, %v3607_v58 }
 0xc90   :  { %v8525_v59 = vpop.f32.mrf.mxu0  ;;  %8551 = vmatprep.mubr.msk.f32.mxu1 %vm9497_vm4, %v9496_v18 }
 0xc92   :  { %v3612_v60 = vpop.f32.mrf.mxu0 }
 0xc93   :  { %8552 = vmatmul.mubr.msk.f32.gmra.mxu1 %vm325_vm1, %v3612_v60 }
 0xc94   :  { %v8528_v62 = vpop.f32.mrf.mxu0  ;;  %8554 = vmatprep.mubr.msk.f32.mxu1 %vm9497_vm4, %v9496_v18 }
 0xc95   :  { %v9215_v16 = vpop.eup %9214 }
 0xc96   :  { %v3617_v19 = vpop.f32.mrf.mxu0  ;;  %9172 = vpush %v9215_v16 }
 0xc97   :  { %8555 = vmatmul.mubr.msk.f32.gmra.mxu1 %vm325_vm1, %v3617_v19 }
 0xc98   :  { %v8531_v20 = vpop.f32.mrf.mxu0  ;;  %8557 = vmatprep.mubr.msk.f32.mxu1 %vm9497_vm4, %v9496_v18 }
 0xc9a   :  { %v3622_v53 = vpop.f32.mrf.mxu0 }
 0xc9b   :  { %8558 = vmatmul.mubr.msk.f32.gmra.mxu1 %vm325_vm1, %v3622_v53 }
 0xc9c   :  { %v8534_v21 = vpop.f32.mrf.mxu0  ;;  %8560 = vmatprep.mubr.msk.f32.mxu1 %vm9497_vm4, %v9496_v18 }
 0xc9e   :  { %v3627_v24 = vpop.f32.mrf.mxu0 }
 0xc9f   :  { %8561 = vmatmul.mubr.msk.f32.gmra.mxu1 %vm325_vm1, %v3627_v24 }
 0xca0   :  { %v8537_v26 = vpop.f32.mrf.mxu0  ;;  %8604 = vmatprep.mubr.msk.f32.mxu1 %vm9497_vm4, %v9496_v18 }
 0xca2   :  { %v3828_v30 = vpop.f32.mrf.mxu0 }
 0xca3   :  { %8605 = vmatmul.mubr.msk.f32.vlgmr.msra.gmra.mxu1 %vm325_vm1, %v3828_v30 }
 0xca4   :  { %v8581_v32 = vpop.f32.mrf.mxu0  ;;  %8607 = vmatprep.mubr.msk.f32.mxu1 %vm9497_vm4, %v9496_v18  ;;  %8663 = vmatpush3.msra.mxu1 %v7332_v29 }
 0xca5   :  { %8664 = vmatprep.subr.mxu1 %v9496_v18 }
 0xca6   :  { %v3833_v35 = vpop.f32.mrf.mxu0  ;;  %8665 = vmatpush3.msra.mxu1 %v7331_v34 }
 0xca7   :  { %8608 = vmatmul.mubr.msk.f32.gmra.mxu1 %vm325_vm1, %v3833_v35  ;;  %8724 = vmatprep.subr.mxu1 %v9496_v18 }
 0xca8   :  { %v8584_v36 = vpop.f32.mrf.mxu0  ;;  %8610 = vmatprep.mubr.msk.f32.mxu1 %vm9497_vm4, %v9496_v18 }
 0xcaa   :  { %v3838_v39 = vpop.f32.mrf.mxu0 }
 0xcab   :  { %8611 = vmatmul.mubr.msk.f32.gmra.mxu1 %vm325_vm1, %v3838_v39 }
 0xcac   :  { %v8587_v40 = vpop.f32.mrf.mxu0  ;;  %8613 = vmatprep.mubr.msk.f32.mxu1 %vm9497_vm4, %v9496_v18 }
 0xcae   :  { %v3843_v41 = vpop.f32.mrf.mxu0 }
 0xcaf   :  { %8614 = vmatmul.mubr.msk.f32.gmra.mxu1 %vm325_vm1, %v3843_v41 }
 0xcb0   :  { %v8590_v43 = vpop.f32.mrf.mxu0  ;;  %8616 = vmatprep.mubr.msk.f32.mxu1 %vm9497_vm4, %v9496_v18 }
 0xcb2   :  { %v3848_v46 = vpop.f32.mrf.mxu0 }
 0xcb3   :  { %8617 = vmatmul.mubr.msk.f32.gmra.mxu1 %vm325_vm1, %v3848_v46 }
 0xcb4   :  { %v8593_v3 = vpop.f32.mrf.mxu0  ;;  %8619 = vmatprep.mubr.msk.f32.mxu1 %vm9497_vm4, %v9496_v18 }
 0xcb6   :  { %v3853_v6 = vpop.f32.mrf.mxu0 }
 0xcb7   :  { %8620 = vmatmul.mubr.msk.f32.gmra.mxu1 %vm325_vm1, %v3853_v6 }
 0xcb8   :  { %v8596_v42 = vpop.f32.mrf.mxu0  ;;  %8622 = vmatprep.mubr.msk.f32.mxu1 %vm9497_vm4, %v9496_v18 }
 0xcba   :  { %v3858_v1 = vpop.f32.mrf.mxu0 }
 0xcbb   :  { %8623 = vmatmul.mubr.msk.f32.gmra.mxu1 %vm325_vm1, %v3858_v1 }
 0xcbc   :  { %v8599_v7 = vpop.f32.mrf.mxu0  ;;  %8666 = vmatprep.mubr.msk.f32.mxu1 %vm9497_vm4, %v9496_v18 }
 0xcbe   :  { %v4059_v8 = vpop.f32.mrf.mxu0 }
 0xcbf   :  { %8667 = vmatmul.mubr.msk.f32.vlgmr.msra.gmra.mxu1 %vm325_vm1, %v4059_v8 }
 0xcc0   :  { %v8643_v45 = vpop.f32.mrf.mxu0  ;;  %8669 = vmatprep.mubr.msk.f32.mxu1 %vm9497_vm4, %v9496_v18  ;;  %8725 = vmatpush3.msra.mxu1 %v7348_v44 }
 0xcc1   :  { %8726 = vmatprep.subr.mxu1 %v9496_v18 }
 0xcc2   :  { %v4064_v11 = vpop.f32.mrf.mxu0  ;;  %8727 = vmatpush3.msra.mxu1 %v7347_v9 }
 0xcc3   :  { %8670 = vmatmul.mubr.msk.f32.gmra.mxu1 %vm325_vm1, %v4064_v11 }
 0xcc4   :  { %v8646_v0 = vpop.f32.mrf.mxu0  ;;  %8672 = vmatprep.mubr.msk.f32.mxu1 %vm9497_vm4, %v9496_v18 }
 0xcc6   :  { %v4069_v2 = vpop.f32.mrf.mxu0 }
 0xcc7   :  { %8673 = vmatmul.mubr.msk.f32.gmra.mxu1 %vm325_vm1, %v4069_v2  ;;  %s9173_s12 = spop %9172 }
 0xcc8   :  { %v8649_v47 = vpop.f32.mrf.mxu0  ;;  %s1170_s2 = smul.f32 %s9173_s12, %s1165_s22  ;;  %8675 = vmatprep.mubr.msk.f32.mxu1 %vm9497_vm4, %v9496_v18 }
 0xcc9   :  { %s1173_s8 = smul.f32 %s9173_s12, %s9169_s18  ;;  %s9444_s18 = scalar_lea.vmem %s7086_s1, 32 }
 0xcca   :  { %v4074_v4 = vpop.f32.mrf.mxu0  ;;  %s1171_s4 = sand.u32 2147483647, %s1170_s2  ;;  %p9445_p13 = scmp.ne.s32.totalorder %s7086_s1, %s9444_s18 }
 0xccb   :  { %s1174_s7 = smul.f32 %s9171_s0, %s1173_s8  ;;  %8676 = vmatmul.mubr.msk.f32.gmra.mxu1 %vm325_vm1, %v4074_v4  ;;  %p9450_p1 = scmp.lt.s32.totalorder %s9444_s18, %s9444_s18 }
 0xccc   :  { %v8652_v49 = vpop.f32.mrf.mxu0  ;;  %8678 = vmatprep.mubr.msk.f32.mxu1 %vm9497_vm4, %v9496_v18 }
 0xccd   :  { %s1175_s29 = sand.u32 2147483647, %s1174_s7  ;;  %p9451_p2 = por %p9450_p1, %p9449_p0 }
 0xcce   :  { %s1176_s26 = sadd.f32 %s1175_s29, %s1171_s4  ;;  %v4079_v63 = vpop.f32.mrf.mxu0 }
 0xccf   :  { %8679 = vmatmul.mubr.msk.f32.gmra.mxu1 %vm325_vm1, %v4079_v63  ;;  %p9452_p3 = pnand %p9451_p2, %p9445_p13 }
 0xcd0   :  { %s1179_s9 = smul.f32 0.5, %s1176_s26  ;;  %v8655_v22 = vpop.f32.mrf.mxu0  ;;  %8681 = vmatprep.mubr.msk.f32.mxu1 %vm9497_vm4, %v9496_v18 }
 0xcd2   :  { %v4084_v10 = vpop.f32.mrf.mxu0  ;;  %1181 = sst [smem:[#allocation23]] %s1179_s9 }
 0xcd3   :  { %8682 = vmatmul.mubr.msk.f32.gmra.mxu1 %vm325_vm1, %v4084_v10  ;;  %7096 = dma.smem_to_hbm %s9498_s30, 16, %s11462_s27, [#allocation6]  }
 0xcd4   :  { %v8658_v52 = vpop.f32.mrf.mxu0  ;;  %8684 = vmatprep.mubr.msk.f32.mxu1 %vm9497_vm4, %v9496_v18 }
 0xcd6   :  { %v4089_v14 = vpop.f32.mrf.mxu0 }
 0xcd7   :  { %v2731_v23 = vpop.f32.mrf.mxu1  ;;  %8685 = vmatmul.mubr.msk.f32.gmra.mxu1 %vm325_vm1, %v4089_v14 }
 0xcd8   :  { %v2765_v15 = vadd.f32 %v2731_v23, %v10511_v54  ;;  %v8661_v25 = vpop.f32.mrf.mxu0  ;;  %8728 = vmatprep.mubr.msk.f32.mxu1 %vm9497_vm4, %v9496_v18 }
 0xcd9   :  { %v8296_v27 = vpop.f32.mrf.mxu1 }
 0xcda   :  { %v4290_v17 = vpop.f32.mrf.mxu0 }
 0xcdb   :  { %v2736_v31 = vpop.f32.mrf.mxu1  ;;  %8729 = vmatmul.mubr.msk.f32.vlgmr.msra.gmra.mxu1 %vm325_vm1, %v4290_v17 }
 0xcdc   :  { %v2766_v37 = vadd.f32 %v2736_v31, %v10520_v61  ;;  %v8705_v55 = vpop.f32.mrf.mxu0  ;;  %8731 = vmatprep.mubr.msk.f32.mxu1 %vm9497_vm4, %v9496_v18 }
 0xcdd   :  { %v8299_v12 = vpop.f32.mrf.mxu1 }
 0xcde   :  { %v4295_v13 = vpop.f32.mrf.mxu0 }
 0xcdf   :  { %v2741_v57 = vpop.f32.mrf.mxu1  ;;  %8732 = vmatmul.mubr.msk.f32.gmra.mxu1 %vm325_vm1, %v4295_v13 }
 0xce0   :  { %v2767_v54 = vadd.f32 %v2741_v57, %v10530_v51  ;;  %v8708_v48 = vpop.f32.mrf.mxu0  ;;  %8734 = vmatprep.mubr.msk.f32.mxu1 %vm9497_vm4, %v9496_v18 }
 0xce1   :  { %v8302_v50 = vpop.f32.mrf.mxu1 }
 0xce2   :  { %v4300_v56 = vpop.f32.mrf.mxu0 }
 0xce3   :  { %v2746_v58 = vpop.f32.mrf.mxu1  ;;  %8735 = vmatmul.mubr.msk.f32.gmra.mxu1 %vm325_vm1, %v4300_v56 }
 0xce4   :  { %v2768_v61 = vadd.f32 %v2746_v58, %v10540_v28  ;;  %v8711_v59 = vpop.f32.mrf.mxu0  ;;  %8737 = vmatprep.mubr.msk.f32.mxu1 %vm9497_vm4, %v9496_v18 }
 0xce5   :  { %v8305_v60 = vpop.f32.mrf.mxu1 }
 0xce6   :  { %v4305_v62 = vpop.f32.mrf.mxu0 }
 0xce7   :  { %v2751_v16 = vpop.f32.mrf.mxu1  ;;  %8738 = vmatmul.mubr.msk.f32.gmra.mxu1 %vm325_vm1, %v4305_v62 }
 0xce8   :  { %v2769_v51 = vadd.f32 %v2751_v16, %v10550_v33  ;;  %v8714_v19 = vpop.f32.mrf.mxu0  ;;  %8740 = vmatprep.mubr.msk.f32.mxu1 %vm9497_vm4, %v9496_v18 }
 0xce9   :  { %v8308_v20 = vpop.f32.mrf.mxu1 }
 0xcea   :  { %v4310_v53 = vpop.f32.mrf.mxu0 }
 0xceb   :  { %v2756_v21 = vpop.f32.mrf.mxu1  ;;  %8741 = vmatmul.mubr.msk.f32.gmra.mxu1 %vm325_vm1, %v4310_v53 }
 0xcec   :  { %v2770_v28 = vadd.f32 %v2756_v21, %v10558_v38  ;;  %v8717_v24 = vpop.f32.mrf.mxu0  ;;  %8743 = vmatprep.mubr.msk.f32.mxu1 %vm9497_vm4, %v9496_v18 }
 0xced   :  { %v8311_v26 = vpop.f32.mrf.mxu1 }
 0xcee   :  { %v4315_v29 = vpop.f32.mrf.mxu0 }
 0xcef   :  { %v2761_v30 = vpop.f32.mrf.mxu1  ;;  %8744 = vmatmul.mubr.msk.f32.gmra.mxu1 %vm325_vm1, %v4315_v29 }
 0xcf0   :  { %v2771_v33 = vadd.f32 %v2761_v30, %v10564_v5  ;;  %v8720_v34 = vpop.f32.mrf.mxu0  ;;  %8746 = vmatprep.mubr.msk.f32.mxu1 %vm9497_vm4, %v9496_v18 }
 0xcf1   :  { %v8314_v32 = vpop.f32.mrf.mxu1 }
 0xcf2   :  { %v4320_v35 = vpop.f32.mrf.mxu0 }
 0xcf3   :  { %v2991_v36 = vpop.f32.mrf.mxu1  ;;  %8747 = vmatmul.mubr.msk.f32.gmra.mxu1 %vm325_vm1, %v4320_v35 }
 0xcf4   :  { %v3025_v38 = vadd.f32 %v2991_v36, %v2765_v15  ;;  %v8723_v39 = vpop.f32.mrf.mxu0 }
 0xcf5   :  { %v8358_v40 = vpop.f32.mrf.mxu1  ;;  %v4476_v39 = vld [vmem:[%s11449_s14] sm:$0xff] }
 0xcf6   :  { %8763 = vmatprep.mubr.msk.f32.mxu1 %vm4480_vm5, %v4476_v39 }
 0xcf7   :  { %v2996_v41 = vpop.f32.mrf.mxu1 }
 0xcf8   :  { %v3026_v43 = vadd.f32 %v2996_v41, %v2766_v37 }
 0xcf9   :  { %v8361_v46 = vpop.f32.mrf.mxu1 }
 0xcfb   :  { %v3001_v3 = vpop.f32.mrf.mxu1 }
 0xcfc   :  { %v3027_v6 = vadd.f32 %v3001_v3, %v2767_v54 }
 0xcfd   :  { %v8364_v42 = vpop.f32.mrf.mxu1 }
 0xcff   :  { %v3006_v1 = vpop.f32.mrf.mxu1 }
 0xd00   :  { %v3028_v5 = vadd.f32 %v3006_v1, %v2768_v61 }
 0xd01   :  { %v8367_v7 = vpop.f32.mrf.mxu1 }
 0xd03   :  { %v3011_v44 = vpop.f32.mrf.mxu1 }
 0xd04   :  { %v3029_v8 = vadd.f32 %v3011_v44, %v2769_v51 }
 0xd05   :  { %v8370_v9 = vpop.f32.mrf.mxu1 }
 0xd07   :  { %v3016_v45 = vpop.f32.mrf.mxu1 }
 0xd08   :  { %v3030_v11 = vadd.f32 %v3016_v45, %v2770_v28 }
 0xd09   :  { %v8373_v0 = vpop.f32.mrf.mxu1 }
 0xd0a   :  { %v4691_v0 = vld [vmem:[%s11450_s15 + $0x38] sm:$0xff] }
 0xd0b   :  { %v3021_v2 = vpop.f32.mrf.mxu1 }
 0xd0c   :  { %v3031_v47 = vadd.f32 %v3021_v2, %v2771_v33 }
 0xd0d   :  { %v8376_v4 = vpop.f32.mrf.mxu1 }
 0xd0f   :  { %v3251_v49 = vpop.f32.mrf.mxu1 }
 0xd10   :  { %v3285_v63 = vadd.f32 %v3251_v49, %v3025_v38 }
 0xd11   :  { %v8420_v22 = vpop.f32.mrf.mxu1 }
 0xd13   :  { %v3256_v10 = vpop.f32.mrf.mxu1 }
 0xd14   :  { %v3286_v52 = vadd.f32 %v3256_v10, %v3026_v43 }
 0xd15   :  { %v8423_v14 = vpop.f32.mrf.mxu1 }
 0xd17   :  { %v3261_v23 = vpop.f32.mrf.mxu1 }
 0xd18   :  { %v3287_v15 = vadd.f32 %v3261_v23, %v3027_v6 }
 0xd19   :  { %v8426_v25 = vpop.f32.mrf.mxu1 }
 0xd1b   :  { %v3266_v27 = vpop.f32.mrf.mxu1 }
 0xd1c   :  { %v3288_v17 = vadd.f32 %v3266_v27, %v3028_v5 }
 0xd1d   :  { %v8429_v31 = vpop.f32.mrf.mxu1 }
 0xd1f   :  { %v3271_v37 = vpop.f32.mrf.mxu1 }
 0xd20   :  { %v3289_v55 = vadd.f32 %v3271_v37, %v3029_v8 }
 0xd21   :  { %v8432_v12 = vpop.f32.mrf.mxu1 }
 0xd23   :  { %v3276_v13 = vpop.f32.mrf.mxu1 }
 0xd24   :  { %v3290_v57 = vadd.f32 %v3276_v13, %v3030_v11  ;;  %v4692_v11 = vld [vmem:[%s11450_s15 + $0x40] sm:$0xff] }
 0xd25   :  { %v8435_v54 = vpop.f32.mrf.mxu1  ;;  %8789 = vmatprep.subr.mxu0 %v4692_v11 }
 0xd26   :  { %8790 = vmatpush3.msra.mxu0 %v4692_v11  ;;  %v7356_v11 = vld [vmem:[#allocation18] ss:$0 sm:$0xff] }
 0xd27   :  { %v3281_v48 = vpop.f32.mrf.mxu1  ;;  %8791 = vmatprep.subr.mxu0 %v4691_v0 }
 0xd28   :  { %v3291_v50 = vadd.f32 %v3281_v48, %v3031_v47  ;;  %8792 = vmatpush3.msra.mxu0 %v4691_v0 }
 0xd29   :  { %v8438_v56 = vpop.f32.mrf.mxu1 }
 0xd2b   :  { %v3490_v58 = vpop.f32.mrf.mxu1 }
 0xd2c   :  { %v3524_v61 = vadd.f32 %v3490_v58, %v3285_v63 }
 0xd2d   :  { %v8482_v59 = vpop.f32.mrf.mxu1 }
 0xd2f   :  { %v3495_v60 = vpop.f32.mrf.mxu1 }
 0xd30   :  { %v3525_v62 = vadd.f32 %v3495_v60, %v3286_v52 }
 0xd31   :  { %v8485_v16 = vpop.f32.mrf.mxu1 }
 0xd33   :  { %v3500_v51 = vpop.f32.mrf.mxu1 }
 0xd34   :  { %v3526_v19 = vadd.f32 %v3500_v51, %v3287_v15 }
 0xd35   :  { %v8488_v20 = vpop.f32.mrf.mxu1 }
 0xd37   :  { %v3505_v53 = vpop.f32.mrf.mxu1 }
 0xd38   :  { %v3527_v21 = vadd.f32 %v3505_v53, %v3288_v17 }
 0xd39   :  { %v8491_v28 = vpop.f32.mrf.mxu1 }
 0xd3b   :  { %v3510_v24 = vpop.f32.mrf.mxu1 }
 0xd3c   :  { %v3528_v26 = vadd.f32 %v3510_v24, %v3289_v55 }
 0xd3d   :  { %v8494_v29 = vpop.f32.mrf.mxu1 }
 0xd3f   :  { %v3515_v30 = vpop.f32.mrf.mxu1 }
 0xd40   :  { %v3529_v33 = vadd.f32 %v3515_v30, %v3290_v57 }
 0xd41   :  { %v8497_v34 = vpop.f32.mrf.mxu1 }
 0xd43   :  { %v3520_v32 = vpop.f32.mrf.mxu1 }
 0xd44   :  { %v3530_v35 = vadd.f32 %v3520_v32, %v3291_v50 }
 0xd45   :  { %v8500_v36 = vpop.f32.mrf.mxu1 }
 0xd47   :  { %v3721_v38 = vpop.f32.mrf.mxu1 }
 0xd48   :  { %v3755_v40 = vadd.f32 %v3721_v38, %v3524_v61 }
 0xd49   :  { %v8544_v41 = vpop.f32.mrf.mxu1 }
 0xd4b   :  { %v3726_v43 = vpop.f32.mrf.mxu1 }
 0xd4c   :  { %v3756_v46 = vadd.f32 %v3726_v43, %v3525_v62 }
 0xd4d   :  { %v8547_v3 = vpop.f32.mrf.mxu1 }
 0xd4f   :  { %v3731_v6 = vpop.f32.mrf.mxu1 }
 0xd50   :  { %v3757_v42 = vadd.f32 %v3731_v6, %v3526_v19 }
 0xd51   :  { %v8550_v1 = vpop.f32.mrf.mxu1 }
 0xd53   :  { %v3736_v5 = vpop.f32.mrf.mxu1 }
 0xd54   :  { %v3758_v7 = vadd.f32 %v3736_v5, %v3527_v21 }
 0xd55   :  { %v8553_v44 = vpop.f32.mrf.mxu1 }
 0xd57   :  { %v3741_v8 = vpop.f32.mrf.mxu1 }
 0xd58   :  { %v3759_v9 = vadd.f32 %v3741_v8, %v3528_v26 }
 0xd59   :  { %v8556_v45 = vpop.f32.mrf.mxu1 }
 0xd5b   :  { %v3746_v2 = vpop.f32.mrf.mxu1 }
 0xd5c   :  { %v3760_v47 = vadd.f32 %v3746_v2, %v3529_v33 }
 0xd5d   :  { %v8559_v4 = vpop.f32.mrf.mxu1 }
 0xd5f   :  { %v3751_v49 = vpop.f32.mrf.mxu1 }
 0xd60   :  { %v3761_v63 = vadd.f32 %v3751_v49, %v3530_v35 }
 0xd61   :  { %v8562_v22 = vpop.f32.mrf.mxu1 }
 0xd63   :  { %v3952_v10 = vpop.f32.mrf.mxu1 }
 0xd64   :  { %v10835_v52 = vadd.f32 %v3952_v10, %v3755_v40 }
 0xd65   :  { %v8606_v14 = vpop.f32.mrf.mxu1 }
 0xd67   :  { %v3957_v23 = vpop.f32.mrf.mxu1 }
 0xd68   :  { %v3987_v15 = vadd.f32 %v3957_v23, %v3756_v46 }
 0xd69   :  { %v8609_v25 = vpop.f32.mrf.mxu1 }
 0xd6b   :  { %v3962_v27 = vpop.f32.mrf.mxu1 }
 0xd6c   :  { %v3988_v17 = vadd.f32 %v3962_v27, %v3757_v42 }
 0xd6d   :  { %v8612_v31 = vpop.f32.mrf.mxu1 }
 0xd6f   :  { %v3967_v37 = vpop.f32.mrf.mxu1 }
 0xd70   :  { %v3989_v55 = vadd.f32 %v3967_v37, %v3758_v7 }
 0xd71   :  { %v8615_v12 = vpop.f32.mrf.mxu1 }
 0xd73   :  { %v3972_v13 = vpop.f32.mrf.mxu1 }
 0xd74   :  { %v3990_v57 = vadd.f32 %v3972_v13, %v3759_v9 }
 0xd75   :  { %v8618_v54 = vpop.f32.mrf.mxu1 }
 0xd77   :  { %v3977_v48 = vpop.f32.mrf.mxu1 }
 0xd78   :  { %v3991_v43 = vadd.f32 %v3977_v48, %v3760_v47  ;;  %v4477_v48 = vld [vmem:[%s11449_s14 + $0x8] sm:$0xff] }
 0xd79   :  { %v8621_v50 = vpop.f32.mrf.mxu1 }
 0xd7a   :  { %v4478_v50 = vld [vmem:[%s11449_s14 + $0x10] sm:$0xff] }
 0xd7b   :  { %v3982_v56 = vpop.f32.mrf.mxu1 }
 0xd7c   :  { %v3992_v3 = vadd.f32 %v3982_v56, %v3761_v63  ;;  %v4479_v56 = vld [vmem:[%s11449_s14 + $0x18] sm:$0xf] }
 0xd7d   :  { %v8624_v58 = vpop.f32.mrf.mxu1 }
 0xd7e   :  { %v7361_v58 = vld [vmem:[%s11449_s14 + $0x20] sm:$0xff] }
 0xd7f   :  { %v4183_v61 = vpop.f32.mrf.mxu1 }
 0xd80   :  { %v4217_v63 = vadd.f32 %v4183_v61, %v10835_v52  ;;  %v7362_v61 = vld [vmem:[%s11449_s14 + $0x28] sm:$0xff] }
 0xd81   :  { %v8668_v59 = vpop.f32.mrf.mxu1 }
 0xd82   :  { %v7381_v59 = vld [vmem:[%s11450_s15 + $0x88] sm:$0xff] }
 0xd83   :  { %v4188_v60 = vpop.f32.mrf.mxu1 }
 0xd84   :  { %v4218_v10 = vadd.f32 %v4188_v60, %v3987_v15  ;;  %v7363_v60 = vld [vmem:[%s11449_s14 + $0x30] sm:$0xff] }
 0xd85   :  { %v8671_v62 = vpop.f32.mrf.mxu1 }
 0xd86   :  { %v7380_v62 = vld [vmem:[%s11450_s15 + $0x80] sm:$0xff] }
 0xd87   :  { %v4193_v16 = vpop.f32.mrf.mxu1 }
 0xd88   :  { %v4219_v2 = vadd.f32 %v4193_v16, %v3988_v17  ;;  %v7364_v16 = vld [vmem:[%s11449_s14 + $0x38] sm:$0xf] }
 0xd89   :  { %v8674_v51 = vpop.f32.mrf.mxu1 }
 0xd8a   :  { %v4690_v51 = vld [vmem:[%s11450_s15 + $0x30] sm:$0xff] }
 0xd8b   :  { %v4198_v19 = vpop.f32.mrf.mxu1  ;;  %8793 = vmatprep.subr.mxu0 %v4690_v51 }
 0xd8c   :  { %v4220_v8 = vadd.f32 %v4198_v19, %v3989_v55  ;;  %v7379_v19 = vld [vmem:[%s11450_s15 + $0x78] sm:$0xff]  ;;  %8794 = vmatpush3.msra.mxu0 %v4690_v51 }
 0xd8d   :  { %v8677_v20 = vpop.f32.mrf.mxu1 }
 0xd8e   :  { %v4689_v20 = vld [vmem:[%s11450_s15 + $0x28] sm:$0xff] }
 0xd8f   :  { %v4203_v53 = vpop.f32.mrf.mxu1  ;;  %8795 = vmatprep.subr.mxu0 %v4689_v20 }
 0xd90   :  { %v4221_v1 = vadd.f32 %v4203_v53, %v3990_v57  ;;  %v7378_v53 = vld [vmem:[%s11450_s15 + $0x70] sm:$0xff]  ;;  %8796 = vmatpush3.msra.mxu0 %v4689_v20 }
 0xd91   :  { %v8680_v21 = vpop.f32.mrf.mxu1 }
 0xd92   :  { %v4688_v21 = vld [vmem:[%s11450_s15 + $0x20] sm:$0xff] }
 0xd93   :  { %v4208_v28 = vpop.f32.mrf.mxu1  ;;  %8797 = vmatprep.subr.mxu0 %v4688_v21 }
 0xd94   :  { %v4222_v6 = vadd.f32 %v4208_v28, %v3991_v43  ;;  %v7377_v28 = vld [vmem:[%s11450_s15 + $0x68] sm:$0xff]  ;;  %8798 = vmatpush3.msra.mxu0 %v4688_v21  ;;  %v7411_v21 = vld [vmem:[%s11451_s16 + $0x38] sm:$0xff] }
 0xd95   :  { %v8683_v24 = vpop.f32.mrf.mxu1 }
 0xd96   :  { %v4687_v24 = vld [vmem:[%s11450_s15 + $0x18] sm:$0xff] }
 0xd97   :  { %v4213_v26 = vpop.f32.mrf.mxu1  ;;  %8799 = vmatprep.subr.mxu0 %v4687_v24 }
 0xd98   :  { %v4223_v5 = vadd.f32 %v4213_v26, %v3992_v3  ;;  %v7376_v26 = vld [vmem:[%s11450_s15 + $0x60] sm:$0xff]  ;;  %8800 = vmatpush3.msra.mxu0 %v4687_v24  ;;  %v7426_v24 = vld [vmem:[%s11451_s16 + $0x48] sm:$0xff] }
 0xd99   :  { %v8686_v29 = vpop.f32.mrf.mxu1 }
 0xd9a   :  { %v4686_v29 = vld [vmem:[%s11450_s15 + $0x10] sm:$0xff] }
 0xd9b   :  { %v4414_v30 = vpop.f32.mrf.mxu1  ;;  %8801 = vmatprep.subr.mxu0 %v4686_v29 }
 0xd9c   :  { %v4448_v37 = vadd.f32 %v4414_v30, %v4217_v63  ;;  %v7375_v30 = vld [vmem:[%s11450_s15 + $0x58] sm:$0xff]  ;;  %8802 = vmatpush3.msra.mxu0 %v4686_v29  ;;  %v4991_v63 = vld [vmem:[%s11452_s17 + $0x20] sm:$0xf] }
 0xd9d   :  { %v8730_v33 = vpop.f32.mrf.mxu1  ;;  %v7428_v29 = vld [vmem:[%s11451_s16 + $0x58] sm:$0xf] }
 0xd9e   :  { %v4462_v15 = vadd.f32 %v7356_v11, %v4448_v37  ;;  %v4685_v33 = vld [vmem:[%s11450_s15 + $0x8] sm:$0xff] }
 0xd9f   :  { %v4419_v34 = vpop.f32.mrf.mxu1  ;;  %8803 = vmatprep.subr.mxu0 %v4685_v33  ;;  %v7392_v37 = vld [vmem:[%s11451_s16 + $0x28] sm:$0xf] }
 0xda0   :  { %v4449_v25 = vadd.f32 %v4419_v34, %v4218_v10  ;;  %v4469_v52 = vmax.f32 %v4462_v15, 0.0  ;;  %v7374_v34 = vld [vmem:[%s11450_s15 + $0x50] sm:$0xff]  ;;  %8804 = vmatpush3.msra.mxu0 %v4685_v33  ;;  %v4990_v15 = vld [vmem:[%s11452_s17 + $0x18] sm:$0xff]  ;;  %v7443_v33 = vld [vmem:[%s11451_s16 + $0x68] sm:$0xff] }
 0xda1   :  { %v8733_v32 = vpop.f32.mrf.mxu1 }
 0xda2   :  { %v4463_v17 = vadd.f32 %v7356_v11, %v4449_v25  ;;  %v4684_v32 = vld [vmem:[%s11450_s15] sm:$0xff] }
 0xda3   :  { %v4424_v35 = vpop.f32.mrf.mxu1  ;;  %8805 = vmatprep.subr.mxu0 %v4684_v32  ;;  %v7391_v25 = vld [vmem:[%s11451_s16 + $0x20] sm:$0xff] }
 0xda4   :  { %v4450_v14 = vadd.f32 %v4424_v35, %v4219_v2  ;;  %v4470_v54 = vmax.f32 %v4463_v17, 0.0  ;;  %v7373_v35 = vld [vmem:[%s11450_s15 + $0x48] sm:$0xff]  ;;  %8806 = vmatpush3.msra.mxu0 %v4684_v32  ;;  %v7398_v17 = vld [vmem:[%s11452_s17 + $0x30] sm:$0xff] }
 0xda5   :  { %v8736_v36 = vpop.f32.mrf.mxu1  ;;  %8837 = vmatprep.subr.mxu0 %v9496_v18  ;;  %v7421_v32 = vld [vmem:[%s11452_s17 + $0x70] sm:$0xf] }
 0xda6   :  { %v4464_v55 = vadd.f32 %v7356_v11, %v4450_v14  ;;  %v7390_v14 = vld [vmem:[%s11451_s16 + $0x18] sm:$0xff] }
 0xda7   :  { %v4429_v38 = vpop.f32.mrf.mxu1 }
 0xda8   :  { %v4451_v4 = vadd.f32 %v4429_v38, %v4220_v8  ;;  %v4471_v57 = vmax.f32 %v4464_v55, 0.0  ;;  %v4892_v55 = vld [vmem:[%s11451_s16 + $0x10] sm:$0xf] }
 0xda9   :  { %v8739_v39 = vpop.f32.mrf.mxu1 }
 0xdaa   :  { %v4465_v27 = vadd.f32 %v7356_v11, %v4451_v4 }
 0xdab   :  { %v4434_v40 = vpop.f32.mrf.mxu1 }
 0xdac   :  { %v4452_v9 = vadd.f32 %v4434_v40, %v4221_v1  ;;  %v4472_v13 = vmax.f32 %v4465_v27, 0.0  ;;  %v4891_v27 = vld [vmem:[%s11451_s16 + $0x8] sm:$0xff] }
 0xdad   :  { %v8742_v41 = vpop.f32.mrf.mxu1 }
 0xdae   :  { %v4466_v47 = vadd.f32 %v7356_v11, %v4452_v9 }
 0xdaf   :  { %v4439_v46 = vpop.f32.mrf.mxu1 }
 0xdb0   :  { %v4453_v7 = vadd.f32 %v4439_v46, %v4222_v6  ;;  %v4473_v12 = vmax.f32 %v4466_v47, 0.0  ;;  %v4890_v47 = vld [vmem:[%s11451_s16] sm:$0xff] }
 0xdb1   :  { %v8745_v42 = vpop.f32.mrf.mxu1 }
 0xdb2   :  { %v4467_v49 = vadd.f32 %v7356_v11, %v4453_v7 }
 0xdb3   :  { %v4444_v44 = vpop.f32.mrf.mxu1 }
 0xdb4   :  { %v4454_v45 = vadd.f32 %v4444_v44, %v4223_v5  ;;  %v4474_v31 = vmax.f32 %v4467_v49, 0.0 }
 0xdb5   :  { %v8748_v0 = vpop.f32.mrf.mxu1 }
 0xdb6   :  { %v4468_v22 = vadd.f32 %v7356_v11, %v4454_v45 }
 0xdb8   :  { %v4475_v23 = vmax.f32 %v4468_v22, 0.0 }
 0xdba   :  { %8749 = vmatprep.subr.mxu1 %v4475_v23 }
 0xdbb   :  { %8750 = vmatpush3.msra.mxu1 %v4475_v23 }
 0xdbc   :  { %8751 = vmatprep.subr.mxu1 %v4474_v31 }
 0xdbd   :  { %8752 = vmatpush3.msra.mxu1 %v4474_v31 }
 0xdbe   :  { %8753 = vmatprep.subr.mxu1 %v4473_v12 }
 0xdbf   :  { %8754 = vmatpush3.msra.mxu1 %v4473_v12 }
 0xdc0   :  { %8755 = vmatprep.subr.mxu1 %v4472_v13 }
 0xdc1   :  { %8756 = vmatpush3.msra.mxu1 %v4472_v13 }
 0xdc2   :  { %8757 = vmatprep.subr.mxu1 %v4471_v57 }
 0xdc3   :  { %8758 = vmatpush3.msra.mxu1 %v4471_v57 }
 0xdc4   :  { %8759 = vmatprep.subr.mxu1 %v4470_v54 }
 0xdc5   :  { %8760 = vmatpush3.msra.mxu1 %v4470_v54 }
 0xdc6   :  { %8761 = vmatprep.subr.mxu1 %v4469_v52 }
 0xdc7   :  { %8762 = vmatpush3.msra.mxu1 %v4469_v52 }
 0xdc8   :  { %8769 = vmatprep.subr.mxu1 %v4475_v23  ;;  %8764 = vmatmul.mubr.msk.f32.vlgmr.msra.gmra.mxu1 %vm4480_vm5, %v4477_v48 }
 0xdc9   :  { %8770 = vmatpush3.msra.mxu1 %v4475_v23  ;;  %8766 = vmatprep.mubr.msk.f32.mxu1 %vm4480_vm5, %v4478_v50  ;;  %v7401_v23 = vld [vmem:[%s11452_s17 + $0x48] sm:$0xf] }
 0xdca   :  { %8771 = vmatprep.subr.mxu1 %v4474_v31 }
 0xdcb   :  { %8772 = vmatpush3.msra.mxu1 %v4474_v31  ;;  %v7400_v31 = vld [vmem:[%s11452_s17 + $0x40] sm:$0xff] }
 0xdcc   :  { %8773 = vmatprep.subr.mxu1 %v4473_v12  ;;  %8767 = vmatmul.mubr.msk.f32.gmra.mxu1 %vm4480_vm5, %v4479_v56 }
 0xdcd   :  { %8774 = vmatpush3.msra.mxu1 %v4473_v12  ;;  %8783 = vmatprep.mubr.msk.f32.mxu1 %vm4480_vm5, %v7361_v58  ;;  %v7399_v12 = vld [vmem:[%s11452_s17 + $0x38] sm:$0xff] }
 0xdce   :  { %8775 = vmatprep.subr.mxu1 %v4472_v13 }
 0xdcf   :  { %8776 = vmatpush3.msra.mxu1 %v4472_v13  ;;  %v7397_v13 = vld [vmem:[%s11452_s17 + $0x28] sm:$0xff] }
 0xdd0   :  { %8777 = vmatprep.subr.mxu1 %v4471_v57 }
 0xdd1   :  { %8778 = vmatpush3.msra.mxu1 %v4471_v57  ;;  %v4989_v57 = vld [vmem:[%s11452_s17 + $0x10] sm:$0xff] }
 0xdd2   :  { %8779 = vmatprep.subr.mxu1 %v4470_v54 }
 0xdd3   :  { %8780 = vmatpush3.msra.mxu1 %v4470_v54  ;;  %v4988_v54 = vld [vmem:[%s11452_s17 + $0x8] sm:$0xff] }
 0xdd4   :  { %8781 = vmatprep.subr.mxu1 %v4469_v52 }
 0xdd5   :  { %8782 = vmatpush3.msra.mxu1 %v4469_v52  ;;  %v4987_v52 = vld [vmem:[%s11452_s17] sm:$0xff] }
 0xdd6   :  { %8784 = vmatmul.mubr.msk.f32.vlgmr.msra.gmra.mxu1 %vm4480_vm5, %v7362_v61  ;;  %8813 = vmatprep.subr.mxu1 %v7381_v59 }
 0xdd7   :  { %8786 = vmatprep.mubr.msk.f32.mxu1 %vm4480_vm5, %v7363_v60  ;;  %8814 = vmatpush3.msra.mxu1 %v7381_v59 }
 0xdd8   :  { %8815 = vmatprep.subr.mxu1 %v7380_v62 }
 0xdd9   :  { %8816 = vmatpush3.msra.mxu1 %v7380_v62 }
 0xdda   :  { %8787 = vmatmul.mubr.msk.f32.gmra.mxu1 %vm4480_vm5, %v7364_v16  ;;  %8817 = vmatprep.subr.mxu1 %v7379_v19 }
 0xddb   :  { %8818 = vmatpush3.msra.mxu1 %v7379_v19  ;;  %v7410_v19 = vld [vmem:[%s11451_s16 + $0x30] sm:$0xff] }
 0xddc   :  { %8819 = vmatprep.subr.mxu1 %v7378_v53 }
 0xddd   :  { %8820 = vmatpush3.msra.mxu1 %v7378_v53 }
 0xdde   :  { %8821 = vmatprep.subr.mxu1 %v7377_v28 }
 0xddf   :  { %8822 = vmatpush3.msra.mxu1 %v7377_v28  ;;  %v7412_v28 = vld [vmem:[%s11451_s16 + $0x40] sm:$0xf] }
 0xde0   :  { %8823 = vmatprep.subr.mxu1 %v7376_v26 }
 0xde1   :  { %8824 = vmatpush3.msra.mxu1 %v7376_v26  ;;  %v7427_v26 = vld [vmem:[%s11451_s16 + $0x50] sm:$0xff] }
 0xde2   :  { %8825 = vmatprep.subr.mxu1 %v7375_v30 }
 0xde3   :  { %8826 = vmatpush3.msra.mxu1 %v7375_v30  ;;  %v7442_v30 = vld [vmem:[%s11451_s16 + $0x60] sm:$0xff] }
 0xde4   :  { %8827 = vmatprep.subr.mxu1 %v7374_v34 }
 0xde5   :  { %8828 = vmatpush3.msra.mxu1 %v7374_v34  ;;  %v7444_v34 = vld [vmem:[%s11451_s16 + $0x70] sm:$0xf] }
 0xde6   :  { %8829 = vmatprep.subr.mxu1 %v7373_v35 }
 0xde7   :  { %8830 = vmatpush3.msra.mxu1 %v7373_v35  ;;  %v7420_v35 = vld [vmem:[%s11452_s17 + $0x68] sm:$0xff] }
 0xde8   :  { %8854 = vmatprep.subr.mxu1 %v9496_v18 }
 0xe88   :  { %v8765_v36 = vpop.f32.mrf.mxu1 }
 0xe8a   :  { %v4559_v38 = vpop.f32.mrf.mxu1 }
 0xe8c   :  { %v8768_v39 = vpop.f32.mrf.mxu1 }
 0xe8e   :  { %v4569_v40 = vpop.f32.mrf.mxu1 }
 0xe96   :  { %v8785_v41 = vpop.f32.mrf.mxu1 }
 0xe97   :  { %v4681_v3 = vmax.f32 %v8765_v36, %v8785_v41  ;;  %v7419_v36 = vld [vmem:[%s11452_s17 + $0x60] sm:$0xff] }
 0xe98   :  { %v4661_v43 = vpop.f32.mrf.mxu1 }
 0xe99   :  { %v4680_v46 = vmax.f32 %v4559_v38, %v4661_v43  ;;  %v7418_v38 = vld [vmem:[%s11452_s17 + $0x58] sm:$0xff] }
 0xe9a   :  { %v8788_v6 = vpop.f32.mrf.mxu1 }
 0xe9b   :  { %8807 = vmatprep.mubr.msk.f32.mxu0 %vm4693_vm6, %v4680_v46  ;;  %8831 = vmatprep.mubr.msk.f32.mxu1 %vm4693_vm6, %v4680_v46  ;;  %v4683_v5 = vmax.f32 %v8768_v39, %v8788_v6  ;;  %v7417_v39 = vld [vmem:[%s11452_s17 + $0x50] sm:$0xff] }
 0xe9c   :  { %v4671_v42 = vpop.f32.mrf.mxu1  ;;  %8808 = vmatmul.mubr.msk.f32.vlgmr.msra.gmra.mxu0 %vm4693_vm6, %v4681_v3  ;;  %8832 = vmatmul.mubr.msk.f32.vlgmr.msra.gmra.mxu1 %vm4693_vm6, %v4681_v3 }
 0xe9d   :  { %v4682_v1 = vmax.f32 %v4569_v40, %v4671_v42 }
 0xe9f   :  { %8810 = vmatprep.mubr.msk.f32.mxu0 %vm4693_vm6, %v4682_v1  ;;  %8834 = vmatprep.mubr.msk.f32.mxu1 %vm4693_vm6, %v4682_v1 }
 0xea0   :  { %8811 = vmatmul.mubr.msk.f32.gmra.mxu0 %vm4693_vm6, %v4683_v5  ;;  %8835 = vmatmul.mubr.msk.f32.gmra.mxu1 %vm4693_vm6, %v4683_v5 }
 0xea1   :  { %8862 = vmatprep.mubr.msk.f32.mxu1 %vm9497_vm4, %v9496_v18  ;;  %8845 = vmatprep.mubr.msk.f32.mxu0 %vm9497_vm4, %v9496_v18 }
 0xf5c   :  { %v8809_v7 = vpop.f32.mrf.mxu0  ;;  %v8833_v44 = vpop.f32.mrf.mxu1 }
 0xf5d   :  { %v10930_v22 = vmax.f32 %v8809_v7, %v8833_v44 }
 0xf5e   :  { %v4772_v8 = vpop.f32.mrf.mxu0  ;;  %v4867_v9 = vpop.f32.mrf.mxu1 }
 0xf5f   :  { %v10936_v10 = vmax.f32 %v4772_v8, %v4867_v9 }
 0xf60   :  { %v8812_v45 = vpop.f32.mrf.mxu0  ;;  %v8836_v11 = vpop.f32.mrf.mxu1 }
 0xf61   :  { %v10920_v0 = vmax.f32 %v8812_v45, %v8836_v11  ;;  %v7437_v11 = vld [vmem:[%s11452_s17 + $0x98] sm:$0xf] }
 0xf62   :  { %v4782_v2 = vpop.f32.mrf.mxu0  ;;  %v4877_v4 = vpop.f32.mrf.mxu1 }
 0xf63   :  { %v10922_v49 = vmax.f32 %v4782_v2, %v4877_v4  ;;  %8838 = vmatpush3.msk.msra.mxu0 %vm4903_vm7, %v10920_v0  ;;  %8855 = vmatpush3.msk.msra.mxu1 %vm4903_vm7, %v10920_v0  ;;  %v7436_v4 = vld [vmem:[%s11452_s17 + $0x90] sm:$0xff] }
 0xf64   :  { %8839 = vmatprep.subr.mxu0 %v9496_v18  ;;  %8856 = vmatprep.subr.mxu1 %v9496_v18 }
 0xf65   :  { %8840 = vmatpush3.msra.mxu0 %v10922_v49  ;;  %8857 = vmatpush3.msra.mxu1 %v10922_v49 }
 0xf66   :  { %8841 = vmatprep.subr.mxu0 %v9496_v18  ;;  %8858 = vmatprep.subr.mxu1 %v9496_v18 }
 0xf67   :  { %8842 = vmatpush3.msra.mxu0 %v10930_v22  ;;  %8859 = vmatpush3.msra.mxu1 %v10930_v22 }
 0xf68   :  { %8843 = vmatprep.subr.mxu0 %v9496_v18  ;;  %8860 = vmatprep.subr.mxu1 %v9496_v18 }
 0xf69   :  { %8844 = vmatpush3.msra.mxu0 %v10936_v10  ;;  %8861 = vmatpush3.msra.mxu1 %v10936_v10 }
 0xf6a   :  { %8863 = vmatmul.mubr.msk.f32.vlgmr.msra.gmra.mxu1 %vm4893_vm8, %v7390_v14  ;;  %8846 = vmatmul.mubr.msk.f32.vlgmr.msra.gmra.mxu0 %vm4893_vm8, %v4890_v47  ;;  %v7434_v14 = vld [vmem:[%s11452_s17 + $0x80] sm:$0xff] }
 0xf6b   :  { %8865 = vmatprep.mubr.msk.f32.mxu1 %vm9497_vm4, %v9496_v18  ;;  %8848 = vmatprep.mubr.msk.f32.mxu0 %vm9497_vm4, %v9496_v18 }
 0xf6c   :  { %8871 = vmatprep.subr.mxu0 %v9496_v18  ;;  %8890 = vmatprep.subr.mxu1 %v9496_v18 }
 0xf6d   :  { %8872 = vmatpush3.msk.msra.mxu0 %vm4903_vm7, %v7401_v23  ;;  %8891 = vmatpush3.msk.msra.mxu1 %vm4903_vm7, %v4991_v63  ;;  %v7433_v23 = vld [vmem:[%s11452_s17 + $0x78] sm:$0xff] }
 0xf6e   :  { %8866 = vmatmul.mubr.msk.f32.gmra.mxu1 %vm4893_vm8, %v7391_v25  ;;  %8849 = vmatmul.mubr.msk.f32.gmra.mxu0 %vm4893_vm8, %v4891_v27  ;;  %v7453_v27 = vld [vmem:[%s11452_s17 + $0xc0] sm:$0xf] }
 0xf6f   :  { %8868 = vmatprep.mubr.msk.f32.mxu1 %vm9497_vm4, %v9496_v18  ;;  %8851 = vmatprep.mubr.msk.f32.mxu0 %vm9497_vm4, %v9496_v18 }
 0xf70   :  { %8873 = vmatprep.subr.mxu0 %v9496_v18  ;;  %8892 = vmatprep.subr.mxu1 %v9496_v18 }
 0xf71   :  { %8874 = vmatpush3.msra.mxu0 %v7400_v31  ;;  %8893 = vmatpush3.msra.mxu1 %v4990_v15 }
 0xf72   :  { %8869 = vmatmul.mubr.msk.f32.gmra.mxu1 %vm4893_vm8, %v7392_v37  ;;  %8852 = vmatmul.mubr.msk.f32.gmra.mxu0 %vm4893_vm8, %v4892_v55  ;;  %v7452_v37 = vld [vmem:[%s11452_s17 + $0xb8] sm:$0xff] }
 0xf73   :  { %8875 = vmatprep.subr.mxu0 %v9496_v18  ;;  %8881 = vmatprep.mubr.msk.f32.mxu0 %vm9497_vm4, %v9496_v18 }
 0xf74   :  { %8876 = vmatpush3.msra.mxu0 %v7399_v12  ;;  %8900 = vmatprep.mubr.msk.f32.mxu1 %vm9497_vm4, %v9496_v18  ;;  %v7451_v12 = vld [vmem:[%s11452_s17 + $0xb0] sm:$0xff] }
 0xf75   :  { %8877 = vmatprep.subr.mxu0 %v9496_v18  ;;  %8894 = vmatprep.subr.mxu1 %v9496_v18 }
 0xf76   :  { %8878 = vmatpush3.msra.mxu0 %v7398_v17  ;;  %8895 = vmatpush3.msra.mxu1 %v4989_v57  ;;  %v7449_v57 = vld [vmem:[%s11452_s17 + $0xa0] sm:$0xff] }
 0xf77   :  { %8879 = vmatprep.subr.mxu0 %v9496_v18  ;;  %8896 = vmatprep.subr.mxu1 %v9496_v18 }
 0xf78   :  { %8880 = vmatpush3.msra.mxu0 %v7397_v13  ;;  %8897 = vmatpush3.msra.mxu1 %v4988_v54  ;;  %v7450_v13 = vld [vmem:[%s11452_s17 + $0xa8] sm:$0xff] }
 0xf79   :  { %8909 = vmatprep.subr.mxu0 %v9496_v18  ;;  %8898 = vmatprep.subr.mxu1 %v9496_v18 }
 0xf7a   :  { %8899 = vmatpush3.msra.mxu1 %v4987_v52 }
 0xf7b   :  { %8926 = vmatprep.subr.mxu1 %v9496_v18 }
0x102a   :  { %v5071_v48 = vpop.f32.mrf.mxu1  ;;  %v4973_v50 = vpop.f32.mrf.mxu0 }
0x102b   :  { %8882 = vmatmul.mubr.msk.f32.vlgmr.msra.gmra.mxu0 %vm5091_vm9, %v5071_v48  ;;  %8901 = vmatmul.mubr.msk.f32.vlgmr.msra.gmra.mxu1 %vm5091_vm9, %v4973_v50 }
0x102c   :  { %8910 = vmatpush3.msk.msra.mxu0 %vm4903_vm7, %v10920_v0  ;;  %v8864_v56 = vpop.f32.mrf.mxu1  ;;  %8884 = vmatprep.mubr.msk.f32.mxu0 %vm9497_vm4, %v9496_v18  ;;  %v8847_v58 = vpop.f32.mrf.mxu0 }
0x102d   :  { %8911 = vmatprep.subr.mxu0 %v9496_v18  ;;  %8903 = vmatprep.mubr.msk.f32.mxu1 %vm9497_vm4, %v9496_v18 }
0x102e   :  { %8912 = vmatpush3.msra.mxu0 %v10922_v49  ;;  %v5076_v61 = vpop.f32.mrf.mxu1  ;;  %v4978_v59 = vpop.f32.mrf.mxu0  ;;  %8927 = vmatpush3.msk.msra.mxu1 %vm4903_vm7, %v7421_v32 }
0x102f   :  { %8913 = vmatprep.subr.mxu0 %v9496_v18  ;;  %8885 = vmatmul.mubr.msk.f32.gmra.mxu0 %vm5091_vm9, %v5076_v61 }
0x1030   :  { %8914 = vmatpush3.msra.mxu0 %v10930_v22  ;;  %v8867_v60 = vpop.f32.mrf.mxu1  ;;  %8887 = vmatprep.mubr.msk.f32.mxu0 %vm9497_vm4, %v9496_v18  ;;  %v8850_v62 = vpop.f32.mrf.mxu0 }
0x1031   :  { %8915 = vmatprep.subr.mxu0 %v9496_v18  ;;  %8904 = vmatmul.mubr.msk.f32.gmra.mxu1 %vm5091_vm9, %v4978_v59  ;;  %v5871_v60 = vld [vmem:[%s11454_s19] sm:$0xff]  ;;  %v7462_v62 = vld [vmem:[%s11454_s19 + $0x10] sm:$0xff] }
0x1032   :  { %8916 = vmatpush3.msra.mxu0 %v10936_v10  ;;  %v5081_v16 = vpop.f32.mrf.mxu1  ;;  %v4983_v51 = vpop.f32.mrf.mxu0  ;;  %8906 = vmatprep.mubr.msk.f32.mxu1 %vm9497_vm4, %v9496_v18 }
0x1033   :  { %8888 = vmatmul.mubr.msk.f32.gmra.mxu0 %vm5091_vm9, %v5081_v16  ;;  %8945 = vmatprep.subr.mxu0 %v9496_v18 }
0x1034   :  { %8917 = vmatprep.mubr.msk.f32.mxu0 %vm9497_vm4, %v9496_v18  ;;  %v8870_v20 = vpop.f32.mrf.mxu1  ;;  %v8853_v53 = vpop.f32.mrf.mxu0  ;;  %8928 = vmatprep.subr.mxu1 %v9496_v18 }
0x1035   :  { %8907 = vmatmul.mubr.msk.f32.gmra.mxu1 %vm5091_vm9, %v4983_v51 }
0x1036   :  { %8936 = vmatprep.mubr.msk.f32.mxu1 %vm9497_vm4, %v9496_v18  ;;  %8929 = vmatpush3.msra.mxu1 %v7420_v35 }
0x1037   :  { %8918 = vmatmul.mubr.msk.f32.vlgmr.msra.gmra.mxu0 %vm4893_vm8, %v7410_v19  ;;  %8930 = vmatprep.subr.mxu1 %v9496_v18 }
0x1038   :  { %8946 = vmatpush3.msk.msra.mxu0 %vm4903_vm7, %v10920_v0  ;;  %8920 = vmatprep.mubr.msk.f32.mxu0 %vm9497_vm4, %v9496_v18 }
0x1039   :  { %8947 = vmatprep.subr.mxu0 %v9496_v18  ;;  %8931 = vmatpush3.msra.mxu1 %v7419_v36 }
0x103a   :  { %8948 = vmatpush3.msra.mxu0 %v10922_v49  ;;  %8932 = vmatprep.subr.mxu1 %v9496_v18 }
0x103b   :  { %8949 = vmatprep.subr.mxu0 %v9496_v18  ;;  %8921 = vmatmul.mubr.msk.f32.gmra.mxu0 %vm4893_vm8, %v7411_v21 }
0x103c   :  { %8950 = vmatpush3.msra.mxu0 %v10930_v22  ;;  %8923 = vmatprep.mubr.msk.f32.mxu0 %vm9497_vm4, %v9496_v18 }
0x103d   :  { %8951 = vmatprep.subr.mxu0 %v9496_v18  ;;  %8933 = vmatpush3.msra.mxu1 %v7418_v38 }
0x103e   :  { %8952 = vmatpush3.msra.mxu0 %v10936_v10  ;;  %8934 = vmatprep.subr.mxu1 %v9496_v18 }
0x103f   :  { %8924 = vmatmul.mubr.msk.f32.gmra.mxu0 %vm4893_vm8, %v7412_v28  ;;  %8981 = vmatprep.subr.mxu0 %v9496_v18 }
0x1040   :  { %8953 = vmatprep.mubr.msk.f32.mxu0 %vm9497_vm4, %v9496_v18  ;;  %8935 = vmatpush3.msra.mxu1 %v7417_v39 }
0x1041   :  { %8962 = vmatprep.subr.mxu1 %v9496_v18 }
0x1043   :  { %8954 = vmatmul.mubr.msk.f32.vlgmr.msra.gmra.mxu0 %vm4893_vm8, %v7426_v24 }
0x1044   :  { %8982 = vmatpush3.msk.msra.mxu0 %vm4903_vm7, %v10920_v0  ;;  %8956 = vmatprep.mubr.msk.f32.mxu0 %vm9497_vm4, %v9496_v18 }
0x1045   :  { %8983 = vmatprep.subr.mxu0 %v9496_v18 }
0x1046   :  { %8984 = vmatpush3.msra.mxu0 %v10922_v49 }
0x1047   :  { %8985 = vmatprep.subr.mxu0 %v9496_v18  ;;  %8957 = vmatmul.mubr.msk.f32.gmra.mxu0 %vm4893_vm8, %v7427_v26 }
0x1048   :  { %8986 = vmatpush3.msra.mxu0 %v10930_v22  ;;  %8959 = vmatprep.mubr.msk.f32.mxu0 %vm9497_vm4, %v9496_v18  ;;  %v7435_v22 = vld [vmem:[%s11452_s17 + $0x88] sm:$0xff] }
0x1049   :  { %8987 = vmatprep.subr.mxu0 %v9496_v18 }
0x104a   :  { %8988 = vmatpush3.msra.mxu0 %v10936_v10 }
0x104b   :  { %8960 = vmatmul.mubr.msk.f32.gmra.mxu0 %vm4893_vm8, %v7428_v29 }
0x104c   :  { %8989 = vmatprep.mubr.msk.f32.mxu0 %vm9497_vm4, %v9496_v18 }
0x104f   :  { %8990 = vmatmul.mubr.msk.f32.vlgmr.msra.gmra.mxu0 %vm4893_vm8, %v7442_v30 }
0x1050   :  { %8992 = vmatprep.mubr.msk.f32.mxu0 %vm9497_vm4, %v9496_v18 }
0x1053   :  { %8993 = vmatmul.mubr.msk.f32.gmra.mxu0 %vm4893_vm8, %v7443_v33 }
0x1054   :  { %8995 = vmatprep.mubr.msk.f32.mxu0 %vm9497_vm4, %v9496_v18 }
0x1057   :  { %8996 = vmatmul.mubr.msk.f32.gmra.mxu0 %vm4893_vm8, %v7444_v34 }
0x1058   :  { %9023 = vmatprep.mubr.msk.f32.mxu0 %vm5873_vm10, %v5871_v60  ;;  %v6290_v60 = vld [vmem:[%s11456_s21] sm:$0xff] }
0x10eb   :  { %v5170_v40 = vpop.f32.mrf.mxu0  ;;  %v5262_v41 = vpop.f32.mrf.mxu1 }
0x10ec   :  { %v11141_v43 = vadd.f32 %v5262_v41, %v5170_v40 }
0x10ed   :  { %v8883_v46 = vpop.f32.mrf.mxu0  ;;  %v8902_v3 = vpop.f32.mrf.mxu1 }
0x10ef   :  { %v5175_v6 = vpop.f32.mrf.mxu0 }
0x10f1   :  { %v8886_v42 = vpop.f32.mrf.mxu0  ;;  %v5267_v1 = vpop.f32.mrf.mxu1 }
0x10f2   :  { %v11143_v5 = vadd.f32 %v5267_v1, %v5175_v6 }
0x10f3   :  { %v5180_v7 = vpop.f32.mrf.mxu0  ;;  %v8905_v44 = vpop.f32.mrf.mxu1 }
0x10f4   :  { %v7458_v44 = vld [vmem:[#allocation19] ss:$0 sm:$0xff] }
0x10f5   :  { %v8889_v8 = vpop.f32.mrf.mxu0  ;;  %v5272_v9 = vpop.f32.mrf.mxu1 }
0x10f6   :  { %v11145_v45 = vadd.f32 %v5272_v9, %v5180_v7 }
0x10f7   :  { %v5355_v0 = vpop.f32.mrf.mxu0  ;;  %v8908_v2 = vpop.f32.mrf.mxu1 }
0x10f8   :  { %8937 = vmatmul.mubr.msk.f32.vlgmr.msra.gmra.mxu1 %vm5091_vm9, %v5355_v0 }
0x10f9   :  { %v8919_v49 = vpop.f32.mrf.mxu0  ;;  %8939 = vmatprep.mubr.msk.f32.mxu1 %vm9497_vm4, %v9496_v18  ;;  %8963 = vmatpush3.msk.msra.mxu1 %vm4903_vm7, %v7437_v11 }
0x10fa   :  { %8964 = vmatprep.subr.mxu1 %v9496_v18  ;;  %v6047_v49 = vld [vmem:[%s11455_s20 + $0x18] sm:$0xff] }
0x10fb   :  { %v5360_v10 = vpop.f32.mrf.mxu0  ;;  %8965 = vmatpush3.msra.mxu1 %v7436_v4  ;;  %v7463_v4 = vld [vmem:[%s11454_s19 + $0x18] sm:$0x3] }
0x10fc   :  { %8940 = vmatmul.mubr.msk.f32.gmra.mxu1 %vm5091_vm9, %v5360_v10  ;;  %8966 = vmatprep.subr.mxu1 %v9496_v18  ;;  %v6046_v10 = vld [vmem:[%s11455_s20 + $0x10] sm:$0xff] }
0x10fd   :  { %v8922_v47 = vpop.f32.mrf.mxu0  ;;  %8942 = vmatprep.mubr.msk.f32.mxu1 %vm9497_vm4, %v9496_v18  ;;  %8967 = vmatpush3.msra.mxu1 %v7435_v22  ;;  %v7472_v22 = vld [vmem:[%s11455_s20 + $0x38] sm:$0xff] }
0x10fe   :  { %8968 = vmatprep.subr.mxu1 %v9496_v18  ;;  %v6045_v47 = vld [vmem:[%s11455_s20 + $0x8] sm:$0xff] }
0x10ff   :  { %v5365_v63 = vpop.f32.mrf.mxu0  ;;  %8969 = vmatpush3.msra.mxu1 %v7434_v14  ;;  %v7471_v14 = vld [vmem:[%s11455_s20 + $0x30] sm:$0xff] }
0x1100   :  { %8943 = vmatmul.mubr.msk.f32.gmra.mxu1 %vm5091_vm9, %v5365_v63  ;;  %8970 = vmatprep.subr.mxu1 %v9496_v18  ;;  %v6044_v63 = vld [vmem:[%s11455_s20] sm:$0xff] }
0x1101   :  { %v8925_v25 = vpop.f32.mrf.mxu0  ;;  %8971 = vmatpush3.msra.mxu1 %v7433_v23  ;;  %8972 = vmatprep.mubr.msk.f32.mxu1 %vm9497_vm4, %v9496_v18  ;;  %v7470_v23 = vld [vmem:[%s11455_s20 + $0x28] sm:$0xff] }
0x1102   :  { %8998 = vmatprep.subr.mxu1 %v9496_v18  ;;  %v7469_v25 = vld [vmem:[%s11455_s20 + $0x20] sm:$0xff] }
0x1103   :  { %v5549_v31 = vpop.f32.mrf.mxu0 }
0x1104   :  { %8973 = vmatmul.mubr.msk.f32.vlgmr.msra.gmra.mxu1 %vm5091_vm9, %v5549_v31 }
0x1105   :  { %v8955_v55 = vpop.f32.mrf.mxu0  ;;  %8975 = vmatprep.mubr.msk.f32.mxu1 %vm9497_vm4, %v9496_v18  ;;  %8999 = vmatpush3.msk.msra.mxu1 %vm4903_vm7, %v7453_v27 }
0x1106   :  { %9000 = vmatprep.subr.mxu1 %v9496_v18 }
0x1107   :  { %v5554_v17 = vpop.f32.mrf.mxu0  ;;  %9001 = vmatpush3.msra.mxu1 %v7452_v37 }
0x1108   :  { %8976 = vmatmul.mubr.msk.f32.gmra.mxu1 %vm5091_vm9, %v5554_v17  ;;  %9002 = vmatprep.subr.mxu1 %v9496_v18 }
0x1109   :  { %v8958_v15 = vpop.f32.mrf.mxu0  ;;  %8978 = vmatprep.mubr.msk.f32.mxu1 %vm9497_vm4, %v9496_v18  ;;  %9003 = vmatpush3.msra.mxu1 %v7451_v12 }
0x110a   :  { %9004 = vmatprep.subr.mxu1 %v9496_v18 }
0x110b   :  { %v5559_v54 = vpop.f32.mrf.mxu0  ;;  %9005 = vmatpush3.msra.mxu1 %v7450_v13 }
0x110c   :  { %8979 = vmatmul.mubr.msk.f32.gmra.mxu1 %vm5091_vm9, %v5559_v54  ;;  %9006 = vmatprep.subr.mxu1 %v9496_v18 }
0x110d   :  { %v8961_v52 = vpop.f32.mrf.mxu0  ;;  %9007 = vmatpush3.msra.mxu1 %v7449_v57  ;;  %9008 = vmatprep.mubr.msk.f32.mxu1 %vm9497_vm4, %v9496_v18 }
0x110f   :  { %v5743_v48 = vpop.f32.mrf.mxu0 }
0x1110   :  { %9009 = vmatmul.mubr.msk.f32.vlgmr.msra.gmra.mxu1 %vm5091_vm9, %v5743_v48 }
0x1111   :  { %v8991_v50 = vpop.f32.mrf.mxu0  ;;  %9011 = vmatprep.mubr.msk.f32.mxu1 %vm9497_vm4, %v9496_v18 }
0x1112   :  { %v7477_v50 = vld [vmem:[%s11458_s23 + $0x2] sm:$0x3] }
0x1113   :  { %v5748_v56 = vpop.f32.mrf.mxu0 }
0x1114   :  { %9012 = vmatmul.mubr.msk.f32.gmra.mxu1 %vm5091_vm9, %v5748_v56  ;;  %v6211_v56 = vld [vmem:[%s11458_s23] sm:$0x3] }
0x1115   :  { %v8994_v58 = vpop.f32.mrf.mxu0  ;;  %9014 = vmatprep.mubr.msk.f32.mxu1 %vm9497_vm4, %v9496_v18 }
0x1116   :  { %v7481_v58 = vld [vmem:[%s11456_s21 + $0x18] sm:$0xff] }
0x1117   :  { %v5753_v61 = vpop.f32.mrf.mxu0 }
0x1118   :  { %9015 = vmatmul.mubr.msk.f32.gmra.mxu1 %vm5091_vm9, %v5753_v61  ;;  %v7480_v61 = vld [vmem:[%s11456_s21 + $0x10] sm:$0xff] }
0x1119   :  { %v8997_v59 = vpop.f32.mrf.mxu0  ;;  %9032 = vmatprep.mubr.msk.f32.mxu1 %vm5873_vm10, %v7462_v62 }
0x111a   :  { %v6291_v59 = vld [vmem:[%s11456_s21 + $0x8] sm:$0xff] }
0x11b8   :  { %v5453_v16 = vpop.f32.mrf.mxu1 }
0x11b9   :  { %v5467_v38 = vadd.f32 %v5453_v16, %v11141_v43 }
0x11ba   :  { %v8938_v51 = vpop.f32.mrf.mxu1 }
0x11bb   :  { %v7484_v51 = vld [vmem:[%s11458_s23 + $0x4] sm:$0x3] }
0x11bc   :  { %v5458_v19 = vpop.f32.mrf.mxu1 }
0x11bd   :  { %v5468_v35 = vadd.f32 %v5458_v19, %v11143_v5 }
0x11be   :  { %v8941_v20 = vpop.f32.mrf.mxu1 }
0x11c0   :  { %v5463_v53 = vpop.f32.mrf.mxu1 }
0x11c1   :  { %v5469_v39 = vadd.f32 %v5463_v53, %v11145_v45  ;;  %v5872_v45 = vld [vmem:[%s11454_s19 + $0x8] sm:$0x3]  ;;  %v7490_v53 = vld [vmem:[%s11458_s23 + $0x6] sm:$0x3] }
0x11c2   :  { %v8944_v21 = vpop.f32.mrf.mxu1 }
0x11c3   :  { %v7496_v21 = vld [vmem:[%s11458_s23 + $0x8] sm:$0x3] }
0x11c4   :  { %v5647_v28 = vpop.f32.mrf.mxu1 }
0x11c5   :  { %v5661_v46 = vadd.f32 %v5647_v28, %v5467_v38  ;;  %v7488_v28 = vld [vmem:[%s11456_s21 + $0x28] sm:$0xff] }
0x11c6   :  { %v8974_v24 = vpop.f32.mrf.mxu1 }
0x11c7   :  { %v7487_v24 = vld [vmem:[%s11456_s21 + $0x20] sm:$0xff] }
0x11c8   :  { %v5652_v26 = vpop.f32.mrf.mxu1 }
0x11c9   :  { %v5662_v40 = vadd.f32 %v5652_v26, %v5468_v35  ;;  %v6995_v26 = vld [vmem:[%s11459_s24 + $0x70] sm:$0xff]  ;;  %v6989_v35 = vld [vmem:[%s11459_s24 + $0x40] sm:$0xff] }
0x11ca   :  { %v8977_v29 = vpop.f32.mrf.mxu1 }
0x11cb   :  { %v6994_v29 = vld [vmem:[%s11459_s24 + $0x68] sm:$0xff] }
0x11cc   :  { %v5657_v30 = vpop.f32.mrf.mxu1 }
0x11cd   :  { %v5663_v3 = vadd.f32 %v5657_v30, %v5469_v39  ;;  %v6993_v30 = vld [vmem:[%s11459_s24 + $0x60] sm:$0xff] }
0x11ce   :  { %v8980_v33 = vpop.f32.mrf.mxu1 }
0x11cf   :  { %v6992_v33 = vld [vmem:[%s11459_s24 + $0x58] sm:$0xff] }
0x11d0   :  { %v5841_v34 = vpop.f32.mrf.mxu1 }
0x11d1   :  { %v5855_v1 = vadd.f32 %v5841_v34, %v5661_v46  ;;  %v6991_v34 = vld [vmem:[%s11459_s24 + $0x50] sm:$0xff]  ;;  %v7494_v46 = vld [vmem:[%s11456_s21 + $0x38] sm:$0xff] }
0x11d2   :  { %v9010_v32 = vpop.f32.mrf.mxu1 }
0x11d3   :  { %v5865_v0 = vadd.f32 %v7458_v44, %v5855_v1  ;;  %v6990_v32 = vld [vmem:[%s11459_s24 + $0x48] sm:$0xff] }
0x11d4   :  { %v5846_v36 = vpop.f32.mrf.mxu1  ;;  %v7500_v1 = vld [vmem:[%s11456_s21 + $0x48] sm:$0xff] }
0x11d5   :  { %v5856_v6 = vadd.f32 %v5846_v36, %v5662_v40  ;;  %v5868_v43 = vmax.f32 %v5865_v0, 0.0  ;;  %v6988_v0 = vld [vmem:[%s11459_s24 + $0x38] sm:$0xff] }
0x11d6   :  { %v9013_v41 = vpop.f32.mrf.mxu1 }
0x11d7   :  { %v5866_v9 = vadd.f32 %v7458_v44, %v5856_v6  ;;  %v7493_v6 = vld [vmem:[%s11456_s21 + $0x30] sm:$0xff] }
0x11d8   :  { %v5851_v42 = vpop.f32.mrf.mxu1 }
0x11d9   :  { %v5857_v7 = vadd.f32 %v5851_v42, %v5663_v3  ;;  %v5869_v5 = vmax.f32 %v5866_v9, 0.0 }
0x11da   :  { %v9016_v8 = vpop.f32.mrf.mxu1 }
0x11db   :  { %v5867_v11 = vadd.f32 %v7458_v44, %v5857_v7  ;;  %v7499_v44 = vld [vmem:[%s11456_s21 + $0x40] sm:$0xff] }
0x11dd   :  { %v5870_v2 = vmax.f32 %v5867_v11, 0.0 }
0x11df   :  { %9017 = vmatprep.subr.msk.mxu0 %vm4903_vm7, %v5870_v2  ;;  %9026 = vmatprep.subr.msk.mxu1 %vm4903_vm7, %v5870_v2 }
0x11e0   :  { %9018 = vmatpush3.msk.msra.mxu0 %vm4903_vm7, %v5870_v2  ;;  %9027 = vmatpush3.msk.msra.mxu1 %vm4903_vm7, %v5870_v2  ;;  %v6987_v2 = vld [vmem:[%s11459_s24 + $0x30] sm:$0xff] }
0x11e1   :  { %9019 = vmatprep.subr.mxu0 %v5869_v5  ;;  %9028 = vmatprep.subr.mxu1 %v5869_v5 }
0x11e2   :  { %9020 = vmatpush3.msra.mxu0 %v5869_v5  ;;  %9029 = vmatpush3.msra.mxu1 %v5869_v5  ;;  %v6986_v5 = vld [vmem:[%s11459_s24 + $0x28] sm:$0xff] }
0x11e3   :  { %9021 = vmatprep.subr.mxu0 %v5868_v43  ;;  %9030 = vmatprep.subr.mxu1 %v5868_v43 }
0x11e4   :  { %9022 = vmatpush3.msra.mxu0 %v5868_v43  ;;  %9031 = vmatpush3.msra.mxu1 %v5868_v43  ;;  %v6985_v43 = vld [vmem:[%s11459_s24 + $0x20] sm:$0xff] }
0x11e5   :  { %9024 = vmatmul.mubr.msk.f32.vlgmr.msra.gmra.mxu0 %vm5873_vm10, %v5872_v45  ;;  %9033 = vmatmul.mubr.msk.f32.vlgmr.msra.gmra.mxu1 %vm5873_vm10, %v7463_v4  ;;  %v6984_v45 = vld [vmem:[%s11459_s24 + $0x18] sm:$0xff]  ;;  %v6983_v4 = vld [vmem:[%s11459_s24 + $0x10] sm:$0xff] }
0x11e6   :  { %9035 = vmatprep.subr.mxu0 %v6047_v49  ;;  %9046 = vmatprep.subr.mxu1 %v7472_v22 }
0x11e7   :  { %9036 = vmatpush3.msra.mxu0 %v6047_v49  ;;  %9047 = vmatpush3.msra.mxu1 %v7472_v22  ;;  %v6982_v49 = vld [vmem:[%s11459_s24 + $0x8] sm:$0xff]  ;;  %v6981_v22 = vld [vmem:[%s11459_s24] sm:$0xff] }
0x11e8   :  { %9037 = vmatprep.subr.mxu0 %v6046_v10  ;;  %9048 = vmatprep.subr.mxu1 %v7471_v14 }
0x11e9   :  { %9038 = vmatpush3.msra.mxu0 %v6046_v10  ;;  %9049 = vmatpush3.msra.mxu1 %v7471_v14 }
0x11ea   :  { %9039 = vmatprep.subr.mxu0 %v6045_v47  ;;  %9050 = vmatprep.subr.mxu1 %v7470_v23 }
0x11eb   :  { %9040 = vmatpush3.msra.mxu0 %v6045_v47  ;;  %9051 = vmatpush3.msra.mxu1 %v7470_v23 }
0x11ec   :  { %9041 = vmatprep.subr.mxu0 %v6044_v63  ;;  %9052 = vmatprep.subr.mxu1 %v7469_v25 }
0x11ed   :  { %9042 = vmatpush3.msra.mxu0 %v6044_v63  ;;  %9053 = vmatpush3.msra.mxu1 %v7469_v25 }
0x11ee   :  { %9064 = vmatprep.subr.mxu1 %v9496_v18  ;;  %9057 = vmatprep.subr.mxu0 %v9496_v18 }
0x12a5   :  { %v9025_v27 = vpop.f32.mrf.mxu0  ;;  %v9034_v31 = vpop.f32.mrf.mxu1 }
0x12a6   :  { %v6043_v17 = vmax.f32 %v9025_v27, %v9034_v31  ;;  %v7502_v31 = vld [vmem:[#allocation21] ss:$0 sm:$0xff] }
0x12a7   :  { %v5949_v37 = vpop.f32.mrf.mxu0  ;;  %v6033_v55 = vpop.f32.mrf.mxu1 }
0x12a8   :  { %v6042_v12 = vmax.f32 %v5949_v37, %v6033_v55 }
0x12aa   :  { %9043 = vmatprep.mubr.msk.f32.mxu0 %vm1272_vm2, %v6042_v12  ;;  %9054 = vmatprep.mubr.msk.f32.mxu1 %vm1272_vm2, %v6042_v12 }
0x12ab   :  { %9044 = vmatmul.mubr.msk.f32.vlgmr.msra.gmra.mxu0 %vm1272_vm2, %v6043_v17  ;;  %9055 = vmatmul.mubr.msk.f32.vlgmr.msra.gmra.mxu1 %vm1272_vm2, %v6043_v17 }
0x12ac   :  { %9068 = vmatprep.mubr.msk.f32.mxu1 %vm9497_vm4, %v9496_v18  ;;  %9061 = vmatprep.mubr.msk.f32.mxu0 %vm9497_vm4, %v9496_v18 }
0x136b   :  { %v9045_v13 = vpop.f32.mrf.mxu0  ;;  %v9056_v15 = vpop.f32.mrf.mxu1 }
0x136c   :  { %v6210_v57 = vmax.f32 %v9045_v13, %v9056_v15 }
0x136d   :  { %v6120_v54 = vpop.f32.mrf.mxu0  ;;  %v6200_v52 = vpop.f32.mrf.mxu1 }
0x136e   :  { %v6209_v48 = vmax.f32 %v6120_v54, %v6200_v52  ;;  %9065 = vmatpush3.msk.msra.mxu1 %vm6216_vm11, %v6210_v57  ;;  %9058 = vmatpush3.msk.msra.mxu0 %vm6216_vm11, %v6210_v57 }
0x136f   :  { %9066 = vmatprep.subr.mxu1 %v9496_v18  ;;  %9059 = vmatprep.subr.mxu0 %v9496_v18 }
0x1370   :  { %9067 = vmatpush3.msra.mxu1 %v6209_v48  ;;  %9060 = vmatpush3.msra.mxu0 %v6209_v48 }
0x1371   :  { %9069 = vmatmul.mubr.msk.f32.vlgmr.msra.gmra.mxu1 %vm6212_vm12, %v7477_v50  ;;  %9062 = vmatmul.mubr.msk.f32.vlgmr.msra.gmra.mxu0 %vm6212_vm12, %v6211_v56 }
0x1372   :  { %9071 = vmatprep.subr.mxu0 %v9496_v18  ;;  %9075 = vmatprep.mubr.msk.f32.mxu0 %vm9497_vm4, %v9496_v18 }
0x1373   :  { %9072 = vmatpush3.msra.mxu0 %v7481_v58  ;;  %9078 = vmatprep.subr.mxu1 %v9496_v18 }
0x1374   :  { %9073 = vmatprep.subr.mxu0 %v9496_v18  ;;  %9082 = vmatprep.mubr.msk.f32.mxu1 %vm9497_vm4, %v9496_v18 }
0x1375   :  { %9074 = vmatpush3.msra.mxu0 %v7480_v61  ;;  %9079 = vmatpush3.msra.mxu1 %v6291_v59 }
0x1376   :  { %9085 = vmatprep.subr.mxu0 %v9496_v18  ;;  %9080 = vmatprep.subr.mxu1 %v9496_v18 }
0x1377   :  { %9081 = vmatpush3.msra.mxu1 %v6290_v60 }
0x1378   :  { %9092 = vmatprep.subr.mxu1 %v9496_v18 }
0x1431   :  { %v6363_v62 = vpop.f32.mrf.mxu1  ;;  %v6286_v16 = vpop.f32.mrf.mxu0 }
0x1432   :  { %9076 = vmatmul.mubr.msk.f32.vlgmr.msra.gmra.mxu0 %vm325_vm1, %v6363_v62  ;;  %9083 = vmatmul.mubr.msk.f32.vlgmr.msra.gmra.mxu1 %vm325_vm1, %v6286_v16 }
0x1433   :  { %9086 = vmatpush3.msk.msra.mxu0 %vm6216_vm11, %v6210_v57  ;;  %9089 = vmatprep.mubr.msk.f32.mxu0 %vm9497_vm4, %v9496_v18  ;;  %v9070_v19 = vpop.f32.mrf.mxu1  ;;  %v9063_v20 = vpop.f32.mrf.mxu0 }
0x1434   :  { %9087 = vmatprep.subr.mxu0 %v9496_v18  ;;  %9096 = vmatprep.mubr.msk.f32.mxu1 %vm9497_vm4, %v9496_v18 }
0x1435   :  { %9088 = vmatpush3.msra.mxu0 %v6209_v48  ;;  %9093 = vmatpush3.msra.mxu1 %v7488_v28 }
0x1436   :  { %9099 = vmatprep.subr.mxu0 %v9496_v18  ;;  %9090 = vmatmul.mubr.msk.f32.vlgmr.msra.gmra.mxu0 %vm6212_vm12, %v7484_v51 }
0x1437   :  { %9100 = vmatpush3.msk.msra.mxu0 %vm6216_vm11, %v6210_v57  ;;  %9103 = vmatprep.mubr.msk.f32.mxu0 %vm9497_vm4, %v9496_v18 }
0x1438   :  { %9101 = vmatprep.subr.mxu0 %v9496_v18  ;;  %9094 = vmatprep.subr.mxu1 %v9496_v18 }
0x1439   :  { %9102 = vmatpush3.msra.mxu0 %v6209_v48  ;;  %9095 = vmatpush3.msra.mxu1 %v7487_v24 }
0x143a   :  { %9113 = vmatprep.subr.mxu0 %v9496_v18  ;;  %9104 = vmatmul.mubr.msk.f32.vlgmr.msra.gmra.mxu0 %vm6212_vm12, %v7490_v53 }
0x143b   :  { %9114 = vmatpush3.msk.msra.mxu0 %vm6216_vm11, %v6210_v57  ;;  %9117 = vmatprep.mubr.msk.f32.mxu0 %vm9497_vm4, %v9496_v18 }
0x143c   :  { %9115 = vmatprep.subr.mxu0 %v9496_v18  ;;  %9106 = vmatprep.subr.mxu1 %v9496_v18 }
0x143d   :  { %9116 = vmatpush3.msra.mxu0 %v6209_v48 }
0x143e   :  { %9118 = vmatmul.mubr.msk.f32.vlgmr.msra.gmra.mxu0 %vm6212_vm12, %v7496_v21  ;;  %9127 = vmatprep.subr.mxu0 %v9496_v18 }
0x143f   :  { %9157 = vmatprep.mubr.msk.f32.mxu0 %vm9497_vm4, %v9496_v18  ;;  %9128 = vmatpush3.msra.mxu0 %v6995_v26 }
0x1440   :  { %9129 = vmatprep.subr.mxu0 %v9496_v18 }
0x1441   :  { %9130 = vmatpush3.msra.mxu0 %v6994_v29 }
0x1442   :  { %9131 = vmatprep.subr.mxu0 %v9496_v18 }
0x1443   :  { %9132 = vmatpush3.msra.mxu0 %v6993_v30 }
0x1444   :  { %9133 = vmatprep.subr.mxu0 %v9496_v18 }
0x1445   :  { %9134 = vmatpush3.msra.mxu0 %v6992_v33 }
0x1446   :  { %9135 = vmatprep.subr.mxu0 %v9496_v18 }
0x1447   :  { %9136 = vmatpush3.msra.mxu0 %v6991_v34 }
0x1448   :  { %9137 = vmatprep.subr.mxu0 %v9496_v18 }
0x1449   :  { %9138 = vmatpush3.msra.mxu0 %v6990_v32 }
0x144a   :  { %9139 = vmatprep.subr.mxu0 %v9496_v18 }
0x144b   :  { %9140 = vmatpush3.msra.mxu0 %v6989_v35 }
0x144c   :  { %9141 = vmatprep.subr.mxu0 %v9496_v18 }
0x144d   :  { %9142 = vmatpush3.msra.mxu0 %v6988_v0 }
0x144e   :  { %9143 = vmatprep.subr.mxu0 %v9496_v18 }
0x144f   :  { %9144 = vmatpush3.msra.mxu0 %v6987_v2 }
0x1450   :  { %9145 = vmatprep.subr.mxu0 %v9496_v18 }
0x1451   :  { %9146 = vmatpush3.msra.mxu0 %v6986_v5 }
0x1452   :  { %9147 = vmatprep.subr.mxu0 %v9496_v18 }
0x1453   :  { %9148 = vmatpush3.msra.mxu0 %v6985_v43 }
0x1454   :  { %9149 = vmatprep.subr.mxu0 %v9496_v18 }
0x1455   :  { %9150 = vmatpush3.msra.mxu0 %v6984_v45 }
0x1456   :  { %9151 = vmatprep.subr.mxu0 %v9496_v18 }
0x1457   :  { %9152 = vmatpush3.msra.mxu0 %v6983_v4 }
0x1458   :  { %9153 = vmatprep.subr.mxu0 %v9496_v18 }
0x1459   :  { %9154 = vmatpush3.msra.mxu0 %v6982_v49 }
0x145a   :  { %9155 = vmatprep.subr.mxu0 %v9496_v18 }
0x145b   :  { %9156 = vmatpush3.msra.mxu0 %v6981_v22 }
0x14f2   :  { %v6439_v36 = vpop.f32.mrf.mxu0  ;;  %v6512_v38 = vpop.f32.mrf.mxu1 }
0x14f3   :  { %v6513_v39 = vadd.f32 %v6512_v38, %v6439_v36 }
0x14f4   :  { %v9077_v40 = vpop.f32.mrf.mxu0  ;;  %v9084_v41 = vpop.f32.mrf.mxu1 }
0x14f6   :  { %v6587_v3 = vpop.f32.mrf.mxu0 }
0x14f7   :  { %9097 = vmatmul.mubr.msk.f32.vlgmr.msra.gmra.mxu1 %vm325_vm1, %v6587_v3 }
0x14f8   :  { %v9091_v42 = vpop.f32.mrf.mxu0  ;;  %9107 = vmatpush3.msra.mxu1 %v7494_v46  ;;  %9110 = vmatprep.mubr.msk.f32.mxu1 %vm9497_vm4, %v9496_v18 }
0x14f9   :  { %9108 = vmatprep.subr.mxu1 %v9496_v18 }
0x14fa   :  { %v6739_v7 = vpop.f32.mrf.mxu0  ;;  %9109 = vmatpush3.msra.mxu1 %v7493_v6 }
0x14fb   :  { %9111 = vmatmul.mubr.msk.f32.vlgmr.msra.gmra.mxu1 %vm325_vm1, %v6739_v7  ;;  %9120 = vmatprep.subr.mxu1 %v9496_v18 }
0x14fc   :  { %v9105_v8 = vpop.f32.mrf.mxu0  ;;  %9121 = vmatpush3.msra.mxu1 %v7500_v1  ;;  %9124 = vmatprep.mubr.msk.f32.mxu1 %vm9497_vm4, %v9496_v18 }
0x14fd   :  { %9122 = vmatprep.subr.mxu1 %v9496_v18  ;;  %v7503_v18 = vld [vmem:[%s11460_s25] ss:$0 sm:$0xff] }
0x14fe   :  { %v6891_v9 = vpop.f32.mrf.mxu0  ;;  %9123 = vmatpush3.msra.mxu1 %v7499_v44 }
0x14ff   :  { %9125 = vmatmul.mubr.msk.f32.vlgmr.msra.gmra.mxu1 %vm325_vm1, %v6891_v9 }
0x1500   :  { %v9119_v11 = vpop.f32.mrf.mxu0 }
0x15b7   :  { %v6663_v10 = vpop.f32.mrf.mxu1 }
0x15b8   :  { %v6667_v23 = vadd.f32 %v6663_v10, %v6513_v39 }
0x15b9   :  { %v9098_v14 = vpop.f32.mrf.mxu1 }
0x15bb   :  { %v6815_v47 = vpop.f32.mrf.mxu1 }
0x15bc   :  { %v6819_v25 = vadd.f32 %v6815_v47, %v6667_v23 }
0x15bd   :  { %v9112_v63 = vpop.f32.mrf.mxu1 }
0x15bf   :  { %v6967_v27 = vpop.f32.mrf.mxu1 }
0x15c0   :  { %v6971_v37 = vadd.f32 %v6967_v27, %v6819_v25 }
0x15c1   :  { %v9126_v55 = vpop.f32.mrf.mxu1 }
0x15c2   :  { %v6979_v12 = vadd.f32 %v7502_v31, %v6971_v37 }
0x15c4   :  { %v6980_v17 = vmax.f32 %v6979_v12, 0.0 }
0x15c6   :  { %9158 = vmatmul.mubr.msk.f32.vlgmr.msra.gmra.mxu0 %vm7003_vm13, %v6980_v17 }
0x1686   :  { %v7073_v13 = vpop.f32.mrf.mxu0 }
0x1687   :  { %v7074_v15 = vadd.f32 %v7503_v18, %v7073_v13 }
0x1688   :  { %v9159_v57 = vpop.f32.mrf.mxu0 }
0x1689   :  { %7078 = vst.msk [vmem:[#allocation22] sm:$0x3] %vm7077_vm14, %v7074_v15 }
0x168a   :  { %9455 = shalt.err (!%p9452_p3)
}
0x168b   :  { %s11495_s15 = sld [smem:[#allocation44_spill]] }
0x1691   :  { %7088 = dma.vmem_to_hbm [thread:$0]  %s7086_s1, 32, %s11495_s15, [#allocation5]  }
0x1692   :  { %9476 = dma.done.wait [#allocation5], 32  }
0x1693   :  { %9477 = vsyncadd [#allocation5], 4294967264 }
0x1694   :  { %9478 = dma.done.wait [#allocation6], 16  }
0x1695   :  { %9479 = vsyncadd [#allocation6], 4294967280 }
0x1696   :  { %7103 = sfence }
0x1697   :  { %7104 = vsyncpa [#allocation4], 1 }
0x1698   :  { %7105 = vsyncpa [#allocation8], 1 }
0x1699   :  { %7106 = vsyncpa [#allocation11], 1 }
0x169a   :  { %7107 = vsyncpa [#allocation14], 1 }
0x169b   :  { %7108 = vsyncpa [#allocation17], 1 }
0x169c   :  { %7109 = vsyncpa [#allocation20], 1 }
0x169d   :  { %7110 = vsyncpa [#allocation5], 1 }
0x169e   :  { %7111 = vsyncpa [#allocation6], 1 }

</bundles_post_ra>
